<compile_context>
chip_gen: v5e
topology: v5e:2x2
jax: 0.10.0
libtpu: 0.0.40
codegen_flags: <defaults>
</compile_context>

<pallas_src>
import functools

import jax
import jax.numpy as jnp
from jax.experimental import pallas as pl
from jax.experimental.pallas import tpu as pltpu


def _pick_vmem_limit():
    try:
        kind = jax.devices()[0].device_kind.lower()
    except Exception:  # pragma: no cover
        kind = ""
    for tag in ("v4", "v5", "v6"):
        if tag in kind:
            return 100 * 1024 * 1024   # 128 MiB physical VMEM parts
    return 40 * 1024 * 1024            # v7x (64 MiB physical) and unknown parts


_VMEM_LIMIT = _pick_vmem_limit()


# ----------------------------------------------------------------------------- utils
def _round_up(x, m):
    return (x + m - 1) // m * m


class _Rng:
    def __init__(self, seed):
        self._key = jax.random.PRNGKey(seed)

    def next(self):
        self._key, k = jax.random.split(self._key)
        return k


def _same_pads(sizes, kernel, stride):
    """TF-style SAME padding, identical to Unit3D.compute_pad / MaxPool3dSamePadding."""
    pads = []
    for s, k, st in zip(sizes, kernel, stride):
        p = max(k - st, 0) if s % st == 0 else max(k - (s % st), 0)
        pads.append((p // 2, p - p // 2))
    return pads


def _flatten_s1(x, kernel, same, cpad, pad_value=0.0):
    """Single jnp.pad + reshape: (D,H,W,C) -> (Dp, rows, cpad) flattened layout for the
    stride-1 shift-and-accumulate kernels.  Row pitch Wp and row counts are padded to 16
    so in-kernel dy*Wp offsets are sublane-aligned for bf16."""
    kd, kh, kw = kernel
    D, H, W, C = x.shape
    if same:
        pads = _same_pads((D, H, W), kernel, (1, 1, 1))
        Do, Ho, Wo = D, H, W
    else:
        pads = ((0, 0), (0, 0), (0, 0))
        Do, Ho, Wo = D - kd + 1, H - kh + 1, W - kw + 1
    Dp = D + pads[0][0] + pads[0][1]
    Hp = H + pads[1][0] + pads[1][1]
    Wp = W + pads[2][0] + pads[2][1]
    Wp_al = _round_up(Wp, 16)
    mrows = (Ho - 1) * Wp_al + Wo
    mp = _round_up(mrows, 16)
    need = (kh - 1) * Wp_al + (kw - 1) + mp
    extra_h = max(0, -(-(need - Hp * Wp_al) // Wp_al))
    Hp_ext = Hp + extra_h
    xp = jnp.pad(
        x,
        (pads[0],
         (pads[1][0], pads[1][1] + extra_h),
         (pads[2][0], pads[2][1] + (Wp_al - Wp)),
         (0, cpad - C)),
        constant_values=pad_value)
    xf = xp.reshape(Dp, Hp_ext * Wp_al, cpad)
    geo = dict(Do=Do, Ho=Ho, Wo=Wo, Wp=Wp_al, mrows=mrows, mp=mp, sin=Hp_ext * Wp_al)
    return xf, geo


def _unflatten_s1(out, geo, cout):
    """(Do, mp, N) flat output -> (Do, Ho, Wo, cout); drops garbage pad rows/cols."""
    Do, Ho, Wo, Wp, mrows = geo["Do"], geo["Ho"], geo["Wo"], geo["Wp"], geo["mrows"]
    out = out[:, :mrows, :]
    out = jnp.pad(out, ((0, 0), (0, Ho * Wp - mrows), (0, 0)))
    return out.reshape(Do, Ho, Wp, -1)[:, :, :Wo, :cout]


# ----------------------------------------------------------------- Pallas kernel bodies
def _mm_affine_kernel(a_ref, b_ref, s_ref, c_ref, o_ref, *, relu):
    """o = relu?( (A @ B) * scale + shift ); K handled as one block."""
    y = jnp.dot(a_ref[...], b_ref[...], preferred_element_type=jnp.float32)
    y = y * s_ref[...] + c_ref[...]
    if relu:
        y = jnp.maximum(y, 0.0)
    o_ref[...] = y.astype(o_ref.dtype)


def _conv3d_flat_kernel(x_ref, w_ref, s_ref, c_ref, o_ref, acc_ref,
                        *, kh, kw, wp, cin, mp, relu):
    """Implicit-GEMM stride-1 conv3d.  Grid = (Do, kd): one temporal output slice per d,
    temporal taps kz as the (innermost) reduction axis.  Spatial taps are shifted slices
    of the flattened padded activation; they accumulate into a local f32 value and hit
    the VMEM scratch accumulator once per kz step."""
    kz = pl.program_id(1)

    @pl.when(kz == 0)
    def _init():
        acc_ref[...] = jnp.zeros_like(acc_ref)

    khwc = kh * kw * cin
    slab_len = (kh - 1) * wp + mp
    part = None
    for dx in range(kw):
        slab = x_ref[0, dx:dx + slab_len, :]                 # one unaligned hoist per dx
        for dy in range(kh):
            xs = slab[dy * wp:dy * wp + mp, :]               # 16-aligned slice
            start = kz * khwc + (dy * kw + dx) * cin
            wt = w_ref[pl.ds(start, cin), :]                 # resident weights, pl.ds
            contrib = jnp.dot(xs, wt, preferred_element_type=jnp.float32)
            part = contrib if part is None else part + contrib
    acc_ref[...] += part

    @pl.when(kz == pl.num_programs(1) - 1)
    def _finalize():
        y = acc_ref[...] * s_ref[...] + c_ref[...]
        if relu:
            y = jnp.maximum(y, 0.0)
        o_ref[0] = y.astype(o_ref.dtype)


def _pool3d_flat_kernel(x_ref, o_ref, acc_ref, *, kh, kw, wp, mp, op, inv):
    """Stride-1 max/avg pool using the same shifted-slice scheme (local tap accumulation,
    bf16 max / f32 avg accumulator)."""
    kz = pl.program_id(1)
    slab_len = (kh - 1) * wp + mp
    part = None
    for dx in range(kw):
        slab = x_ref[0, dx:dx + slab_len, :]
        for dy in range(kh):
            v = slab[dy * wp:dy * wp + mp, :]
            if op == "avg":
                v = v.astype(jnp.float32)
            if part is None:
                part = v
            elif op == "max":
                part = jnp.maximum(part, v)
            else:
                part = part + v

    @pl.when(kz == 0)
    def _init():
        acc_ref[...] = part

    @pl.when(kz > 0)
    def _update():
        if op == "max":
            acc_ref[...] = jnp.maximum(acc_ref[...], part)
        else:
            acc_ref[...] = acc_ref[...] + part

    @pl.when(kz == pl.num_programs(1) - 1)
    def _finalize():
        r = acc_ref[...]
        if op == "avg":
            r = r * inv
        o_ref[0] = r.astype(o_ref.dtype)


def _tc_group_kernel(x_ref, w_ref, s_ref, t_ref, dww_ref, dwb_ref, ps_ref, pt_ref,
                     o_ref, *, S, T, npb, P, nbp):
    """One Timeception group, fully fused: grouped 1x1x1 conv (+bias / folded BN),
    branches 2-4 depthwise temporal convs (k=3, dil 1/2/3, zero temporal padding),
    branch-5 temporal max pool (k=2, zero end padding) + BN, ReLU, and the
    (2,1,1)/(2,1,1) temporal downsampling max pool."""
    M = T * S
    Mext = x_ref.shape[1]
    y = jnp.dot(x_ref[0], w_ref[0], preferred_element_type=jnp.float32)
    y = y * s_ref[0] + t_ref[0]
    rows = jax.lax.broadcasted_iota(jnp.int32, (Mext, 1), 0)
    y = jnp.where((rows >= P) & (rows < P + M), y, 0.0)      # zero temporal padding rows

    parts = [y[P:P + M, 0:npb]]                               # branch 1 (BN folded)
    for bi, dil in ((1, 1), (2, 2), (3, 3)):                  # branches 2-4
        col = y[:, bi * npb:(bi + 1) * npb]
        acc = dwb_ref[0, :, (bi - 1) * npb:bi * npb]
        for tap in range(3):
            off = P + (tap - 1) * dil * S
            acc = acc + col[off:off + M, :] * dww_ref[0, tap:tap + 1,
                                                      (bi - 1) * npb:bi * npb]
        parts.append(acc)
    c5 = y[:, 4 * npb:5 * npb]                                # branch 5: maxpool(2,1,1)
    parts.append(jnp.maximum(c5[P:P + M, :], c5[P + S:P + S + M, :]))
    parts.append(jnp.zeros((M, nbp - 5 * npb), jnp.float32))  # lane-dense pad
    z = jnp.concatenate(parts, axis=-1)
    z = jnp.maximum(z * ps_ref[0] + pt_ref[0], 0.0)           # branch-5 BN affine + ReLU

    To = T // 2                                               # temporal downsample 2x
    for t2 in range(To):
        a = z[(2 * t2) * S:(2 * t2 + 1) * S, :]
        b = z[(2 * t2 + 1) * S:(2 * t2 + 2) * S, :]
        o_ref[0, t2 * S:(t2 + 1) * S, :] = jnp.maximum(a, b).astype(o_ref.dtype)
    if o_ref.shape[1] > To * S:
        o_ref[0, To * S:, :] = jnp.zeros((o_ref.shape[1] - To * S, nbp), o_ref.dtype)


# ----------------------------------------------------------------- Pallas call wrappers
@functools.partial(jax.jit, static_argnames=("relu", "out_dtype"))
def _matmul_affine(a, w, s, t, *, relu, out_dtype):
    M, K = a.shape
    Np = w.shape[1]
    a = a.astype(jnp.bfloat16)
    if M <= 512:
        tm = _round_up(M, 8)
    else:
        tm = 512 if M % 512 == 0 else 256
    Mp = _round_up(M, tm)
    if Mp != M:
        a = jnp.pad(a, ((0, Mp - M), (0, 0)))
    tn = Np if Np <= 768 else (256 if Np % 256 == 0 else 128)
    out = pl.pallas_call(
        functools.partial(_mm_affine_kernel, relu=relu),
        out_shape=jax.ShapeDtypeStruct((Mp, Np), out_dtype),
        grid_spec=pltpu.PrefetchScalarGridSpec(
            num_scalar_prefetch=0,
            grid=(Mp // tm, Np // tn),
            in_specs=[
                pl.BlockSpec((tm, K), lambda i, j: (i, 0)),
                pl.BlockSpec((K, tn), lambda i, j: (0, j)),
                pl.BlockSpec((1, tn), lambda i, j: (0, j)),
                pl.BlockSpec((1, tn), lambda i, j: (0, j)),
            ],
            out_specs=pl.BlockSpec((tm, tn), lambda i, j: (i, j)),
        ),
        compiler_params=pltpu.CompilerParams(
            dimension_semantics=("parallel", "parallel"),
            vmem_limit_bytes=_VMEM_LIMIT),
    )(a, w, s, t)
    return out[:M]


def matmul_affine(x2d, p, relu, out_dtype=jnp.bfloat16):
    return _matmul_affine(x2d, p["w"], p["scale"], p["shift"], relu=relu,
                          out_dtype=out_dtype)


@functools.partial(jax.jit, static_argnames=("kernel", "relu", "cin_p", "cout", "np_"))
def _conv3d_s1(x, w, s, t, *, kernel, relu, cin_p, cout, np_):
    kd, kh, kw = kernel
    xf, g = _flatten_s1(x.astype(jnp.bfloat16), kernel, True, cin_p)
    Do, mp, sin, Wp = g["Do"], g["mp"], g["sin"], g["Wp"]
    out = pl.pallas_call(
        functools.partial(_conv3d_flat_kernel, kh=kh, kw=kw, wp=Wp, cin=cin_p, mp=mp,
                          relu=relu),
        out_shape=jax.ShapeDtypeStruct((Do, mp, np_), jnp.bfloat16),
        grid_spec=pltpu.PrefetchScalarGridSpec(
            num_scalar_prefetch=0,
            grid=(Do, kd),
            in_specs=[
                pl.BlockSpec((1, sin, cin_p), lambda d, kz: (d + kz, 0, 0)),
                pl.BlockSpec((kd * kh * kw * cin_p, np_), lambda d, kz: (0, 0)),
                pl.BlockSpec((1, np_), lambda d, kz: (0, 0)),
                pl.BlockSpec((1, np_), lambda d, kz: (0, 0)),
            ],
            out_specs=pl.BlockSpec((1, mp, np_), lambda d, kz: (d, 0, 0)),
            scratch_shapes=[pltpu.VMEM((mp, np_), jnp.float32)],
        ),
        compiler_params=pltpu.CompilerParams(
            dimension_semantics=("parallel", "arbitrary"),
            vmem_limit_bytes=_VMEM_LIMIT),
    )(xf, w, s, t)
    return _unflatten_s1(out, g, cout)


def conv3d_same(x, p, relu=True):
    return _conv3d_s1(x, p["w"], p["scale"], p["shift"], kernel=p["kernel"], relu=relu,
                      cin_p=p["cin_p"], cout=p["cout"], np_=p["Np"])


@functools.partial(jax.jit, static_argnames=("kernel", "op", "same", "cpad"))
def _pool3d_s1(x, *, kernel, op, same, cpad):
    kd, kh, kw = kernel
    xf, g = _flatten_s1(x.astype(jnp.bfloat16), kernel, same, cpad)
    Do, mp, sin, Wp = g["Do"], g["mp"], g["sin"], g["Wp"]
    inv = 1.0 / float(kd * kh * kw)
    acc_dtype = jnp.float32 if op == "avg" else jnp.bfloat16
    out = pl.pallas_call(
        functools.partial(_pool3d_flat_kernel, kh=kh, kw=kw, wp=Wp, mp=mp, op=op, inv=inv),
        out_shape=jax.ShapeDtypeStruct((Do, mp, cpad), jnp.bfloat16),
        grid_spec=pltpu.PrefetchScalarGridSpec(
            num_scalar_prefetch=0,
            grid=(Do, kd),
            in_specs=[pl.BlockSpec((1, sin, cpad), lambda d, kz: (d + kz, 0, 0))],
            out_specs=pl.BlockSpec((1, mp, cpad), lambda d, kz: (d, 0, 0)),
            scratch_shapes=[pltpu.VMEM((mp, cpad), acc_dtype)],
        ),
        compiler_params=pltpu.CompilerParams(
            dimension_semantics=("parallel", "arbitrary"),
            vmem_limit_bytes=_VMEM_LIMIT),
    )(xf)
    return _unflatten_s1(out, g, cpad)


def pool3d_s1(x, kernel, op, same=True, cpad=None):
    """Stride-1 pool.  Returned channel width is `cpad` (padded channels stay attached so
    the following 1x1 conv consumes a lane-dense tensor)."""
    if cpad is None:
        cpad = x.shape[-1]
    return _pool3d_s1(x, kernel=tuple(kernel), op=op, same=same, cpad=int(cpad))


@functools.partial(jax.jit, static_argnames=("kernel", "stride"))
def _maxpool3d_strided(x, *, kernel, stride):
    # TODO(synk): spatially strided max pools stay as fused XLA strided-slice reductions
    # (exact output size, zero padding); strided sublane selection is not expressed in
    # the flat Pallas pool kernel.
    kd, kh, kw = kernel
    sd, sh, sw = stride
    D, H, W, C = x.shape
    pads = _same_pads((D, H, W), kernel, stride)
    Do, Ho, Wo = -(-D // sd), -(-H // sh), -(-W // sw)
    xp = jnp.pad(x, (pads[0], pads[1], pads[2], (0, 0)))
    out = None
    for dz in range(kd):
        for dy in range(kh):
            for dx in range(kw):
                v = xp[dz:dz + sd * (Do - 1) + 1:sd,
                       dy:dy + sh * (Ho - 1) + 1:sh,
                       dx:dx + sw * (Wo - 1) + 1:sw, :]
                out = v if out is None else jnp.maximum(out, v)
    return out


def maxpool3d_strided(x, kernel, stride):
    return _maxpool3d_strided(x, kernel=tuple(kernel), stride=tuple(stride))


@functools.partial(jax.jit, static_argnames=("kernel", "stride", "cout", "kp", "np_"))
def _conv1a_apply(x, w, s, t, *, kernel, stride, cout, kp, np_):
    """Conv3d_1a_7x7: one-off implicit im2col (stride applied during patch extraction)
    feeding the standard tiled matmul kernel with K=1029->1152."""
    kd, kh, kw = kernel
    sd, sh, sw = stride
    D, H, W, C = x.shape
    pads = _same_pads((D, H, W), kernel, stride)
    Do, Ho, Wo = -(-D // sd), -(-H // sh), -(-W // sw)
    xp = jnp.pad(x.astype(jnp.bfloat16), (pads[0], pads[1], pads[2], (0, 0)))
    cols = []
    for dz in range(kd):
        for dy in range(kh):
            for dx in range(kw):
                cols.append(xp[dz:dz + sd * (Do - 1) + 1:sd,
                               dy:dy + sh * (Ho - 1) + 1:sh,
                               dx:dx + sw * (Wo - 1) + 1:sw, :])
    K = kd * kh * kw * C
    cols.append(jnp.zeros((Do, Ho, Wo, kp - K), jnp.bfloat16))
    a = jnp.concatenate(cols, axis=-1).reshape(Do * Ho * Wo, kp)
    y = _matmul_affine(a, w, s, t, relu=True, out_dtype=jnp.bfloat16)
    return y[:, :cout].reshape(Do, Ho, Wo, cout)


def conv1a_apply(x, p):
    return _conv1a_apply(x, p["w"], p["scale"], p["shift"], kernel=p["kernel"],
                         stride=(2, 2, 2), cout=p["cout"], kp=p["Kp"], np_=p["Np"])


@functools.partial(jax.jit, static_argnames=("S", "T", "npb", "P", "Mo_p", "nbp"))
def _tc_fused(xg, gw, gs, gt, dww, dwb, ps, pt, *, S, T, npb, P, Mo_p, nbp):
    G, Mext, cpg = xg.shape
    return pl.pallas_call(
        functools.partial(_tc_group_kernel, S=S, T=T, npb=npb, P=P, nbp=nbp),
        out_shape=jax.ShapeDtypeStruct((G, Mo_p, nbp), jnp.bfloat16),
        grid_spec=pltpu.PrefetchScalarGridSpec(
            num_scalar_prefetch=0,
            grid=(G,),
            in_specs=[
                pl.BlockSpec((1, Mext, cpg), lambda g: (g, 0, 0)),
                pl.BlockSpec((1, cpg, nbp), lambda g: (g, 0, 0)),
                pl.BlockSpec((1, 1, nbp), lambda g: (g, 0, 0)),
                pl.BlockSpec((1, 1, nbp), lambda g: (g, 0, 0)),
                pl.BlockSpec((1, 3, 3 * npb), lambda g: (g, 0, 0)),
                pl.BlockSpec((1, 1, 3 * npb), lambda g: (g, 0, 0)),
                pl.BlockSpec((1, 1, nbp), lambda g: (g, 0, 0)),
                pl.BlockSpec((1, 1, nbp), lambda g: (g, 0, 0)),
            ],
            out_specs=pl.BlockSpec((1, Mo_p, nbp), lambda g: (g, 0, 0)),
        ),
        compiler_params=pltpu.CompilerParams(
            dimension_semantics=("parallel",),
            vmem_limit_bytes=_VMEM_LIMIT),
    )(xg, gw, gs, gt, dww, dwb, ps, pt)


# ------------------------------------------------------------------ parameter packing
def _raw_unit3d(rng, cin, cout, kernel, use_bn=True, use_bias=False):
    kd, kh, kw = kernel
    fan_in = cin * kd * kh * kw
    w = jax.random.normal(rng.next(), (kd, kh, kw, cin, cout), jnp.float32)
    w = w * (2.0 / fan_in) ** 0.5
    bias = (0.05 * jax.random.normal(rng.next(), (cout,), jnp.float32)
            if use_bias else jnp.zeros((cout,), jnp.float32))
    if use_bn:  # fold eval-mode BN (eps=1e-3 as in Unit3D) into an affine at init
        gamma = 1.0 + 0.05 * jax.random.normal(rng.next(), (cout,), jnp.float32)
        beta = 0.05 * jax.random.normal(rng.next(), (cout,), jnp.float32)
        mean = jnp.zeros((cout,), jnp.float32)
        var = jnp.ones((cout,), jnp.float32)
        s = gamma * jax.lax.rsqrt(var + 1e-3)
        scale, shift = s, beta + s * (bias - mean)
    else:
        scale, shift = jnp.ones((cout,), jnp.float32), bias
    return w, scale, shift


def _pack_affine(scale, shift, Np):
    cout = scale.shape[0]
    s = jnp.pad(scale.astype(jnp.float32), (0, Np - cout), constant_values=1.0)
    t = jnp.pad(shift.astype(jnp.float32), (0, Np - cout))
    return s.reshape(1, Np), t.reshape(1, Np)


def pack_conv_params(rng, cin, cout, kernel):
    w, scale, shift = _raw_unit3d(rng, cin, cout, kernel)
    kd, kh, kw = kernel
    cin_p = _round_up(cin, 16)
    Np = _round_up(cout, 128)
    w = jnp.pad(w, ((0, 0), (0, 0), (0, 0), (0, cin_p - cin), (0, Np - cout)))
    wf = w.reshape(kd * kh * kw * cin_p, Np).astype(jnp.bfloat16)
    s, t = _pack_affine(scale, shift, Np)
    return dict(kernel=kernel, cin_p=cin_p, cout=cout, Np=Np, w=wf, scale=s, shift=t)


def pack_conv1a_params(rng, cin, cout, kernel):
    w, scale, shift = _raw_unit3d(rng, cin, cout, kernel)
    kd, kh, kw = kernel
    K = kd * kh * kw * cin
    Kp = _round_up(K, 128)
    Np = _round_up(cout, 128)
    w2 = jnp.pad(w.reshape(K, cout), ((0, Kp - K), (0, Np - cout))).astype(jnp.bfloat16)
    s, t = _pack_affine(scale, shift, Np)
    return dict(kernel=kernel, cout=cout, K=K, Kp=Kp, Np=Np, w=w2, scale=s, shift=t)


def pack_matmul_params(w2d, scale, shift):
    cin, cout = w2d.shape
    Np = _round_up(cout, 128)
    w = jnp.pad(w2d, ((0, 0), (0, Np - cout))).astype(jnp.bfloat16)
    s, t = _pack_affine(scale, shift, Np)
    return dict(cout=cout, Np=Np, w=w, scale=s, shift=t)


def pack_unit1x1_params(rng, cin, cout, use_bn=True, use_bias=False, cin_pad=None):
    w, scale, shift = _raw_unit3d(rng, cin, cout, (1, 1, 1), use_bn, use_bias)
    w2 = w.reshape(cin, cout)
    if cin_pad is not None and cin_pad > cin:
        w2 = jnp.pad(w2, ((0, cin_pad - cin), (0, 0)))
    return pack_matmul_params(w2, scale, shift)


def unit1x1_apply(x, p, relu=True):
    D, H, W, C = x.shape
    y = matmul_affine(x.reshape(-1, C), p, relu=relu)
    return y[:, :p["cout"]].reshape(D, H, W, p["cout"])


# ------------------------------------------------------------------ I3D backbone
_INCEPTION_CFG = [
    ("Mixed_3b", 192, (64, 96, 128, 16, 32, 32)),
    ("Mixed_3c", 256, (128, 128, 192, 32, 96, 64)),
    ("Mixed_4b", 480, (192, 96, 208, 16, 48, 64)),
    ("Mixed_4c", 512, (160, 112, 224, 24, 64, 64)),
    ("Mixed_4d", 512, (128, 128, 256, 24, 64, 64)),
    ("Mixed_4e", 512, (112, 144, 288, 32, 64, 64)),
    ("Mixed_4f", 528, (256, 160, 320, 32, 128, 128)),
    ("Mixed_5b", 832, (256, 160, 320, 32, 128, 128)),
    ("Mixed_5c", 832, (384, 192, 384, 48, 128, 128)),
]


def make_inception_params(rng, cin, oc):
    # b0, b1a, b2a share the block input -> fuse their 1x1x1 convs into one matmul.
    w0, s0, t0 = _raw_unit3d(rng, cin, oc[0], (1, 1, 1))
    w1a, s1a, t1a = _raw_unit3d(rng, cin, oc[1], (1, 1, 1))
    w2a, s2a, t2a = _raw_unit3d(rng, cin, oc[3], (1, 1, 1))
    b1b = pack_conv_params(rng, oc[1], oc[2], (3, 3, 3))
    b2b = pack_conv_params(rng, oc[3], oc[4], (3, 3, 3))
    pool_cpad = _round_up(cin, 128)     # pool output stays 128-padded into b3b
    b3b = pack_unit1x1_params(rng, cin, oc[5], cin_pad=pool_cpad)
    wf = jnp.concatenate([w0.reshape(cin, -1), w1a.reshape(cin, -1),
                          w2a.reshape(cin, -1)], axis=1)
    fused = pack_matmul_params(wf, jnp.concatenate([s0, s1a, s2a]),
                               jnp.concatenate([t0, t1a, t2a]))
    fused["splits"] = (oc[0], oc[1], oc[3])
    return dict(fused=fused, b1b=b1b, b2b=b2b, b3b=b3b, pool_cpad=pool_cpad)


def make_i3d_params(rng, in_channels=3):
    P = {}
    P["Conv3d_1a_7x7"] = pack_conv1a_params(rng, in_channels, 64, (7, 7, 7))
    P["Conv3d_2b_1x1"] = pack_unit1x1_params(rng, 64, 64)
    P["Conv3d_2c_3x3"] = pack_conv_params(rng, 64, 192, (3, 3, 3))
    for name, cin, oc in _INCEPTION_CFG:
        P[name] = make_inception_params(rng, cin, oc)
    return P


def inception_apply(x, p):
    D, H, W, Cin = x.shape
    c0, c1, c2 = p["fused"]["splits"]
    y = matmul_affine(x.reshape(-1, Cin), p["fused"], relu=True)
    b0 = y[:, :c0].reshape(D, H, W, c0)
    x1 = y[:, c0:c0 + c1].reshape(D, H, W, c1)
    x2 = y[:, c0 + c1:c0 + c1 + c2].reshape(D, H, W, c2)
    b1 = conv3d_same(x1, p["b1b"])
    b2 = conv3d_same(x2, p["b2b"])
    xp = pool3d_s1(x, (3, 3, 3), "max", same=True, cpad=p["pool_cpad"])  # zero pad = F.pad
    b3 = unit1x1_apply(xp, p["b3b"])
    return jnp.concatenate([b0, b1, b2, b3], axis=-1)


def i3d_features(x, P):
    """InceptionI3d.forward(x, no_logits=True): features up to Mixed_5c."""
    x = conv1a_apply(x, P["Conv3d_1a_7x7"])
    x = maxpool3d_strided(x, (1, 3, 3), (1, 2, 2))            # MaxPool3d_2a_3x3
    x = unit1x1_apply(x, P["Conv3d_2b_1x1"])
    x = conv3d_same(x, P["Conv3d_2c_3x3"])
    x = maxpool3d_strided(x, (1, 3, 3), (1, 2, 2))            # MaxPool3d_3a_3x3
    for name in ("Mixed_3b", "Mixed_3c"):
        x = inception_apply(x, P[name])
    x = maxpool3d_strided(x, (3, 3, 3), (2, 2, 2))            # MaxPool3d_4a_3x3
    for name in ("Mixed_4b", "Mixed_4c", "Mixed_4d", "Mixed_4e", "Mixed_4f"):
        x = inception_apply(x, P[name])
    x = maxpool3d_strided(x, (2, 2, 2), (2, 2, 2))            # MaxPool3d_5a_2x2
    for name in ("Mixed_5b", "Mixed_5c"):
        x = inception_apply(x, P[name])
    return x   # (T/8, H/32, W/32, 1024)


# ------------------------------------------------------------------ Timeception
def make_tc_params(rng, c_in, n_layers=1, n_groups=8, expansion=1.25):
    layers = []
    for _ in range(n_layers):
        n_branches = 5
        npb = int(c_in * expansion / float(n_branches * n_groups))
        n_out = npb * n_groups * n_branches
        cpg = c_in // n_groups
        eps = 1e-5
        nb = 5 * npb
        nbp = _round_up(nb, 128)
        gw, gs, gt, dww, dwb, ps, pt = [], [], [], [], [], [], []
        for _g in range(n_groups):
            conv_w, conv_b, bns = [], [], []
            for _b in range(5):        # 1x1x1 channel-reduction conv per branch
                w = jax.random.normal(rng.next(), (cpg, npb), jnp.float32) * (2.0 / cpg) ** 0.5
                conv_w.append(w)
                conv_b.append(0.05 * jax.random.normal(rng.next(), (npb,), jnp.float32))
            for _b in range(5):        # BatchNorm3d per branch (eval-mode stats)
                gamma = 1.0 + 0.05 * jax.random.normal(rng.next(), (npb,), jnp.float32)
                beta = 0.05 * jax.random.normal(rng.next(), (npb,), jnp.float32)
                sb = gamma * jax.lax.rsqrt(jnp.ones((npb,), jnp.float32) + eps)
                bns.append((sb, beta))
            wcat = jnp.concatenate(conv_w, axis=1)                 # (cpg, 5*npb)
            gw.append(jnp.pad(wcat, ((0, 0), (0, nbp - nb))))
            # branch 1: fold its BN into the 1x1 conv affine; branches 2-5 keep conv bias.
            ss = jnp.concatenate([bns[0][0]] + [jnp.ones((npb,), jnp.float32)] * 4)
            ts = jnp.concatenate([bns[0][1] + bns[0][0] * conv_b[0]] + conv_b[1:])
            gs.append(jnp.pad(ss, (0, nbp - nb)))
            gt.append(jnp.pad(ts, (0, nbp - nb)))
            # depthwise temporal convs (k=3, dil 1/2/3) with their BN folded in
            ws, bs = [], []
            for bi in (2, 3, 4):
                w = jax.random.normal(rng.next(), (3, npb), jnp.float32) * (1.0 / 3.0) ** 0.5
                bvec = 0.05 * jax.random.normal(rng.next(), (npb,), jnp.float32)
                s_, t_ = bns[bi - 1]
                ws.append(w * s_[None, :])
                bs.append(s_ * bvec + t_)
            dww.append(jnp.concatenate(ws, axis=1))                # (3, 3*npb)
            dwb.append(jnp.concatenate(bs))                        # (3*npb,)
            # post affine (identity for b1-b4, BN for b5), applied before the ReLU
            ps.append(jnp.concatenate([jnp.ones((4 * npb,), jnp.float32), bns[4][0],
                                       jnp.zeros((nbp - nb,), jnp.float32)]))
            pt.append(jnp.concatenate([jnp.zeros((4 * npb,), jnp.float32), bns[4][1],
                                       jnp.zeros((nbp - nb,), jnp.float32)]))
        layers.append(dict(
            n_groups=n_groups, cpg=cpg, npb=npb, n_out=n_out, nbp=nbp,
            gw=jnp.stack(gw).astype(jnp.bfloat16),                 # (G, cpg, nbp)
            gs=jnp.stack(gs)[:, None, :], gt=jnp.stack(gt)[:, None, :],
            dww=jnp.stack(dww), dwb=jnp.stack(dwb)[:, None, :],
            ps=jnp.stack(ps)[:, None, :], pt=jnp.stack(pt)[:, None, :]))
        c_in = n_out
    return layers


def tc_layer_apply(f, lp):
    """One Timeception layer on channels-last (T, H, W, C): a single fused Pallas kernel
    per group + one wrapper transpose for the channel shuffle."""
    T, H, W, _C = f.shape
    G, cpg, npb, nbp = lp["n_groups"], lp["cpg"], lp["npb"], lp["nbp"]
    S = H * W
    M = T * S
    P = 3 * S                      # temporal zero-padding rows (max dilation = 3)
    To = T // 2
    Mext = _round_up(M + 2 * P, 16)
    Mo_p = _round_up(To * S, 8)
    xg = f.reshape(M, G, cpg).transpose(1, 0, 2).astype(jnp.bfloat16)
    xg = jnp.pad(xg, ((0, 0), (P, Mext - M - P), (0, 0)))
    out = _tc_fused(xg, lp["gw"], lp["gs"], lp["gt"], lp["dww"], lp["dwb"],
                    lp["ps"], lp["pt"], S=S, T=T, npb=npb, P=P, Mo_p=Mo_p, nbp=nbp)
    # concat [b1..b5] per group, channel shuffle, reshape
    # TODO(synk): assumes the reference concat order is group-major / branch-major inside.
    z = out[:, :To * S, :5 * npb]
    z = z.transpose(1, 2, 0).reshape(To * S, 5 * npb * G)
    return z.reshape(To, H, W, lp["n_out"])


# ------------------------------------------------------------------ full model
class InceptionI3dTcPallas:
    def __init__(self, input_size, num_classes=2, in_channels=3, num_tc_layers=1,
                 dropout_keep_prob=0.5, freeze_i3d=False):
        del input_size, dropout_keep_prob, freeze_i3d   # dropout is identity at inference
        rng = _Rng(0)
        self.num_classes = num_classes
        self.i3d_params = make_i3d_params(rng, in_channels)
        self.tc_params = make_tc_params(rng, 1024, n_layers=num_tc_layers)
        c_out = self.tc_params[-1]["n_out"]
        w, scale, shift = _raw_unit3d(rng, c_out, num_classes, (1, 1, 1),
                                      use_bn=False, use_bias=True)
        self.logits_params = pack_matmul_params(w.reshape(c_out, num_classes), scale, shift)

    def __call__(self, x):
        # x: (N, C, T, H, W) float32 (NCDHW, like PyTorch)
        outs = []
        for n in range(x.shape[0]):   # TODO(synk): batch loop not folded into the grids
            xi = jnp.transpose(x[n], (1, 2, 3, 0)).astype(jnp.float32)   # (T, H, W, C)
            f = i3d_features(xi, self.i3d_params)                        # (T/8, H/32, W/32, 1024)
            for lp in self.tc_params:
                f = tc_layer_apply(f, lp)                                # (T/16, ., ., 1280)
            Tf, Hf, Wf, Cf = f.shape
            # AvgPool3d(kernel=[2,7,7], stride=(1,1,1)).  TODO(synk): the window is
            # clamped to the actual feature size so small demo inputs stay valid; for
            # the canonical 224x224 input this is exactly [2, 7, 7].
            ak = (min(2, Tf), min(7, Hf), min(7, Wf))
            f = pool3d_s1(f, ak, "avg", same=False)
            # Dropout: identity at inference.
            Do, Ho, Wo, _ = f.shape
            y = matmul_affine(f.reshape(-1, Cf), self.logits_params, relu=False,
                              out_dtype=jnp.float32)[:, :self.num_classes]
            y = y.reshape(Do, Ho, Wo, self.num_classes)
            y = jnp.transpose(y, (3, 0, 1, 2))[:, :, 0, 0]               # squeeze(3).squeeze(3)
            outs.append(y)
        return jnp.stack(outs, axis=0)                                   # (N, num_classes, T')


if __name__ == "__main__":
    # Small demo input: 64x64 spatial (I3D downsamples spatially 32x -> 2x2 features) and
    # 32 frames (-> T'=1 after the I3D /8 and Timeception /2 temporal downsampling).
    # The full I3D + Timeception channel widths and layer structure are kept.
    N, C, T, H, W = 1, 3, 32, 64, 64
    model = InceptionI3dTcPallas([N, C, T, H, W], num_classes=2, in_channels=C,
                                 num_tc_layers=1)
    x = jax.random.normal(jax.random.PRNGKey(0), (N, C, T, H, W), jnp.float32)
    y = model(x)
    y = jax.block_until_ready(y)
    assert y.shape == (N, 2, 1), y.shape
    assert bool(jnp.all(jnp.isfinite(y)))
    print("KERNEL_OK")
</pallas_src>

<mosaic_0001>
module attributes {stable_mosaic.version = 11 : i64} {
  func.func @_mm_affine_kernel(%arg0: i32, %arg1: i32, %arg2: memref<512x1152xbf16, #tpu.memory_space<vmem>>, %arg3: memref<1152x128xbf16, #tpu.memory_space<vmem>>, %arg4: memref<1x128xf32, #tpu.memory_space<vmem>>, %arg5: memref<1x128xf32, #tpu.memory_space<vmem>>, %arg6: memref<512x128xbf16, #tpu.memory_space<vmem>>) attributes {dimension_semantics = [#tpu.dimension_semantics<parallel>, #tpu.dimension_semantics<parallel>], iteration_bounds = array<i64: 32, 1>, scalar_prefetch = 0 : i64, scratch_operands = 0 : i64, tpu.core_type = #tpu.core_type<tc>, window_params = [{transform_indices = @transform_0, window_bounds = array<i64: 512, 1152>}, {transform_indices = @transform_1, window_bounds = array<i64: 1152, 128>}, {transform_indices = @transform_2, window_bounds = array<i64: 1, 128>}, {transform_indices = @transform_3, window_bounds = array<i64: 1, 128>}, {transform_indices = @transform_4, window_bounds = array<i64: 512, 128>}]} {
    %c0 = arith.constant 0 : index
    %c0_0 = arith.constant 0 : index
    %0 = vector.load %arg2[%c0, %c0_0] : memref<512x1152xbf16, #tpu.memory_space<vmem>>, vector<512x1152xbf16>
    %c0_1 = arith.constant 0 : index
    %c0_2 = arith.constant 0 : index
    %1 = vector.load %arg3[%c0_1, %c0_2] : memref<1152x128xbf16, #tpu.memory_space<vmem>>, vector<1152x128xbf16>
    %cst = arith.constant dense<0.000000e+00> : vector<512x128xf32>
    %2 = tpu.matmul %0, %1, %cst {dimension_numbers = #tpu.dot_dimension_numbers<[1], [0], [0], [1], [0, 0, 1, 1], [], []>} : vector<512x1152xbf16>, vector<1152x128xbf16>, vector<512x128xf32> -> vector<512x128xf32>
    %c0_3 = arith.constant 0 : index
    %c0_4 = arith.constant 0 : index
    %3 = vector.load %arg4[%c0_3, %c0_4] : memref<1x128xf32, #tpu.memory_space<vmem>>, vector<1x128xf32>
    %4 = vector.broadcast %3 : vector<1x128xf32> to vector<512x128xf32>
    %5 = arith.mulf %2, %4 : vector<512x128xf32>
    %c0_5 = arith.constant 0 : index
    %c0_6 = arith.constant 0 : index
    %6 = vector.load %arg5[%c0_5, %c0_6] : memref<1x128xf32, #tpu.memory_space<vmem>>, vector<1x128xf32>
    %7 = vector.broadcast %6 : vector<1x128xf32> to vector<512x128xf32>
    %8 = arith.addf %5, %7 : vector<512x128xf32>
    %cst_7 = arith.constant 0.000000e+00 : f32
    %9 = vector.broadcast %cst_7 : f32 to vector<512x128xf32>
    %10 = arith.maximumf %8, %9 : vector<512x128xf32>
    %11 = arith.truncf %10 : vector<512x128xf32> to vector<512x128xbf16>
    %c0_8 = arith.constant 0 : index
    %c0_9 = arith.constant 0 : index
    %12 = vector.load %arg6[%c0_8, %c0_9] : memref<512x128xbf16, #tpu.memory_space<vmem>>, vector<512x128xbf16>
    tpu.vector_store %arg6[%c0_8, %c0_9], %11 {strides = array<i32>} : memref<512x128xbf16, #tpu.memory_space<vmem>>, vector<512x128xbf16>,
    return
  }
  func.func @transform_0(%arg0: i32, %arg1: i32) -> (i32, i32) {
    %c0_i32 = arith.constant 0 : i32
    %c0_i32_0 = arith.constant 0 : i32
    return %arg0, %c0_i32 : i32, i32
  }
  func.func @transform_1(%arg0: i32, %arg1: i32) -> (i32, i32) {
    %c0_i32 = arith.constant 0 : i32
    %c0_i32_0 = arith.constant 0 : i32
    return %c0_i32, %arg1 : i32, i32
  }
  func.func @transform_2(%arg0: i32, %arg1: i32) -> (i32, i32) {
    %c0_i32 = arith.constant 0 : i32
    %c0_i32_0 = arith.constant 0 : i32
    return %c0_i32, %arg1 : i32, i32
  }
  func.func @transform_3(%arg0: i32, %arg1: i32) -> (i32, i32) {
    %c0_i32 = arith.constant 0 : i32
    %c0_i32_0 = arith.constant 0 : i32
    return %c0_i32, %arg1 : i32, i32
  }
  func.func @transform_4(%arg0: i32, %arg1: i32) -> (i32, i32) {
    %c0_i32 = arith.constant 0 : i32
    return %arg0, %arg1 : i32, i32
  }
}

</mosaic_0001>

<bundles_post_ra>
// kernel: _matmul_affine.1
= control target key start
LH: loop header
LB: loop body
LE: loop exit
PB: predicated region body
PF: predicated region fallthrough
CT: control target
= control target key end

     0   :  { %s8331_s0 = inlined_call_operand.hbm [shape: bf16[16384,1152], index: 0, kind: input, shape index: {}]   ;;  %s8332_s1 = inlined_call_operand.hbm [shape: bf16[1152,128], index: 1, kind: input, shape index: {}]   ;;  %s8333_s2 = inlined_call_operand.hbm [shape: f32[1,128], index: 2, kind: input, shape index: {}]   ;;  %s8334_s3 = inlined_call_operand.hbm [shape: f32[1,128], index: 3, kind: input, shape index: {}]   ;;  %s8335_s4 = inlined_call_operand.hbm [shape: bf16[16384,128], index: 4, kind: output, shape index: {}]  }
   0x1   :  { %8336 = sst [smem:[#allocation43_spill]] %s8332_s1 }
   0x2   :  { %9 = vsyncpa [#allocation3], 0 }
   0x3   :  { %11 = vsyncpa [#allocation3 + $0x1], 0 }
   0x4   :  { %12 = vsyncpa [#allocation6], 0 }
   0x5   :  { %13 = vsyncpa [#allocation9], 0 }
   0x6   :  { %14 = vsyncpa [#allocation4], 0 }
   0x7   :  { %16 = vsyncpa [#allocation4 + $0x1], 0  ;;  %s7040_s15 = smov 0   ;;  %s7042_s16 = smov 0  }
   0x8   :  { %s7044_s17 = smov 0   ;;  %s7046_s18 = smov 0  }
   0x9   :  { %s7048_s19 = smov 0   ;;  %s7050_s20 = smov 0  }
   0xa LB: > { %s4650_s21 = sadd.s32 4294967295, %s7004_s20   ;;  %s4651_s22 = sadd.s32 4294967294, %s7004_s20   ;;  %s7004_s20 = sphi %s7050_s20, %s22_s20   ;;  %s7000_s19 = sphi %s7048_s19, %s8447_s19   ;;  %s6996_s18 = sphi %s7046_s18, %s8446_s18   ;;  %s6992_s17 = sphi %s7044_s17, %s8445_s17   ;;  %s6988_s16 = sphi %s7042_s16, %s8444_s16   ;;  %s6984_s15 = sphi %s7040_s15, %s8443_s15  }
   0xb   : > { %p54_p0 = scmp.ne.s32.totalorder %s6988_s16, %s6984_s15  ;;  %p7074_p1 = scmp.eq.s32.totalorder %s4650_s21, 0 }
   0xc   : > { %p7078_p2 = scmp.eq.s32.totalorder %s4650_s21, 31  ;;  %p164_p3 = scmp.eq.s32.totalorder %s4651_s22, 31 }
   0xd   : > { %p7084_p4 = por %p7074_p1, %p54_p0  ;;  %p4652_p5 = scmp.ge.s32.totalorder %s7004_s20, 1 }
   0xe   : > { %p7089_p6 = por %p164_p3, %p54_p0  ;;  %p171_p7 = scmp.lt.s32.totalorder %s7004_s20, 33 }
   0xf   : > { %s8341_s1 = sld [smem:[#allocation43_spill]]  ;;  %s7006_s5 = smov [#allocation5]  }
  0x10   : > { %p7097_p8 = pnand %p4652_p5, %p171_p7  ;;  %s186_s6 = sshll.u32 %s7006_s5, 4  ;;  %s187_s6 = int_to_ptr.vmem [resolvable:$true] %s186_s6 }
  0x11   : > { %s200_s10 = sshll.u32 %s8333_s2, 4  ;;  %s7007_s11 = smov 64   ;;  %s201_s10 = int_to_ptr.hbm [resolvable:$true] %s200_s10 }
  0x12   : > { %p6705_p9 = pneg %p7097_p8  ;;  %s7008_s12 = smov 4  }
  0x13   : > { %s7009_s13 = smov [#allocation7]   ;;  %s213_s27 = sshll.u32 %s8334_s3, 4  ;;  %s214_s27 = int_to_ptr.hbm [resolvable:$true] %s213_s27 }
  0x14   : > { %p7105_p10 = pnand %p6705_p9, %p7074_p1  ;;  %s202_s14 = sshll.u32 %s7009_s13, 4  ;;  %s203_s14 = int_to_ptr.vmem [resolvable:$true] %s202_s14 }
  0x15   : > { %s184_s29 = sshll.u32 %s8341_s1, 4  ;;  %s7010_s28 = smov [#allocation8]   ;;  %s185_s29 = int_to_ptr.hbm [resolvable:$true] %s184_s29 }
  0x16   : > { %6708 = dma.hbm_to_vmem [thread:$0]  (!%p7105_p10), %s185_s29, 9216, %s187_s6, [#allocation6], %s7007_s11, %s7007_s11, %s7008_s12  }
  0x17   : > { %6711 = dma.hbm_to_vmem [thread:$0]  (!%p7105_p10), %s201_s10, 16, %s203_s14, [#allocation6]  }
  0x18   : > { %s215_s5 = sshll.u32 %s7010_s28, 4  ;;  %s34_s29 = sadd.s32 1, %s7000_s19  ;;  %s216_s5 = int_to_ptr.vmem [resolvable:$true] %s215_s5 }
  0x19   : > { %6714 = dma.hbm_to_vmem [thread:$0]  (!%p7105_p10), %s214_s27, 16, %s216_s5, [#allocation9]  }
  0x1a   : > { %p36_p11 = scmp.ge.s32.totalorder %s34_s29, 32  ;;  %s41_s6 = sadd.s32 1, %s6992_s17 }
  0x1b   : > { %p48_p12 = scmp.ne.s32.totalorder %s6992_s17, %s6988_s16  ;;  %p49_p13 = scmp.eq.s32.totalorder %s7004_s20, 0 }
  0x1c   : > { %s8449_s29 = smov (%p36_p11, %s34_s29), 0  ;;  %p6726_p5 = scmp.lt.s32.totalorder %s7004_s20, 32 }
  0x1d   : > { %p50_p0 = por %p49_p13, %p48_p12  ;;  %p7130_p3 = por %p7078_p2, %p48_p12 }
  0x1e   : > { %s38_s9 = ssub.s32 %s7000_s19, %s8449_s29  ;;  %s226_s7 = sand.u32 1, %s6992_s17  }
  0x1f   : > { %p39_p7 = scmp.eq.s32.totalorder %s38_s9, 0  ;;  %s6686_s10 = smul.u32 2304, %s226_s7 }
  0x20   : > { %s6687_s12 = smul.u32 2304, %s7000_s19  ;;  %p6716_p9 = pnand %p6726_p5, %p50_p0 }
  0x21   : > { %s7139_s11 = scalar_select %p39_p7, %s6992_s17, %s41_s6  }
  0x22   : > { %s230_s13 = scalar_lea.vmem [#allocation2], %s6686_s10  ;;  %s236_s27 = scalar_lea.hbm %s8331_s0, %s6687_s12 }
  0x23   : > { %s239_s14 = sshll.u32 %s230_s13, 4  ;;  %s237_s24 = sshll.u32 %s236_s27, 4  ;;  %s240_s14 = int_to_ptr.vmem [resolvable:$true] %s239_s14  ;;  %s238_s24 = int_to_ptr.hbm [resolvable:$true] %s237_s24 }
  0x24   : > { %s227_s28 = scalar_lea.sflag [#allocation3], %s226_s7  ;;  %s7011_s5 = smov 576  }
  0x25   : > { %s7012_s1 = smov 36   ;;  %251 = sbr.rel (%p7097_p8) target bundleno = 1377 (0x561), region = 36 }
  0x26   : > { %6718 = dma.hbm_to_vmem [thread:$0]  (!%p6716_p9), %s238_s24, 36864, %s240_s14, %s227_s28, %s7011_s5, %s7011_s5, %s7012_s1  }
  0x2a   : > { %s7148_s6 = sand.u32 1, %s6988_s16  }
  0x2b   : > { %s6688_s9 = smul.u32 2304, %s7148_s6  ;;  %s254_s10 = scalar_lea.sflag [#allocation3], %s7148_s6 }
  0x2d   : > { %s7152_s13 = scalar_lea.vmem [#allocation2], %s6688_s9 }
  0x2e   : > { %6967 = dma.done.wait (%p7084_p4), %s254_s10, 36864  }
  0x2f   : > { %6969 = vsyncadd (%p7084_p4), %s254_s10, 4294930432 }
  0x30   : > { %6971 = dma.done.wait (%p7074_p1), [#allocation6], 9232  }
  0x31   : > { %6973 = vsyncadd (%p7074_p1), [#allocation6], 4294958064 }
  0x32   : > { %6975 = dma.done.wait (%p7074_p1), [#allocation9], 16  }
  0x33   : > { %6977 = vsyncadd (%p7074_p1), [#allocation9], 4294967280  ;;  %v6405_v0 = vld [vmem:[#allocation5 + $0x38] sm:$0xff]  ;;  %v6404_v1 = vld [vmem:[#allocation5 + $0x30] sm:$0xff]  ;;  %s4664_s1 = sshll.u32 %s7148_s6, 8  ;;  %s6470_s25 = sshll.u32 %s6996_s18, 8 }
  0x34   : > { %6662 = vmatpush.bf16.msra.mxu1 %v6405_v0  ;;  %6663 = vmatpush.bf16.msra.mxu2 %v6405_v0  ;;  %v6403_v2 = vld [vmem:[#allocation5 + $0x28] sm:$0xff]  ;;  %v6402_v3 = vld [vmem:[#allocation5 + $0x20] sm:$0xff]  ;;  %v6401_v4 = vld [vmem:[#allocation5 + $0x18] sm:$0xff]  ;;  %s7903_s23 = scalar_lea.vmem [#allocation10], %s4664_s1  ;;  %s4530_s12 = scalar_lea.hbm %s8335_s4, %s6470_s25 }
  0x35   : > { %6664 = vmatpush.bf16.msra.mxu3 %v6405_v0  ;;  %2668 = vmatpush.bf16.msra.mxu0 %v6405_v0  ;;  %v6400_v5 = vld [vmem:[#allocation5 + $0x10] sm:$0xff]  ;;  %v6399_v6 = vld [vmem:[#allocation5 + $0x8] sm:$0xff]  ;;  %v6398_v7 = vld [vmem:[#allocation5] sm:$0xff]  ;;  %s4531_s14 = sshll.u32 %s7903_s23, 4  ;;  %s4533_s21 = sshll.u32 %s4530_s12, 4  ;;  %s4532_s14 = int_to_ptr.vmem [resolvable:$true] %s4531_s14  ;;  %s4534_s21 = int_to_ptr.hbm [resolvable:$true] %s4533_s21 }
  0x36   : > { %v4955_v8 = vld [vmem:[%s7152_s13 + $0x240] sm:$0xf]  ;;  %v6186_v9 = vld [vmem:[%s7152_s13 + $0x260] sm:$0xf0]  ;;  %v6421_v16 = vld [vmem:[#allocation5 + $0xb8] sm:$0xff]  ;;  %s4518_s18 = scalar_lea.sflag [#allocation4], %s7148_s6 }
  0x37   : > { %v5243_v10 = vld [vmem:[%s7152_s13 + $0x480] sm:$0xf]  ;;  %v6258_v11 = vld [vmem:[%s7152_s13 + $0x4a0] sm:$0xf0]  ;;  %v6429_v17 = vld [vmem:[#allocation5 + $0xf8] sm:$0xff]  ;;  %v4956_v18 = vor.u32 %v6186_v9, %v4955_v8  ;;  %s6928_s22 = sshra.s32 %s4534_s21, 4  ;;  %s6929_s22 = int_to_ptr.hbm [resolvable:$true] %s6928_s22 }
  0x38   : > { %6665 = vmatpush.bf16.msra.mxu1 %v6404_v1  ;;  %6666 = vmatpush.bf16.msra.mxu2 %v6404_v1  ;;  %v5531_v12 = vld [vmem:[%s7152_s13 + $0x6c0] sm:$0xf]  ;;  %v6330_v13 = vld [vmem:[%s7152_s13 + $0x6e0] sm:$0xf0]  ;;  %v5244_v19 = vor.u32 %v6258_v11, %v5243_v10  ;;  %v6413_v22 = vld [vmem:[#allocation5 + $0x78] sm:$0xff]  ;;  %s6930_s27 = scalar_lea.hbm %s6929_s22, 256  ;;  %p6935_p8 = scmp.lt.s32.totalorder %s6929_s22, %s8335_s4 }
  0x39   : > { %6667 = vmatpush.bf16.msra.mxu3 %v6404_v1  ;;  %2669 = vmatpush.bf16.msra.mxu0 %v6404_v1  ;;  %v4667_v14 = vld [vmem:[%s7152_s13] sm:$0xf]  ;;  %v6114_v15 = vld [vmem:[%s7152_s13 + $0x20] sm:$0xf0]  ;;  %v5532_v20 = vor.u32 %v6330_v13, %v5531_v12  ;;  %v6437_v23 = vld [vmem:[#allocation5 + $0x138] sm:$0xff]  ;;  %p6931_p1 = scmp.ne.s32.totalorder %s6929_s22, %s6930_s27  ;;  %s6934_s5 = scalar_lea.hbm %s8335_s4, 8192 }
  0x3a   : > { %v4668_v21 = vor.u32 %v6114_v15, %v4667_v14  ;;  %v6420_v24 = vld [vmem:[#allocation5 + $0xb0] sm:$0xff]  ;;  %v6419_v28 = vld [vmem:[#allocation5 + $0xa8] sm:$0xff]  ;;  %v6418_v44 = vld [vmem:[#allocation5 + $0xa0] sm:$0xff]  ;;  %p6936_p10 = scmp.lt.s32.totalorder %s6934_s5, %s6930_s27 }
  0x3b   : > { %v6428_v25 = vld [vmem:[#allocation5 + $0xf0] sm:$0xff]  ;;  %v6427_v29 = vld [vmem:[#allocation5 + $0xe8] sm:$0xff]  ;;  %v6426_v45 = vld [vmem:[#allocation5 + $0xe0] sm:$0xff]  ;;  %p6932_p2 = pnand %p6931_p1, %p7130_p3 }
  0x3c   : > { %6668 = vmatpush.bf16.msra.mxu1 %v6403_v2  ;;  %6669 = vmatpush.bf16.msra.mxu2 %v6403_v2  ;;  %v6412_v26 = vld [vmem:[#allocation5 + $0x70] sm:$0xff]  ;;  %v6411_v30 = vld [vmem:[#allocation5 + $0x68] sm:$0xff]  ;;  %v6410_v46 = vld [vmem:[#allocation5 + $0x60] sm:$0xff]  ;;  %p6937_p11 = por %p6936_p10, %p6935_p8 }
  0x3d   : > { %6670 = vmatpush.bf16.msra.mxu3 %v6403_v2  ;;  %2670 = vmatpush.bf16.msra.mxu0 %v6403_v2  ;;  %v6436_v27 = vld [vmem:[#allocation5 + $0x130] sm:$0xff]  ;;  %v6435_v31 = vld [vmem:[#allocation5 + $0x128] sm:$0xff]  ;;  %v6434_v47 = vld [vmem:[#allocation5 + $0x120] sm:$0xff]  ;;  %p6933_p4 = pneg %p6932_p2 }
  0x3e   : > { %v4991_v32 = vld [vmem:[%s7152_s13 + $0x288] sm:$0xf]  ;;  %v6195_v33 = vld [vmem:[%s7152_s13 + $0x2a8] sm:$0xf0]  ;;  %v5027_v48 = vld [vmem:[%s7152_s13 + $0x2d0] sm:$0xf] }
  0x3f   : > { %v5279_v34 = vld [vmem:[%s7152_s13 + $0x4c8] sm:$0xf]  ;;  %v6267_v35 = vld [vmem:[%s7152_s13 + $0x4e8] sm:$0xf0]  ;;  %v4992_v40 = vor.u32 %v6195_v33, %v4991_v32  ;;  %v6204_v49 = vld [vmem:[%s7152_s13 + $0x2f0] sm:$0xf0]  ;;  %p6938_p12 = pnand %p6937_p11, %p6933_p4 }
  0x40   : > { %6671 = vmatpush.bf16.msra.mxu1 %v6402_v3  ;;  %6672 = vmatpush.bf16.msra.mxu2 %v6402_v3  ;;  %v5567_v36 = vld [vmem:[%s7152_s13 + $0x708] sm:$0xf]  ;;  %v6339_v37 = vld [vmem:[%s7152_s13 + $0x728] sm:$0xf0]  ;;  %v5280_v41 = vor.u32 %v6267_v35, %v5279_v34  ;;  %v5315_v50 = vld [vmem:[%s7152_s13 + $0x510] sm:$0xf]  ;;  %v5028_v56 = vor.u32 %v6204_v49, %v5027_v48 }
  0x41   : > { %6673 = vmatpush.bf16.msra.mxu3 %v6402_v3  ;;  %2671 = vmatpush.bf16.msra.mxu0 %v6402_v3  ;;  %v4703_v38 = vld [vmem:[%s7152_s13 + $0x48] sm:$0xf]  ;;  %v6123_v39 = vld [vmem:[%s7152_s13 + $0x68] sm:$0xf0]  ;;  %v5568_v42 = vor.u32 %v6339_v37, %v5567_v36  ;;  %v6276_v51 = vld [vmem:[%s7152_s13 + $0x530] sm:$0xf0] }
  0x42   : > { %v4704_v43 = vor.u32 %v6123_v39, %v4703_v38  ;;  %v5603_v52 = vld [vmem:[%s7152_s13 + $0x750] sm:$0xf]  ;;  %v6348_v53 = vld [vmem:[%s7152_s13 + $0x770] sm:$0xf0]  ;;  %v5316_v57 = vor.u32 %v6276_v51, %v5315_v50  ;;  %v6417_v60 = vld [vmem:[#allocation5 + $0x98] sm:$0xff] }
  0x43   : > { %v4739_v54 = vld [vmem:[%s7152_s13 + $0x90] sm:$0xf]  ;;  %v6132_v55 = vld [vmem:[%s7152_s13 + $0xb0] sm:$0xf0]  ;;  %v5604_v58 = vor.u32 %v6348_v53, %v5603_v52  ;;  %v6425_v61 = vld [vmem:[#allocation5 + $0xd8] sm:$0xff] }
  0x44   : > { %6674 = vmatpush.bf16.msra.mxu1 %v6401_v4  ;;  %6675 = vmatpush.bf16.msra.mxu2 %v6401_v4  ;;  %v4740_v59 = vor.u32 %v6132_v55, %v4739_v54  ;;  %v6409_v62 = vld [vmem:[#allocation5 + $0x58] sm:$0xff]  ;;  %v6416_v12 = vld [vmem:[#allocation5 + $0x90] sm:$0xff]  ;;  %v5135_v32 = vld [vmem:[%s7152_s13 + $0x3a8] sm:$0xf] }
  0x45   : > { %6676 = vmatpush.bf16.msra.mxu3 %v6401_v4  ;;  %2672 = vmatpush.bf16.msra.mxu0 %v6401_v4  ;;  %v6433_v63 = vld [vmem:[#allocation5 + $0x118] sm:$0xff]  ;;  %v6424_v13 = vld [vmem:[#allocation5 + $0xd0] sm:$0xff]  ;;  %v6231_v33 = vld [vmem:[%s7152_s13 + $0x3c8] sm:$0xf0] }
  0x46   : > { %v5063_v0 = vld [vmem:[%s7152_s13 + $0x318] sm:$0xf]  ;;  %v6213_v1 = vld [vmem:[%s7152_s13 + $0x338] sm:$0xf0]  ;;  %v6408_v14 = vld [vmem:[#allocation5 + $0x50] sm:$0xff] }
  0x47   : > { %v5351_v2 = vld [vmem:[%s7152_s13 + $0x558] sm:$0xf]  ;;  %v6285_v3 = vld [vmem:[%s7152_s13 + $0x578] sm:$0xf0]  ;;  %v5064_v8 = vor.u32 %v6213_v1, %v5063_v0  ;;  %v6432_v15 = vld [vmem:[#allocation5 + $0x110] sm:$0xff] }
  0x48   : > { %6677 = vmatpush.bf16.msra.mxu1 %v6400_v5  ;;  %6678 = vmatpush.bf16.msra.mxu2 %v6400_v5  ;;  %v5639_v4 = vld [vmem:[%s7152_s13 + $0x798] sm:$0xf]  ;;  %v5352_v9 = vor.u32 %v6285_v3, %v5351_v2  ;;  %v5423_v34 = vld [vmem:[%s7152_s13 + $0x5e8] sm:$0xf]  ;;  %v6303_v35 = vld [vmem:[%s7152_s13 + $0x608] sm:$0xf0] }
  0x49   : > { %6679 = vmatpush.bf16.msra.mxu3 %v6400_v5  ;;  %2673 = vmatpush.bf16.msra.mxu0 %v6400_v5  ;;  %v6357_v5 = vld [vmem:[%s7152_s13 + $0x7b8] sm:$0xf0]  ;;  %v5711_v36 = vld [vmem:[%s7152_s13 + $0x828] sm:$0xf]  ;;  %v6375_v37 = vld [vmem:[%s7152_s13 + $0x848] sm:$0xf0] }
  0x4a   : > { %v5640_v10 = vor.u32 %v6357_v5, %v5639_v4  ;;  %v4847_v38 = vld [vmem:[%s7152_s13 + $0x168] sm:$0xf]  ;;  %v6159_v39 = vld [vmem:[%s7152_s13 + $0x188] sm:$0xf0]  ;;  %v5171_v48 = vld [vmem:[%s7152_s13 + $0x3f0] sm:$0xf] }
  0x4b   : > { %v6240_v49 = vld [vmem:[%s7152_s13 + $0x410] sm:$0xf0]  ;;  %v5459_v50 = vld [vmem:[%s7152_s13 + $0x630] sm:$0xf]  ;;  %v5207_v0 = vld [vmem:[%s7152_s13 + $0x438] sm:$0xf] }
  0x4c   : > { %6680 = vmatpush.bf16.msra.mxu1 %v6399_v6  ;;  %6681 = vmatpush.bf16.msra.mxu2 %v6399_v6  ;;  %v6312_v51 = vld [vmem:[%s7152_s13 + $0x650] sm:$0xf0]  ;;  %v5747_v52 = vld [vmem:[%s7152_s13 + $0x870] sm:$0xf]  ;;  %v6249_v1 = vld [vmem:[%s7152_s13 + $0x458] sm:$0xf0] }
  0x4d   : > { %6682 = vmatpush.bf16.msra.mxu3 %v6399_v6  ;;  %2674 = vmatpush.bf16.msra.mxu0 %v6399_v6  ;;  %v4775_v6 = vld [vmem:[%s7152_s13 + $0xd8] sm:$0xf]  ;;  %v6384_v53 = vld [vmem:[%s7152_s13 + $0x890] sm:$0xf0]  ;;  %v4883_v54 = vld [vmem:[%s7152_s13 + $0x1b0] sm:$0xf] }
  0x4e   : > { %v6168_v55 = vld [vmem:[%s7152_s13 + $0x1d0] sm:$0xf0]  ;;  %v5495_v2 = vld [vmem:[%s7152_s13 + $0x678] sm:$0xf]  ;;  %v6321_v3 = vld [vmem:[%s7152_s13 + $0x698] sm:$0xf0] }
  0x4f   : > { %v5783_v4 = vld [vmem:[%s7152_s13 + $0x8b8] sm:$0xf]  ;;  %v6393_v5 = vld [vmem:[%s7152_s13 + $0x8d8] sm:$0xf0] }
  0x50   : > { %6683 = vmatpush.bf16.msra.mxu1 %v6398_v7  ;;  %6684 = vmatpush.bf16.msra.mxu2 %v6398_v7 }
  0x51   : > { %6685 = vmatpush.bf16.msra.mxu3 %v6398_v7  ;;  %2675 = vmatpush.bf16.msra.mxu0 %v6398_v7  ;;  %v6141_v7 = vld [vmem:[%s7152_s13 + $0xf8] sm:$0xf0] }
  0x52   : > { %v4776_v11 = vor.u32 %v6141_v7, %v4775_v6  ;;  %v4919_v6 = vld [vmem:[%s7152_s13 + $0x1f8] sm:$0xf]  ;;  %v6177_v7 = vld [vmem:[%s7152_s13 + $0x218] sm:$0xf0] }
  0x53   : > { %2716 = vmatmul.bf16.vlgmr.msra.gmra.mxu1 %v4956_v18  ;;  %2756 = vmatmul.bf16.vlgmr.msra.gmra.mxu2 %v5244_v19  ;;  %v5387_v18 = vld [vmem:[%s7152_s13 + $0x5a0] sm:$0xf]  ;;  %v6294_v19 = vld [vmem:[%s7152_s13 + $0x5c0] sm:$0xf0] }
  0x54   : > { %3006 = vmatpush.bf16.msrb.mxu2 %v6421_v16  ;;  %2796 = vmatmul.bf16.vlgmr.msra.gmra.mxu3 %v5532_v20  ;;  %v5099_v16 = vld [vmem:[%s7152_s13 + $0x360] sm:$0xf] }
  0x55   : > { %3175 = vmatpush.bf16.msrb.mxu3 %v6429_v17  ;;  %2676 = vmatmul.bf16.vlgmr.msra.gmra.mxu0 %v4668_v21  ;;  %v6222_v17 = vld [vmem:[%s7152_s13 + $0x380] sm:$0xf0]  ;;  %v5675_v20 = vld [vmem:[%s7152_s13 + $0x7e0] sm:$0xf] }
  0x56   : > { %2837 = vmatpush.bf16.msrb.mxu1 %v6413_v22  ;;  %3344 = vmatpush.bf16.msrb.mxu0 %v6437_v23  ;;  %v6366_v21 = vld [vmem:[%s7152_s13 + $0x800] sm:$0xf0]  ;;  %v4811_v22 = vld [vmem:[%s7152_s13 + $0x120] sm:$0xf] }
  0x57   : > { %v6150_v23 = vld [vmem:[%s7152_s13 + $0x140] sm:$0xf0] }
  0x58   : > { %3007 = vmatpush.bf16.msrb.mxu2 %v6420_v24  ;;  %v5100_v24 = vor.u32 %v6222_v17, %v5099_v16  ;;  %v6111_v16 = vld [vmem:[%s7152_s13 + $0xc] sm:$0xf]  ;;  %v4677_v17 = vld [vmem:[%s7152_s13 + $0x2c] sm:$0xf0] }
  0x59   : > { %3176 = vmatpush.bf16.msrb.mxu3 %v6428_v25  ;;  %v5388_v25 = vor.u32 %v6294_v19, %v5387_v18  ;;  %v4683_v18 = vld [vmem:[%s7152_s13 + $0x10] sm:$0xf]  ;;  %v6116_v19 = vld [vmem:[%s7152_s13 + $0x30] sm:$0xf0] }
  0x5a   : > { %2838 = vmatpush.bf16.msrb.mxu1 %v6412_v26  ;;  %3345 = vmatpush.bf16.msrb.mxu0 %v6436_v27  ;;  %v5676_v26 = vor.u32 %v6366_v21, %v5675_v20  ;;  %v4812_v27 = vor.u32 %v6150_v23, %v4811_v22  ;;  %v4680_v23 = vor.u32 %v6111_v16, %v4677_v17  ;;  %v4791_v16 = vld [vmem:[%s7152_s13 + $0xe8] sm:$0xf]  ;;  %v6143_v17 = vld [vmem:[%s7152_s13 + $0x108] sm:$0xf0] }
  0x5c   : > { %3008 = vmatpush.bf16.msrb.mxu2 %v6419_v28  ;;  %v6415_v28 = vld [vmem:[#allocation5 + $0x88] sm:$0xff] }
  0x5d   : > { %3177 = vmatpush.bf16.msrb.mxu3 %v6427_v29  ;;  %v6423_v29 = vld [vmem:[#allocation5 + $0xc8] sm:$0xff] }
  0x5e   : > { %2839 = vmatpush.bf16.msrb.mxu1 %v6411_v30  ;;  %3346 = vmatpush.bf16.msrb.mxu0 %v6435_v31  ;;  %v6407_v30 = vld [vmem:[#allocation5 + $0x48] sm:$0xff] }
  0x5f   : > { %v6431_v31 = vld [vmem:[#allocation5 + $0x108] sm:$0xff] }
  0x60   : > { %3009 = vmatpush.bf16.msrb.mxu2 %v6418_v44  ;;  %v6414_v44 = vld [vmem:[#allocation5 + $0x80] sm:$0xff] }
  0x61   : > { %3178 = vmatpush.bf16.msrb.mxu3 %v6426_v45  ;;  %v6422_v45 = vld [vmem:[#allocation5 + $0xc0] sm:$0xff] }
  0x62   : > { %2840 = vmatpush.bf16.msrb.mxu1 %v6410_v46  ;;  %3347 = vmatpush.bf16.msrb.mxu0 %v6434_v47  ;;  %v6406_v46 = vld [vmem:[#allocation5 + $0x40] sm:$0xff] }
  0x63   : > { %2721 = vmatmul.bf16.gmra.mxu1 %v4992_v40  ;;  %2761 = vmatmul.bf16.gmra.mxu2 %v5280_v41  ;;  %v5136_v40 = vor.u32 %v6231_v33, %v5135_v32  ;;  %v5424_v41 = vor.u32 %v6303_v35, %v5423_v34  ;;  %v6430_v47 = vld [vmem:[#allocation5 + $0x100] sm:$0xff]  ;;  %v4711_v32 = vld [vmem:[%s7152_s13 + $0x50] sm:$0xf]  ;;  %v6124_v33 = vld [vmem:[%s7152_s13 + $0x70] sm:$0xf0] }
  0x64   : > { %2801 = vmatmul.bf16.gmra.mxu3 %v5568_v42  ;;  %3010 = vmatpush.bf16.msrb.mxu2 %v6417_v60  ;;  %v5712_v42 = vor.u32 %v6375_v37, %v5711_v36  ;;  %v6453_v60 = vld [vmem:[#allocation5 + $0x1b8] sm:$0xff]  ;;  %v6120_v34 = vld [vmem:[%s7152_s13 + $0x54] sm:$0xf] }
  0x65   : > { %2681 = vmatmul.bf16.gmra.mxu0 %v4704_v43  ;;  %3179 = vmatpush.bf16.msrb.mxu3 %v6425_v61  ;;  %v4848_v43 = vor.u32 %v6159_v39, %v4847_v38  ;;  %v6461_v61 = vld [vmem:[#allocation5 + $0x1f8] sm:$0xff] }
  0x66   : > { %2841 = vmatpush.bf16.msrb.mxu1 %v6409_v62  ;;  %3348 = vmatpush.bf16.msrb.mxu0 %v6433_v63  ;;  %v6445_v62 = vld [vmem:[#allocation5 + $0x178] sm:$0xff] }
  0x67   : > { %v6469_v63 = vld [vmem:[#allocation5 + $0x238] sm:$0xff] }
  0x68   : > { %3011 = vmatpush.bf16.msrb.mxu2 %v6416_v12  ;;  %v6110_v12 = vld [vmem:[%s7152_s13 + $0x4] sm:$0xf]  ;;  %v4713_v35 = vld [vmem:[%s7152_s13 + $0x74] sm:$0xf0]  ;;  %v6125_v37 = vld [vmem:[%s7152_s13 + $0x78] sm:$0xf0] }
  0x69   : > { %3180 = vmatpush.bf16.msrb.mxu3 %v6424_v13  ;;  %v4669_v13 = vld [vmem:[%s7152_s13 + $0x24] sm:$0xf0]  ;;  %v4719_v36 = vld [vmem:[%s7152_s13 + $0x58] sm:$0xf] }
  0x6a   : > { %2842 = vmatpush.bf16.msrb.mxu1 %v6408_v14  ;;  %3349 = vmatpush.bf16.msrb.mxu0 %v6432_v15  ;;  %v4675_v14 = vld [vmem:[%s7152_s13 + $0x8] sm:$0xf]  ;;  %v6115_v15 = vld [vmem:[%s7152_s13 + $0x28] sm:$0xf0]  ;;  %v4672_v20 = vor.u32 %v6110_v12, %v4669_v13  ;;  %v4783_v12 = vld [vmem:[%s7152_s13 + $0xe0] sm:$0xf] }
  0x6b   : > { %v4676_v21 = vor.u32 %v6115_v15, %v4675_v14  ;;  %v6142_v13 = vld [vmem:[%s7152_s13 + $0x100] sm:$0xf0]  ;;  %v4785_v15 = vld [vmem:[%s7152_s13 + $0x104] sm:$0xf0] }
  0x6c   : > { %3012 = vmatpush.bf16.msrb.mxu2 %v6415_v28  ;;  %v6138_v14 = vld [vmem:[%s7152_s13 + $0xe4] sm:$0xf] }
  0x6d   : > { %3181 = vmatpush.bf16.msrb.mxu3 %v6423_v29 }
  0x6e   : > { %2843 = vmatpush.bf16.msrb.mxu1 %v6407_v30  ;;  %3350 = vmatpush.bf16.msrb.mxu0 %v6431_v31  ;;  %v6119_v30 = vld [vmem:[%s7152_s13 + $0x4c] sm:$0xf]  ;;  %v4705_v31 = vld [vmem:[%s7152_s13 + $0x6c] sm:$0xf0] }
  0x70   : > { %3013 = vmatpush.bf16.msrb.mxu2 %v6414_v44  ;;  %v4720_v44 = vor.u32 %v6125_v37, %v4719_v36  ;;  %v6146_v36 = vld [vmem:[%s7152_s13 + $0x124] sm:$0xf]  ;;  %v4813_v37 = vld [vmem:[%s7152_s13 + $0x144] sm:$0xf0] }
  0x71   : > { %3182 = vmatpush.bf16.msrb.mxu3 %v6422_v45 }
  0x72   : > { %2844 = vmatpush.bf16.msrb.mxu1 %v6406_v46  ;;  %3351 = vmatpush.bf16.msrb.mxu0 %v6430_v47 }
  0x73   : > { %2726 = vmatmul.bf16.gmra.mxu1 %v5028_v56  ;;  %2766 = vmatmul.bf16.gmra.mxu2 %v5316_v57  ;;  %v5172_v56 = vor.u32 %v6240_v49, %v5171_v48  ;;  %v5460_v57 = vor.u32 %v6312_v51, %v5459_v50  ;;  %v6128_v50 = vld [vmem:[%s7152_s13 + $0x94] sm:$0xf]  ;;  %v4741_v51 = vld [vmem:[%s7152_s13 + $0xb4] sm:$0xf0] }
  0x74   : > { %2806 = vmatmul.bf16.gmra.mxu3 %v5604_v58  ;;  %v5748_v58 = vor.u32 %v6384_v53, %v5747_v52  ;;  %3682 = vmatpush.bf16.msra.mxu2 %v6453_v60  ;;  %v4747_v52 = vld [vmem:[%s7152_s13 + $0x98] sm:$0xf]  ;;  %v6133_v53 = vld [vmem:[%s7152_s13 + $0xb8] sm:$0xf0]  ;;  %v4744_v60 = vor.u32 %v6128_v50, %v4741_v51  ;;  %v4827_v50 = vld [vmem:[%s7152_s13 + $0x130] sm:$0xf] }
  0x75   : > { %2686 = vmatmul.bf16.gmra.mxu0 %v4740_v59  ;;  %v4884_v59 = vor.u32 %v6168_v55, %v4883_v54  ;;  %3851 = vmatpush.bf16.msra.mxu3 %v6461_v61  ;;  %v6129_v54 = vld [vmem:[%s7152_s13 + $0x9c] sm:$0xf]  ;;  %v4749_v55 = vld [vmem:[%s7152_s13 + $0xbc] sm:$0xf0]  ;;  %v4748_v61 = vor.u32 %v6133_v53, %v4747_v52  ;;  %v6152_v51 = vld [vmem:[%s7152_s13 + $0x150] sm:$0xf0] }
  0x76   : > { %3513 = vmatpush.bf16.msra.mxu1 %v6445_v62  ;;  %4020 = vmatpush.bf16.msra.mxu0 %v6469_v63  ;;  %v4752_v63 = vor.u32 %v6129_v54, %v4749_v55  ;;  %v4816_v54 = vor.u32 %v6146_v36, %v4813_v37 }
  0x83   : > { %2731 = vmatmul.bf16.gmra.mxu1 %v5064_v8  ;;  %2771 = vmatmul.bf16.gmra.mxu2 %v5352_v9  ;;  %v5208_v8 = vor.u32 %v6249_v1, %v5207_v0  ;;  %v5496_v9 = vor.u32 %v6321_v3, %v5495_v2  ;;  %v6452_v2 = vld [vmem:[#allocation5 + $0x1b0] sm:$0xff] }
  0x84   : > { %2811 = vmatmul.bf16.gmra.mxu3 %v5640_v10  ;;  %v5784_v10 = vor.u32 %v6393_v5, %v5783_v4  ;;  %v6460_v3 = vld [vmem:[#allocation5 + $0x1f0] sm:$0xff]  ;;  %3683 = vmatpush.bf16.msra.mxu2 %v6452_v2 }
  0x85   : > { %2691 = vmatmul.bf16.gmra.mxu0 %v4776_v11  ;;  %v4920_v11 = vor.u32 %v6177_v7, %v4919_v6  ;;  %3852 = vmatpush.bf16.msra.mxu3 %v6460_v3  ;;  %v6444_v6 = vld [vmem:[#allocation5 + $0x170] sm:$0xff] }
  0x86   : > { %3514 = vmatpush.bf16.msra.mxu1 %v6444_v6  ;;  %v6155_v6 = vld [vmem:[%s7152_s13 + $0x16c] sm:$0xf] }
  0x93   : > { %2736 = vmatmul.bf16.gmra.mxu1 %v5100_v24  ;;  %2776 = vmatmul.bf16.gmra.mxu2 %v5388_v25  ;;  %v4684_v24 = vor.u32 %v6116_v19, %v4683_v18 }
  0x94   : > { %2816 = vmatmul.bf16.gmra.mxu3 %v5676_v26 }
  0x95   : > { %2696 = vmatmul.bf16.gmra.mxu0 %v4812_v27 }
  0xa3   : > { %2741 = vmatmul.bf16.gmra.mxu1 %v5136_v40  ;;  %2781 = vmatmul.bf16.gmra.mxu2 %v5424_v41  ;;  %v4708_v40 = vor.u32 %v6119_v30, %v4705_v31  ;;  %v4712_v41 = vor.u32 %v6124_v33, %v4711_v32  ;;  %v4792_v30 = vor.u32 %v6143_v17, %v4791_v16 }
  0xa4   : > { %2821 = vmatmul.bf16.gmra.mxu3 %v5712_v42 }
  0xa5   : > { %2701 = vmatmul.bf16.gmra.mxu0 %v4848_v43  ;;  %v4716_v43 = vor.u32 %v6120_v34, %v4713_v35 }
  0xb3   : > { %2746 = vmatmul.bf16.gmra.mxu1 %v5172_v56  ;;  %2786 = vmatmul.bf16.gmra.mxu2 %v5460_v57  ;;  %v4755_v56 = vld [vmem:[%s7152_s13 + $0xa0] sm:$0xf]  ;;  %v6134_v57 = vld [vmem:[%s7152_s13 + $0xc0] sm:$0xf0] }
  0xb4   : > { %2826 = vmatmul.bf16.gmra.mxu3 %v5748_v58  ;;  %v4756_v0 = vor.u32 %v6134_v57, %v4755_v56 }
  0xb5   : > { %2706 = vmatmul.bf16.gmra.mxu0 %v4884_v59 }
  0xc3   : > { %2751 = vmatmul.bf16.gmra.mxu1 %v5208_v8  ;;  %2791 = vmatmul.bf16.gmra.mxu2 %v5496_v9  ;;  %v6468_v9 = vld [vmem:[#allocation5 + $0x230] sm:$0xff] }
  0xc4   : > { %2831 = vmatmul.bf16.gmra.mxu3 %v5784_v10  ;;  %v6137_v10 = vld [vmem:[%s7152_s13 + $0xdc] sm:$0xf]  ;;  %4021 = vmatpush.bf16.msra.mxu0 %v6468_v9  ;;  %v4849_v9 = vld [vmem:[%s7152_s13 + $0x18c] sm:$0xf0] }
  0xc5   : > { %2711 = vmatmul.bf16.gmra.mxu0 %v4920_v11  ;;  %v4777_v11 = vld [vmem:[%s7152_s13 + $0xfc] sm:$0xf0] }
  0xd0   : > { %v7238_v22 = vpop.f32.mrf.mxu1 }
  0xd2   : > { %v7240_v25 = vpop.f32.mrf.mxu0 }
  0xd3   : > { %2845 = vmatmul.bf16.vlgmr.msrb.gmra.mxu1 %v4672_v20  ;;  %3014 = vmatmul.bf16.vlgmr.msrb.gmra.mxu2 %v4676_v21  ;;  %v4780_v20 = vor.u32 %v6137_v10, %v4777_v11  ;;  %v4784_v21 = vor.u32 %v6142_v13, %v4783_v12  ;;  %v4855_v10 = vld [vmem:[%s7152_s13 + $0x170] sm:$0xf]  ;;  %v6160_v11 = vld [vmem:[%s7152_s13 + $0x190] sm:$0xf0]  ;;  %v4857_v13 = vld [vmem:[%s7152_s13 + $0x194] sm:$0xf0] }
  0xd4   : > { %3183 = vmatmul.bf16.vlgmr.msrb.gmra.mxu3 %v4680_v23  ;;  %v6156_v12 = vld [vmem:[%s7152_s13 + $0x174] sm:$0xf] }
  0xd5   : > { %3352 = vmatmul.bf16.vlgmr.msrb.gmra.mxu0 %v4684_v24  ;;  %v4788_v24 = vor.u32 %v6138_v14, %v4785_v15  ;;  %v4863_v14 = vld [vmem:[%s7152_s13 + $0x178] sm:$0xf]  ;;  %v6161_v15 = vld [vmem:[%s7152_s13 + $0x198] sm:$0xf0] }
  0xd6   : > { %v7242_v26 = vpop.f32.mrf.mxu2  ;;  %v4864_v36 = vor.u32 %v6161_v15, %v4863_v14 }
  0xd7   : > { %v7244_v27 = vpop.f32.mrf.mxu3 }
  0xd8   : > { %8345 = vst [vmem:[#allocation15_spill] sm:$0xff] %v7244_v27  ;;  %v7246_v28 = vpop.f32.mrf.mxu1 }
  0xda   : > { %v7248_v29 = vpop.f32.mrf.mxu0 }
  0xde   : > { %v7258_v38 = vpop.f32.mrf.mxu2 }
  0xdf   : > { %v7260_v39 = vpop.f32.mrf.mxu3 }
  0xe0   : > { %8346 = vst [vmem:[#allocation16_spill] sm:$0xff] %v7260_v39  ;;  %v7262_v42 = vpop.f32.mrf.mxu1 }
  0xe2   : > { %v7264_v45 = vpop.f32.mrf.mxu0 }
  0xe3   : > { %2850 = vmatmul.bf16.gmra.mxu1 %v4708_v40  ;;  %3019 = vmatmul.bf16.gmra.mxu2 %v4712_v41  ;;  %v4819_v40 = vld [vmem:[%s7152_s13 + $0x128] sm:$0xf]  ;;  %v6151_v41 = vld [vmem:[%s7152_s13 + $0x148] sm:$0xf0] }
  0xe4   : > { %3188 = vmatmul.bf16.gmra.mxu3 %v4716_v43  ;;  %v6147_v43 = vld [vmem:[%s7152_s13 + $0x12c] sm:$0xf]  ;;  %v4820_v55 = vor.u32 %v6151_v41, %v4819_v40 }
  0xe5   : > { %3357 = vmatmul.bf16.gmra.mxu0 %v4720_v44  ;;  %v4821_v44 = vld [vmem:[%s7152_s13 + $0x14c] sm:$0xf0] }
  0xe6   : > { %v7266_v46 = vpop.f32.mrf.mxu2  ;;  %v4824_v57 = vor.u32 %v6147_v43, %v4821_v44 }
  0xe7   : > { %v7268_v47 = vpop.f32.mrf.mxu3 }
  0xe8   : > { %8347 = vst [vmem:[#allocation17_spill] sm:$0xff] %v7268_v47  ;;  %v7270_v48 = vpop.f32.mrf.mxu1 }
  0xea   : > { %v7272_v49 = vpop.f32.mrf.mxu0 }
  0xee   : > { %v7282_v58 = vpop.f32.mrf.mxu2 }
  0xef   : > { %v7284_v59 = vpop.f32.mrf.mxu3 }
  0xf0   : > { %8348 = vst [vmem:[#allocation18_spill] sm:$0xff] %v7284_v59  ;;  %v7286_v62 = vpop.f32.mrf.mxu1 }
  0xf2   : > { %v7288_v1 = vpop.f32.mrf.mxu0 }
  0xf3   : > { %2855 = vmatmul.bf16.gmra.mxu1 %v4744_v60  ;;  %3024 = vmatmul.bf16.gmra.mxu2 %v4748_v61  ;;  %v4828_v60 = vor.u32 %v6152_v51, %v4827_v50  ;;  %v6164_v50 = vld [vmem:[%s7152_s13 + $0x1b4] sm:$0xf]  ;;  %v4885_v51 = vld [vmem:[%s7152_s13 + $0x1d4] sm:$0xf0] }
  0xf4   : > { %3193 = vmatmul.bf16.gmra.mxu3 %v4752_v63 }
  0xf5   : > { %3362 = vmatmul.bf16.gmra.mxu0 %v4756_v0 }
  0xf6   : > { %v7290_v4 = vpop.f32.mrf.mxu2 }
  0xf7   : > { %v7292_v5 = vpop.f32.mrf.mxu3 }
  0xf8   : > { %8349 = vst [vmem:[#allocation19_spill] sm:$0xff] %v7292_v5  ;;  %v7294_v7 = vpop.f32.mrf.mxu1  ;;  %v6188_v5 = vld [vmem:[%s7152_s13 + $0x270] sm:$0xf0] }
  0xfa   : > { %v7296_v8 = vpop.f32.mrf.mxu0 }
  0xfe   : > { %v7306_v18 = vpop.f32.mrf.mxu2 }
  0xff   : > { %v7308_v19 = vpop.f32.mrf.mxu3 }
 0x100   : > { %8350 = vst [vmem:[#allocation20_spill] sm:$0xff] %v7308_v19  ;;  %v7310_v23 = vpop.f32.mrf.mxu1  ;;  %v4971_v19 = vld [vmem:[%s7152_s13 + $0x250] sm:$0xf] }
 0x101   : > { %v4972_v47 = vor.u32 %v6188_v5, %v4971_v19  ;;  %v6191_v5 = vld [vmem:[%s7152_s13 + $0x28c] sm:$0xf]  ;;  %v4993_v19 = vld [vmem:[%s7152_s13 + $0x2ac] sm:$0xf0] }
 0x102   : > { %v7312_v31 = vpop.f32.mrf.mxu0 }
 0x103   : > { %2860 = vmatmul.bf16.gmra.mxu1 %v4780_v20  ;;  %3029 = vmatmul.bf16.gmra.mxu2 %v4784_v21  ;;  %v4852_v20 = vor.u32 %v6155_v6, %v4849_v9  ;;  %v4856_v21 = vor.u32 %v6160_v11, %v4855_v10  ;;  %v4899_v6 = vld [vmem:[%s7152_s13 + $0x1c0] sm:$0xf]  ;;  %v6170_v9 = vld [vmem:[%s7152_s13 + $0x1e0] sm:$0xf0] }
 0x104   : > { %3198 = vmatmul.bf16.gmra.mxu3 %v4788_v24 }
 0x105   : > { %3367 = vmatmul.bf16.gmra.mxu0 %v4792_v30  ;;  %v4860_v30 = vor.u32 %v6156_v12, %v4857_v13  ;;  %v4888_v12 = vor.u32 %v6164_v50, %v4885_v51 }
 0x106   : > { %v7314_v32 = vpop.f32.mrf.mxu2 }
 0x107   : > { %v7316_v33 = vpop.f32.mrf.mxu3 }
 0x108   : > { %8351 = vst [vmem:[#allocation21_spill] sm:$0xff] %v7316_v33  ;;  %v7318_v34 = vpop.f32.mrf.mxu1  ;;  %v4965_v33 = vld [vmem:[%s7152_s13 + $0x26c] sm:$0xf0] }
 0x10a   : > { %v7320_v35 = vpop.f32.mrf.mxu0 }
 0x10e   : > { %v7330_v52 = vpop.f32.mrf.mxu2 }
 0x10f   : > { %v7332_v53 = vpop.f32.mrf.mxu3 }
 0x110   : > { %8352 = vst [vmem:[#allocation22_spill] sm:$0xff] %v7332_v53  ;;  %v7334_v56 = vpop.f32.mrf.mxu1 }
 0x112   : > { %v7336_v61 = vpop.f32.mrf.mxu0 }
 0x113   : > { %2865 = vmatmul.bf16.gmra.mxu1 %v4816_v54  ;;  %3034 = vmatmul.bf16.gmra.mxu2 %v4820_v55  ;;  %v4891_v54 = vld [vmem:[%s7152_s13 + $0x1b8] sm:$0xf]  ;;  %v6169_v55 = vld [vmem:[%s7152_s13 + $0x1d8] sm:$0xf0] }
 0x114   : > { %3203 = vmatmul.bf16.gmra.mxu3 %v4824_v57  ;;  %v6165_v57 = vld [vmem:[%s7152_s13 + $0x1bc] sm:$0xf]  ;;  %v4892_v13 = vor.u32 %v6169_v55, %v4891_v54 }
 0x115   : > { %3372 = vmatmul.bf16.gmra.mxu0 %v4828_v60  ;;  %v4893_v60 = vld [vmem:[%s7152_s13 + $0x1dc] sm:$0xf0] }
 0x116   : > { %v7338_v63 = vpop.f32.mrf.mxu2  ;;  %v4896_v15 = vor.u32 %v6165_v57, %v4893_v60  ;;  %v6443_v57 = vld [vmem:[#allocation5 + $0x168] sm:$0xff] }
 0x117   : > { %v7340_v0 = vpop.f32.mrf.mxu3  ;;  %v6467_v60 = vld [vmem:[#allocation5 + $0x228] sm:$0xff]  ;;  %3515 = vmatpush.bf16.msra.mxu1 %v6443_v57 }
 0x118   : > { %8353 = vst [vmem:[#allocation23_spill] sm:$0xff] %v7340_v0  ;;  %v7342_v2 = vpop.f32.mrf.mxu1  ;;  %4022 = vmatpush.bf16.msra.mxu0 %v6467_v60 }
 0x11a   : > { %v7344_v3 = vpop.f32.mrf.mxu0 }
 0x11e   : > { %v7354_v16 = vpop.f32.mrf.mxu2 }
 0x11f   : > { %v7356_v17 = vpop.f32.mrf.mxu3 }
 0x120   : > { %8354 = vst [vmem:[#allocation24_spill] sm:$0xff] %v7356_v17  ;;  %v7358_v24 = vpop.f32.mrf.mxu1 }
 0x122   : > { %v7360_v37 = vpop.f32.mrf.mxu0 }
 0x123   : > { %2870 = vmatmul.bf16.gmra.mxu1 %v4852_v20  ;;  %3039 = vmatmul.bf16.gmra.mxu2 %v4856_v21  ;;  %v4900_v20 = vor.u32 %v6170_v9, %v4899_v6  ;;  %v6173_v6 = vld [vmem:[%s7152_s13 + $0x1fc] sm:$0xf]  ;;  %v4921_v9 = vld [vmem:[%s7152_s13 + $0x21c] sm:$0xf0] }
 0x124   : > { %3208 = vmatmul.bf16.gmra.mxu3 %v4860_v30  ;;  %v6451_v30 = vld [vmem:[#allocation5 + $0x1a8] sm:$0xff] }
 0x125   : > { %3377 = vmatmul.bf16.gmra.mxu0 %v4864_v36  ;;  %v6459_v36 = vld [vmem:[#allocation5 + $0x1e8] sm:$0xff]  ;;  %3684 = vmatpush.bf16.msra.mxu2 %v6451_v30 }
 0x126   : > { %v7362_v40 = vpop.f32.mrf.mxu2  ;;  %3853 = vmatpush.bf16.msra.mxu3 %v6459_v36  ;;  %v6179_v30 = vld [vmem:[%s7152_s13 + $0x228] sm:$0xf0] }
 0x127   : > { %v7364_v41 = vpop.f32.mrf.mxu3 }
 0x128   : > { %8355 = vst [vmem:[#allocation25_spill] sm:$0xff] %v7364_v41  ;;  %v7366_v43 = vpop.f32.mrf.mxu1 }
 0x12a   : > { %v7368_v44 = vpop.f32.mrf.mxu0 }
 0x12e   : > { %v7378_v10 = vpop.f32.mrf.mxu2 }
 0x12f   : > { %8356 = vst [vmem:[#allocation26_spill] sm:$0xff] %v7378_v10  ;;  %v7380_v11 = vpop.f32.mrf.mxu3 }
 0x130   : > { %8357 = vst [vmem:[#allocation27_spill] sm:$0xff] %v7380_v11  ;;  %v7382_v14 = vpop.f32.mrf.mxu1  ;;  %v4935_v11 = vld [vmem:[%s7152_s13 + $0x208] sm:$0xf] }
 0x131   : > { %v4936_v60 = vor.u32 %v6179_v30, %v4935_v11  ;;  %v6187_v11 = vld [vmem:[%s7152_s13 + $0x268] sm:$0xf0] }
 0x132   : > { %v7384_v21 = vpop.f32.mrf.mxu0  ;;  %v6183_v30 = vld [vmem:[%s7152_s13 + $0x24c] sm:$0xf] }
 0x133   : > { %2875 = vmatmul.bf16.gmra.mxu1 %v4888_v12  ;;  %3044 = vmatmul.bf16.gmra.mxu2 %v4892_v13  ;;  %v4927_v12 = vld [vmem:[%s7152_s13 + $0x200] sm:$0xf]  ;;  %v6178_v13 = vld [vmem:[%s7152_s13 + $0x220] sm:$0xf0]  ;;  %v4968_v59 = vor.u32 %v6183_v30, %v4965_v33 }
 0x134   : > { %3213 = vmatmul.bf16.gmra.mxu3 %v4896_v15  ;;  %v6174_v15 = vld [vmem:[%s7152_s13 + $0x204] sm:$0xf]  ;;  %v4928_v17 = vor.u32 %v6178_v13, %v4927_v12 }
 0x135   : > { %3382 = vmatmul.bf16.gmra.mxu0 %v4900_v20  ;;  %v4929_v20 = vld [vmem:[%s7152_s13 + $0x224] sm:$0xf0]  ;;  %v6182_v13 = vld [vmem:[%s7152_s13 + $0x244] sm:$0xf] }
 0x136   : > { %v7386_v50 = vpop.f32.mrf.mxu2  ;;  %v4932_v57 = vor.u32 %v6174_v15, %v4929_v20  ;;  %v4957_v15 = vld [vmem:[%s7152_s13 + $0x264] sm:$0xf0] }
 0x137   : > { %8358 = vst [vmem:[#allocation28_spill] sm:$0xff] %v7386_v50  ;;  %v7388_v51 = vpop.f32.mrf.mxu3  ;;  %v4963_v20 = vld [vmem:[%s7152_s13 + $0x248] sm:$0xf] }
 0x138   : > { %8359 = vst [vmem:[#allocation29_spill] sm:$0xff] %v7388_v51  ;;  %v7390_v54 = vpop.f32.mrf.mxu1  ;;  %v4924_v51 = vor.u32 %v6173_v6, %v4921_v9 }
 0x13a   : > { %v7392_v55 = vpop.f32.mrf.mxu0 }
 0x13e   : > { %v7402_v41 = vpop.f32.mrf.mxu2 }
 0x13f   : > { %8360 = vst [vmem:[#allocation30_spill] sm:$0xff] %v7402_v41  ;;  %v7404_v36 = vpop.f32.mrf.mxu3  ;;  %v6197_v41 = vld [vmem:[%s7152_s13 + $0x2b8] sm:$0xf0] }
 0x140   : > { %8361 = vst [vmem:[#allocation31_spill] sm:$0xff] %v7404_v36  ;;  %v7406_v0 = vpop.f32.mrf.mxu1 }
 0x142   : > { %v7408_v53 = vpop.f32.mrf.mxu0 }
 0x143   : > { %2880 = vmatmul.bf16.gmra.mxu1 %v4924_v51  ;;  %3049 = vmatmul.bf16.gmra.mxu2 %v4928_v17 }
 0x144   : > { %3218 = vmatmul.bf16.gmra.mxu3 %v4932_v57  ;;  %v4960_v57 = vor.u32 %v6182_v13, %v4957_v15 }
 0x145   : > { %3387 = vmatmul.bf16.gmra.mxu0 %v4936_v60  ;;  %v4964_v60 = vor.u32 %v6187_v11, %v4963_v20 }
 0x146   : > { %v7410_v36 = vpop.f32.mrf.mxu2 }
 0x147   : > { %8362 = vst [vmem:[#allocation32_spill] sm:$0xff] %v7410_v36  ;;  %v7412_v6 = vpop.f32.mrf.mxu3  ;;  %v5007_v36 = vld [vmem:[%s7152_s13 + $0x298] sm:$0xf] }
 0x148   : > { %8363 = vst [vmem:[#allocation33_spill] sm:$0xff] %v7412_v6  ;;  %v7414_v9 = vpop.f32.mrf.mxu1 }
 0x14a   : > { %v7416_v12 = vpop.f32.mrf.mxu0 }
 0x14e   : > { %v7426_v51 = vpop.f32.mrf.mxu2 }
 0x14f   : > { %8364 = vst [vmem:[#allocation34_spill] sm:$0xff] %v7426_v51  ;;  %v7428_v17 = vpop.f32.mrf.mxu3  ;;  %v6196_v51 = vld [vmem:[%s7152_s13 + $0x2b0] sm:$0xf0] }
 0x150   : > { %8365 = vst [vmem:[#allocation35_spill] sm:$0xff] %v7428_v17  ;;  %v2846_v6 = vpop.f32.mrf.mxu1 }
 0x151   : > { %v2847_v27 = vadd.f32 %v2846_v6, %v7240_v25 }
 0x152   : > { %v3353_v39 = vpop.f32.mrf.mxu0 }
 0x153   : > { %2885 = vmatmul.bf16.gmra.mxu1 %v4960_v57  ;;  %3054 = vmatmul.bf16.gmra.mxu2 %v4964_v60  ;;  %v4999_v57 = vld [vmem:[%s7152_s13 + $0x290] sm:$0xf]  ;;  %v6192_v60 = vld [vmem:[%s7152_s13 + $0x294] sm:$0xf] }
 0x154   : > { %3223 = vmatmul.bf16.gmra.mxu3 %v4968_v59 }
 0x155   : > { %3392 = vmatmul.bf16.gmra.mxu0 %v4972_v47  ;;  %v5001_v47 = vld [vmem:[%s7152_s13 + $0x2b4] sm:$0xf0] }
 0x156   : > { %v3015_v13 = vpop.f32.mrf.mxu2 }
 0x157   : > { %v3016_v15 = vadd.f32 %v3015_v13, %v2847_v27  ;;  %v3184_v20 = vpop.f32.mrf.mxu3  ;;  %v4996_v27 = vor.u32 %v6191_v5, %v4993_v19  ;;  %v5000_v13 = vor.u32 %v6196_v51, %v4999_v57  ;;  %v6200_v57 = vld [vmem:[%s7152_s13 + $0x2d4] sm:$0xf] }
 0x158   : > { %v2848_v11 = vpop.f32.mrf.mxu1 }
 0x159   : > { %v3185_v17 = vadd.f32 %v3184_v20, %v3016_v15  ;;  %v2849_v59 = vadd.f32 %v2848_v11, %v7248_v29  ;;  %v5004_v15 = vor.u32 %v6192_v60, %v5001_v47  ;;  %v5008_v20 = vor.u32 %v6197_v41, %v5007_v36  ;;  %v5029_v60 = vld [vmem:[%s7152_s13 + $0x2f4] sm:$0xf0] }
 0x15a   : > { %v3355_v33 = vpop.f32.mrf.mxu0  ;;  %v5035_v47 = vld [vmem:[%s7152_s13 + $0x2d8] sm:$0xf] }
 0x15b   : > { %v7433_v30 = vadd.f32 %v3353_v39, %v3185_v17 }
 0x15d   : > { %8366 = vst [vmem:[#allocation36_spill] sm:$0xff] %v7433_v30 }
 0x15e   : > { %v3017_v25 = vpop.f32.mrf.mxu2 }
 0x15f   : > { %v3018_v6 = vadd.f32 %v3017_v25, %v2849_v59  ;;  %v3186_v50 = vpop.f32.mrf.mxu3  ;;  %v6201_v25 = vld [vmem:[%s7152_s13 + $0x2dc] sm:$0xf] }
 0x160   : > { %v2851_v10 = vpop.f32.mrf.mxu1 }
 0x161   : > { %v3187_v39 = vadd.f32 %v3186_v50, %v3018_v6  ;;  %v2852_v51 = vadd.f32 %v2851_v10, %v7264_v45 }
 0x162   : > { %v3358_v17 = vpop.f32.mrf.mxu0 }
 0x163   : > { %2890 = vmatmul.bf16.gmra.mxu1 %v4996_v27  ;;  %3059 = vmatmul.bf16.gmra.mxu2 %v5000_v13  ;;  %v7442_v29 = vadd.f32 %v3355_v33, %v3187_v39  ;;  %v6205_v33 = vld [vmem:[%s7152_s13 + $0x2f8] sm:$0xf0]  ;;  %v5037_v27 = vld [vmem:[%s7152_s13 + $0x2fc] sm:$0xf0]  ;;  %v5032_v39 = vor.u32 %v6200_v57, %v5029_v60 }
 0x164   : > { %3228 = vmatmul.bf16.gmra.mxu3 %v5004_v15  ;;  %v5043_v13 = vld [vmem:[%s7152_s13 + $0x2e0] sm:$0xf]  ;;  %v6206_v15 = vld [vmem:[%s7152_s13 + $0x300] sm:$0xf0] }
 0x165   : > { %8367 = vst [vmem:[#allocation37_spill] sm:$0xff] %v7442_v29  ;;  %3397 = vmatmul.bf16.gmra.mxu0 %v5008_v20 }
 0x166   : > { %v3020_v11 = vpop.f32.mrf.mxu2 }
 0x167   : > { %v3021_v5 = vadd.f32 %v3020_v11, %v2852_v51  ;;  %v3189_v41 = vpop.f32.mrf.mxu3  ;;  %v5036_v51 = vor.u32 %v6205_v33, %v5035_v47 }
 0x168   : > { %v2853_v36 = vpop.f32.mrf.mxu1 }
 0x169   : > { %v3190_v50 = vadd.f32 %v3189_v41, %v3021_v5  ;;  %v2854_v6 = vadd.f32 %v2853_v36, %v7272_v49  ;;  %v5040_v5 = vor.u32 %v6201_v25, %v5037_v27  ;;  %v5044_v41 = vor.u32 %v6206_v15, %v5043_v13  ;;  %v6450_v49 = vld [vmem:[#allocation5 + $0x1a0] sm:$0xff]  ;;  %v6209_v27 = vld [vmem:[%s7152_s13 + $0x31c] sm:$0xf] }
 0x16a   : > { %v3360_v19 = vpop.f32.mrf.mxu0  ;;  %v6458_v36 = vld [vmem:[#allocation5 + $0x1e0] sm:$0xff]  ;;  %3685 = vmatpush.bf16.msra.mxu2 %v6450_v49 }
 0x16b   : > { %v7447_v59 = vadd.f32 %v3358_v17, %v3190_v50  ;;  %3854 = vmatpush.bf16.msra.mxu3 %v6458_v36  ;;  %v6442_v25 = vld [vmem:[#allocation5 + $0x160] sm:$0xff] }
 0x16c   : > { %v5065_v13 = vld [vmem:[%s7152_s13 + $0x33c] sm:$0xf0]  ;;  %3516 = vmatpush.bf16.msra.mxu1 %v6442_v25 }
 0x16d   : > { %v5071_v15 = vld [vmem:[%s7152_s13 + $0x320] sm:$0xf]  ;;  %v5068_v36 = vor.u32 %v6209_v27, %v5065_v13 }
 0x16e   : > { %v3022_v45 = vpop.f32.mrf.mxu2 }
 0x16f   : > { %v3023_v10 = vadd.f32 %v3022_v45, %v2854_v6  ;;  %v3191_v20 = vpop.f32.mrf.mxu3  ;;  %v6466_v6 = vld [vmem:[#allocation5 + $0x220] sm:$0xff] }
 0x170   : > { %v2856_v11 = vpop.f32.mrf.mxu1  ;;  %4023 = vmatpush.bf16.msra.mxu0 %v6466_v6  ;;  %v6214_v45 = vld [vmem:[%s7152_s13 + $0x340] sm:$0xf0] }
 0x171   : > { %v3192_v29 = vadd.f32 %v3191_v20, %v3023_v10  ;;  %v2857_v50 = vadd.f32 %v2856_v11, %v7288_v1  ;;  %v6210_v10 = vld [vmem:[%s7152_s13 + $0x324] sm:$0xf]  ;;  %v6215_v11 = vld [vmem:[%s7152_s13 + $0x348] sm:$0xf0] }
 0x172   : > { %v3363_v30 = vpop.f32.mrf.mxu0 }
 0x173   : > { %2895 = vmatmul.bf16.gmra.mxu1 %v5032_v39  ;;  %3064 = vmatmul.bf16.gmra.mxu2 %v5036_v51  ;;  %v7456_v17 = vadd.f32 %v3360_v19, %v3192_v29  ;;  %v5073_v39 = vld [vmem:[%s7152_s13 + $0x344] sm:$0xf0] }
 0x174   : > { %3233 = vmatmul.bf16.gmra.mxu3 %v5040_v5  ;;  %v5079_v51 = vld [vmem:[%s7152_s13 + $0x328] sm:$0xf] }
 0x175   : > { %3402 = vmatmul.bf16.gmra.mxu0 %v5044_v41 }
 0x176   : > { %v3025_v57 = vpop.f32.mrf.mxu2 }
 0x177   : > { %v3026_v60 = vadd.f32 %v3025_v57, %v2857_v50  ;;  %v3194_v47 = vpop.f32.mrf.mxu3  ;;  %v5072_v50 = vor.u32 %v6214_v45, %v5071_v15 }
 0x178   : > { %v2858_v29 = vpop.f32.mrf.mxu1 }
 0x179   : > { %v3195_v19 = vadd.f32 %v3194_v47, %v3026_v60  ;;  %v2859_v20 = vadd.f32 %v2858_v29, %v7296_v8  ;;  %v5076_v60 = vor.u32 %v6210_v10, %v5073_v39  ;;  %v5080_v47 = vor.u32 %v6215_v11, %v5079_v51  ;;  %v6218_v10 = vld [vmem:[%s7152_s13 + $0x364] sm:$0xf]  ;;  %v5107_v51 = vld [vmem:[%s7152_s13 + $0x368] sm:$0xf]  ;;  %v6219_v11 = vld [vmem:[%s7152_s13 + $0x36c] sm:$0xf] }
 0x17a   : > { %v3365_v33 = vpop.f32.mrf.mxu0 }
 0x17b   : > { %v7461_v1 = vadd.f32 %v3363_v30, %v3195_v19 }
 0x17e   : > { %v3027_v5 = vpop.f32.mrf.mxu2 }
 0x17f   : > { %v3028_v41 = vadd.f32 %v3027_v5, %v2859_v20  ;;  %v3196_v49 = vpop.f32.mrf.mxu3  ;;  %v5101_v20 = vld [vmem:[%s7152_s13 + $0x384] sm:$0xf0] }
 0x180   : > { %v2861_v57 = vpop.f32.mrf.mxu1 }
 0x181   : > { %v3197_v30 = vadd.f32 %v3196_v49, %v3028_v41  ;;  %v2862_v29 = vadd.f32 %v2861_v57, %v7312_v31  ;;  %v5109_v41 = vld [vmem:[%s7152_s13 + $0x38c] sm:$0xf0] }
 0x182   : > { %v3368_v19 = vpop.f32.mrf.mxu0  ;;  %v5115_v49 = vld [vmem:[%s7152_s13 + $0x370] sm:$0xf] }
 0x183   : > { %2900 = vmatmul.bf16.gmra.mxu1 %v5068_v36  ;;  %3069 = vmatmul.bf16.gmra.mxu2 %v5072_v50  ;;  %v7470_v8 = vadd.f32 %v3365_v33, %v3197_v30  ;;  %v6223_v33 = vld [vmem:[%s7152_s13 + $0x388] sm:$0xf0]  ;;  %v6224_v36 = vld [vmem:[%s7152_s13 + $0x390] sm:$0xf0] }
 0x184   : > { %3238 = vmatmul.bf16.gmra.mxu3 %v5076_v60  ;;  %v5104_v60 = vor.u32 %v6218_v10, %v5101_v20 }
 0x185   : > { %3407 = vmatmul.bf16.gmra.mxu0 %v5080_v47  ;;  %v5108_v47 = vor.u32 %v6223_v33, %v5107_v51 }
 0x186   : > { %v3030_v25 = vpop.f32.mrf.mxu2 }
 0x187   : > { %v3031_v6 = vadd.f32 %v3030_v25, %v2862_v29  ;;  %v3199_v27 = vpop.f32.mrf.mxu3  ;;  %v5112_v29 = vor.u32 %v6219_v11, %v5109_v41  ;;  %v5116_v25 = vor.u32 %v6224_v36, %v5115_v49  ;;  %v6227_v11 = vld [vmem:[%s7152_s13 + $0x3ac] sm:$0xf]  ;;  %v5143_v49 = vld [vmem:[%s7152_s13 + $0x3b0] sm:$0xf]  ;;  %v6228_v36 = vld [vmem:[%s7152_s13 + $0x3b4] sm:$0xf] }
 0x188   : > { %v2863_v13 = vpop.f32.mrf.mxu1 }
 0x189   : > { %v3200_v15 = vadd.f32 %v3199_v27, %v3031_v6  ;;  %v2864_v5 = vadd.f32 %v2863_v13, %v7320_v35 }
 0x18a   : > { %v3370_v45 = vpop.f32.mrf.mxu0 }
 0x18b   : > { %v7475_v39 = vadd.f32 %v3368_v19, %v3200_v15 }
 0x18e   : > { %v3032_v31 = vpop.f32.mrf.mxu2 }
 0x18f   : > { %v3033_v50 = vadd.f32 %v3032_v31, %v2864_v5  ;;  %v3201_v57 = vpop.f32.mrf.mxu3  ;;  %v5137_v5 = vld [vmem:[%s7152_s13 + $0x3cc] sm:$0xf0] }
 0x190   : > { %v2866_v30 = vpop.f32.mrf.mxu1 }
 0x191   : > { %v3202_v19 = vadd.f32 %v3201_v57, %v3033_v50  ;;  %v2867_v27 = vadd.f32 %v2866_v30, %v7336_v61  ;;  %v5145_v50 = vld [vmem:[%s7152_s13 + $0x3d4] sm:$0xf0] }
 0x192   : > { %v3373_v6 = vpop.f32.mrf.mxu0  ;;  %v5151_v57 = vld [vmem:[%s7152_s13 + $0x3b8] sm:$0xf] }
 0x193   : > { %2905 = vmatmul.bf16.gmra.mxu1 %v5104_v60  ;;  %3074 = vmatmul.bf16.gmra.mxu2 %v5108_v47  ;;  %v7484_v35 = vadd.f32 %v3370_v45, %v3202_v19  ;;  %v6232_v45 = vld [vmem:[%s7152_s13 + $0x3d0] sm:$0xf0]  ;;  %v6233_v60 = vld [vmem:[%s7152_s13 + $0x3d8] sm:$0xf0] }
 0x194   : > { %3243 = vmatmul.bf16.gmra.mxu3 %v5112_v29  ;;  %v5140_v29 = vor.u32 %v6227_v11, %v5137_v5 }
 0x195   : > { %3412 = vmatmul.bf16.gmra.mxu0 %v5116_v25  ;;  %v5144_v25 = vor.u32 %v6232_v45, %v5143_v49 }
 0x196   : > { %v3035_v13 = vpop.f32.mrf.mxu2 }
 0x197   : > { %v3036_v15 = vadd.f32 %v3035_v13, %v2867_v27  ;;  %v3204_v10 = vpop.f32.mrf.mxu3  ;;  %v5148_v27 = vor.u32 %v6228_v36, %v5145_v50  ;;  %v5152_v13 = vor.u32 %v6233_v60, %v5151_v57  ;;  %v6236_v36 = vld [vmem:[%s7152_s13 + $0x3f4] sm:$0xf]  ;;  %v5179_v57 = vld [vmem:[%s7152_s13 + $0x3f8] sm:$0xf]  ;;  %v6237_v60 = vld [vmem:[%s7152_s13 + $0x3fc] sm:$0xf] }
 0x198   : > { %v2868_v20 = vpop.f32.mrf.mxu1 }
 0x199   : > { %v3205_v51 = vadd.f32 %v3204_v10, %v3036_v15  ;;  %v2869_v31 = vadd.f32 %v2868_v20, %v7344_v3 }
 0x19a   : > { %v3375_v33 = vpop.f32.mrf.mxu0 }
 0x19b   : > { %v7489_v41 = vadd.f32 %v3373_v6, %v3205_v51 }
 0x19e   : > { %v3037_v61 = vpop.f32.mrf.mxu2 }
 0x19f   : > { %v3038_v47 = vadd.f32 %v3037_v61, %v2869_v31  ;;  %v3206_v30 = vpop.f32.mrf.mxu3  ;;  %v5173_v31 = vld [vmem:[%s7152_s13 + $0x414] sm:$0xf0] }
 0x1a0   : > { %v2871_v19 = vpop.f32.mrf.mxu1 }
 0x1a1   : > { %v3207_v6 = vadd.f32 %v3206_v30, %v3038_v47  ;;  %v2872_v10 = vadd.f32 %v2871_v19, %v7360_v37  ;;  %v5181_v47 = vld [vmem:[%s7152_s13 + $0x41c] sm:$0xf0] }
 0x1a2   : > { %v3378_v15 = vpop.f32.mrf.mxu0  ;;  %v5187_v30 = vld [vmem:[%s7152_s13 + $0x400] sm:$0xf] }
 0x1a3   : > { %2910 = vmatmul.bf16.gmra.mxu1 %v5140_v29  ;;  %3079 = vmatmul.bf16.gmra.mxu2 %v5144_v25  ;;  %v7498_v3 = vadd.f32 %v3375_v33, %v3207_v6  ;;  %v6241_v33 = vld [vmem:[%s7152_s13 + $0x418] sm:$0xf0]  ;;  %v6242_v29 = vld [vmem:[%s7152_s13 + $0x420] sm:$0xf0] }
 0x1a4   : > { %3248 = vmatmul.bf16.gmra.mxu3 %v5148_v27  ;;  %v5176_v27 = vor.u32 %v6236_v36, %v5173_v31 }
 0x1a5   : > { %3417 = vmatmul.bf16.gmra.mxu0 %v5152_v13  ;;  %v5180_v13 = vor.u32 %v6241_v33, %v5179_v57 }
 0x1a6   : > { %v3040_v20 = vpop.f32.mrf.mxu2 }
 0x1a7   : > { %v3041_v51 = vadd.f32 %v3040_v20, %v2872_v10  ;;  %v3209_v11 = vpop.f32.mrf.mxu3  ;;  %v5184_v10 = vor.u32 %v6237_v60, %v5181_v47  ;;  %v5188_v20 = vor.u32 %v6242_v29, %v5187_v30  ;;  %v6465_v47 = vld [vmem:[#allocation5 + $0x218] sm:$0xff]  ;;  %v5209_v29 = vld [vmem:[%s7152_s13 + $0x45c] sm:$0xf0] }
 0x1a8   : > { %v2873_v5 = vpop.f32.mrf.mxu1  ;;  %v6245_v30 = vld [vmem:[%s7152_s13 + $0x43c] sm:$0xf]  ;;  %4024 = vmatpush.bf16.msra.mxu0 %v6465_v47 }
 0x1a9   : > { %v3210_v49 = vadd.f32 %v3209_v11, %v3041_v51  ;;  %v2874_v61 = vadd.f32 %v2873_v5, %v7368_v44  ;;  %v6449_v44 = vld [vmem:[#allocation5 + $0x198] sm:$0xff] }
 0x1aa   : > { %v3380_v45 = vpop.f32.mrf.mxu0  ;;  %v6457_v5 = vld [vmem:[#allocation5 + $0x1d8] sm:$0xff]  ;;  %3686 = vmatpush.bf16.msra.mxu2 %v6449_v44 }
 0x1ab   : > { %v7503_v50 = vadd.f32 %v3378_v15, %v3210_v49  ;;  %3855 = vmatpush.bf16.msra.mxu3 %v6457_v5  ;;  %v5212_v5 = vor.u32 %v6245_v30, %v5209_v29 }
 0x1ae   : > { %v3042_v37 = vpop.f32.mrf.mxu2 }
 0x1af   : > { %v3043_v25 = vadd.f32 %v3042_v37, %v2874_v61  ;;  %v3211_v19 = vpop.f32.mrf.mxu3  ;;  %v6441_v61 = vld [vmem:[#allocation5 + $0x158] sm:$0xff]  ;;  %v5215_v37 = vld [vmem:[%s7152_s13 + $0x440] sm:$0xf] }
 0x1b0   : > { %v2876_v6 = vpop.f32.mrf.mxu1  ;;  %3517 = vmatpush.bf16.msra.mxu1 %v6441_v61 }
 0x1b1   : > { %v3212_v51 = vadd.f32 %v3211_v19, %v3043_v25  ;;  %v2877_v49 = vadd.f32 %v2876_v6, %v7384_v21  ;;  %v6250_v25 = vld [vmem:[%s7152_s13 + $0x460] sm:$0xf0]  ;;  %v5223_v6 = vld [vmem:[%s7152_s13 + $0x448] sm:$0xf] }
 0x1b2   : > { %v3383_v11 = vpop.f32.mrf.mxu0  ;;  %v6246_v19 = vld [vmem:[%s7152_s13 + $0x444] sm:$0xf] }
 0x1b3   : > { %2915 = vmatmul.bf16.gmra.mxu1 %v5176_v27  ;;  %3084 = vmatmul.bf16.gmra.mxu2 %v5180_v13  ;;  %v7512_v15 = vadd.f32 %v3380_v45, %v3212_v51  ;;  %v5217_v13 = vld [vmem:[%s7152_s13 + $0x464] sm:$0xf0] }
 0x1b4   : > { %3253 = vmatmul.bf16.gmra.mxu3 %v5184_v10  ;;  %v6251_v10 = vld [vmem:[%s7152_s13 + $0x468] sm:$0xf0] }
 0x1b5   : > { %3422 = vmatmul.bf16.gmra.mxu0 %v5188_v20 }
 0x1b6   : > { %v3045_v36 = vpop.f32.mrf.mxu2 }
 0x1b7   : > { %v3046_v31 = vadd.f32 %v3045_v36, %v2877_v49  ;;  %v3214_v57 = vpop.f32.mrf.mxu3  ;;  %v5216_v49 = vor.u32 %v6250_v25, %v5215_v37 }
 0x1b8   : > { %v2878_v45 = vpop.f32.mrf.mxu1 }
 0x1b9   : > { %v3215_v33 = vadd.f32 %v3214_v57, %v3046_v31  ;;  %v2879_v27 = vadd.f32 %v2878_v45, %v7392_v55  ;;  %v5220_v31 = vor.u32 %v6246_v19, %v5217_v13  ;;  %v5224_v57 = vor.u32 %v6251_v10, %v5223_v6  ;;  %v6254_v19 = vld [vmem:[%s7152_s13 + $0x484] sm:$0xf]  ;;  %v5251_v6 = vld [vmem:[%s7152_s13 + $0x488] sm:$0xf]  ;;  %v6255_v10 = vld [vmem:[%s7152_s13 + $0x48c] sm:$0xf] }
 0x1ba   : > { %v3385_v60 = vpop.f32.mrf.mxu0 }
 0x1bb   : > { %v7517_v21 = vadd.f32 %v3383_v11, %v3215_v33 }
 0x1be   : > { %v3047_v20 = vpop.f32.mrf.mxu2 }
 0x1bf   : > { %v3048_v51 = vadd.f32 %v3047_v20, %v2879_v27  ;;  %v3216_v44 = vpop.f32.mrf.mxu3  ;;  %v5245_v27 = vld [vmem:[%s7152_s13 + $0x4a4] sm:$0xf0] }
 0x1c0   : > { %v2881_v36 = vpop.f32.mrf.mxu1 }
 0x1c1   : > { %v3217_v11 = vadd.f32 %v3216_v44, %v3048_v51  ;;  %v2882_v45 = vadd.f32 %v2881_v36, %v7408_v53  ;;  %v5253_v51 = vld [vmem:[%s7152_s13 + $0x4ac] sm:$0xf0] }
 0x1c2   : > { %v3388_v33 = vpop.f32.mrf.mxu0  ;;  %v5259_v44 = vld [vmem:[%s7152_s13 + $0x490] sm:$0xf] }
 0x1c3   : > { %2920 = vmatmul.bf16.gmra.mxu1 %v5212_v5  ;;  %3089 = vmatmul.bf16.gmra.mxu2 %v5216_v49  ;;  %v7526_v55 = vadd.f32 %v3385_v60, %v3217_v11  ;;  %v6259_v60 = vld [vmem:[%s7152_s13 + $0x4a8] sm:$0xf0]  ;;  %v6260_v5 = vld [vmem:[%s7152_s13 + $0x4b0] sm:$0xf0] }
 0x1c4   : > { %3258 = vmatmul.bf16.gmra.mxu3 %v5220_v31  ;;  %v5248_v31 = vor.u32 %v6254_v19, %v5245_v27 }
 0x1c5   : > { %3427 = vmatmul.bf16.gmra.mxu0 %v5224_v57  ;;  %v5252_v57 = vor.u32 %v6259_v60, %v5251_v6 }
 0x1c6   : > { %v3050_v61 = vpop.f32.mrf.mxu2 }
 0x1c7   : > { %v3051_v47 = vadd.f32 %v3050_v61, %v2882_v45  ;;  %v3219_v30 = vpop.f32.mrf.mxu3  ;;  %v5256_v45 = vor.u32 %v6255_v10, %v5253_v51  ;;  %v5260_v61 = vor.u32 %v6260_v5, %v5259_v44  ;;  %v6263_v10 = vld [vmem:[%s7152_s13 + $0x4cc] sm:$0xf]  ;;  %v5287_v44 = vld [vmem:[%s7152_s13 + $0x4d0] sm:$0xf]  ;;  %v6264_v5 = vld [vmem:[%s7152_s13 + $0x4d4] sm:$0xf] }
 0x1c8   : > { %v2883_v29 = vpop.f32.mrf.mxu1 }
 0x1c9   : > { %v3220_v37 = vadd.f32 %v3219_v30, %v3051_v47  ;;  %v2884_v20 = vadd.f32 %v2883_v29, %v7416_v12 }
 0x1ca   : > { %v3390_v25 = vpop.f32.mrf.mxu0 }
 0x1cb   : > { %v7531_v13 = vadd.f32 %v3388_v33, %v3220_v37 }
 0x1ce   : > { %v3052_v53 = vpop.f32.mrf.mxu2 }
 0x1cf   : > { %v3053_v49 = vadd.f32 %v3052_v53, %v2884_v20  ;;  %v3221_v36 = vpop.f32.mrf.mxu3  ;;  %v5281_v20 = vld [vmem:[%s7152_s13 + $0x4ec] sm:$0xf0] }
 0x1d0   : > { %v2886_v11 = vpop.f32.mrf.mxu1 }
 0x1d1   : > { %v3222_v33 = vadd.f32 %v3221_v36, %v3053_v49  ;;  %v2887_v30 = vadd.f32 %v2886_v11, %v7238_v22  ;;  %v5289_v49 = vld [vmem:[%s7152_s13 + $0x4f4] sm:$0xf0] }
 0x1d2   : > { %v3393_v47 = vpop.f32.mrf.mxu0  ;;  %v5295_v36 = vld [vmem:[%s7152_s13 + $0x4d8] sm:$0xf] }
 0x1d3   : > { %2925 = vmatmul.bf16.gmra.mxu1 %v5248_v31  ;;  %3094 = vmatmul.bf16.gmra.mxu2 %v5252_v57  ;;  %v7540_v12 = vadd.f32 %v3390_v25, %v3222_v33  ;;  %v6268_v25 = vld [vmem:[%s7152_s13 + $0x4f0] sm:$0xf0]  ;;  %v6269_v31 = vld [vmem:[%s7152_s13 + $0x4f8] sm:$0xf0] }
 0x1d4   : > { %3263 = vmatmul.bf16.gmra.mxu3 %v5256_v45  ;;  %v5284_v45 = vor.u32 %v6263_v10, %v5281_v20 }
 0x1d5   : > { %3432 = vmatmul.bf16.gmra.mxu0 %v5260_v61  ;;  %v5288_v61 = vor.u32 %v6268_v25, %v5287_v44 }
 0x1d6   : > { %v3055_v29 = vpop.f32.mrf.mxu2 }
 0x1d7   : > { %v3056_v37 = vadd.f32 %v3055_v29, %v2887_v30  ;;  %v3224_v19 = vpop.f32.mrf.mxu3  ;;  %v5292_v30 = vor.u32 %v6264_v5, %v5289_v49  ;;  %v5296_v29 = vor.u32 %v6269_v31, %v5295_v36  ;;  %v6272_v5 = vld [vmem:[%s7152_s13 + $0x514] sm:$0xf]  ;;  %v5323_v36 = vld [vmem:[%s7152_s13 + $0x518] sm:$0xf]  ;;  %v6273_v31 = vld [vmem:[%s7152_s13 + $0x51c] sm:$0xf] }
 0x1d8   : > { %v2888_v27 = vpop.f32.mrf.mxu1 }
 0x1d9   : > { %v3225_v6 = vadd.f32 %v3224_v19, %v3056_v37  ;;  %v2889_v53 = vadd.f32 %v2888_v27, %v7246_v28 }
 0x1da   : > { %v3395_v60 = vpop.f32.mrf.mxu0 }
 0x1db   : > { %v7545_v51 = vadd.f32 %v3393_v47, %v3225_v6 }
 0x1de   : > { %v3057_v22 = vpop.f32.mrf.mxu2 }
 0x1df   : > { %v3058_v57 = vadd.f32 %v3057_v22, %v2889_v53  ;;  %v3226_v11 = vpop.f32.mrf.mxu3  ;;  %v5317_v53 = vld [vmem:[%s7152_s13 + $0x534] sm:$0xf0] }
 0x1e0   : > { %v2891_v33 = vpop.f32.mrf.mxu1 }
 0x1e1   : > { %v3227_v47 = vadd.f32 %v3226_v11, %v3058_v57  ;;  %v2892_v19 = vadd.f32 %v2891_v33, %v7262_v42  ;;  %v5325_v57 = vld [vmem:[%s7152_s13 + $0x53c] sm:$0xf0] }
 0x1e2   : > { %v3398_v37 = vpop.f32.mrf.mxu0  ;;  %v5331_v11 = vld [vmem:[%s7152_s13 + $0x520] sm:$0xf] }
 0x1e3   : > { %2930 = vmatmul.bf16.gmra.mxu1 %v5284_v45  ;;  %3099 = vmatmul.bf16.gmra.mxu2 %v5288_v61  ;;  %v7554_v28 = vadd.f32 %v3395_v60, %v3227_v47  ;;  %v6277_v60 = vld [vmem:[%s7152_s13 + $0x538] sm:$0xf0]  ;;  %v6278_v45 = vld [vmem:[%s7152_s13 + $0x540] sm:$0xf0] }
 0x1e4   : > { %3268 = vmatmul.bf16.gmra.mxu3 %v5292_v30  ;;  %v5320_v30 = vor.u32 %v6272_v5, %v5317_v53 }
 0x1e5   : > { %3437 = vmatmul.bf16.gmra.mxu0 %v5296_v29  ;;  %v5324_v29 = vor.u32 %v6277_v60, %v5323_v36 }
 0x1e6   : > { %v3060_v27 = vpop.f32.mrf.mxu2 }
 0x1e7   : > { %v3061_v6 = vadd.f32 %v3060_v27, %v2892_v19  ;;  %v3229_v10 = vpop.f32.mrf.mxu3  ;;  %v5328_v19 = vor.u32 %v6273_v31, %v5325_v57  ;;  %v5332_v27 = vor.u32 %v6278_v45, %v5331_v11  ;;  %v6464_v57 = vld [vmem:[#allocation5 + $0x210] sm:$0xff]  ;;  %v6281_v11 = vld [vmem:[%s7152_s13 + $0x55c] sm:$0xf]  ;;  %v5353_v45 = vld [vmem:[%s7152_s13 + $0x57c] sm:$0xf0] }
 0x1e8   : > { %v2893_v20 = vpop.f32.mrf.mxu1  ;;  %4025 = vmatpush.bf16.msra.mxu0 %v6464_v57 }
 0x1e9   : > { %v3230_v44 = vadd.f32 %v3229_v10, %v3061_v6  ;;  %v2894_v22 = vadd.f32 %v2893_v20, %v7270_v48  ;;  %v6448_v48 = vld [vmem:[#allocation5 + $0x190] sm:$0xff] }
 0x1ea   : > { %v3400_v25 = vpop.f32.mrf.mxu0  ;;  %v6456_v20 = vld [vmem:[#allocation5 + $0x1d0] sm:$0xff]  ;;  %3687 = vmatpush.bf16.msra.mxu2 %v6448_v48 }
 0x1eb   : > { %v7559_v49 = vadd.f32 %v3398_v37, %v3230_v44  ;;  %3856 = vmatpush.bf16.msra.mxu3 %v6456_v20  ;;  %v5356_v20 = vor.u32 %v6281_v11, %v5353_v45 }
 0x1ee   : > { %v3062_v42 = vpop.f32.mrf.mxu2 }
 0x1ef   : > { %v3063_v61 = vadd.f32 %v3062_v42, %v2894_v22  ;;  %v3231_v33 = vpop.f32.mrf.mxu3  ;;  %v6440_v22 = vld [vmem:[#allocation5 + $0x150] sm:$0xff]  ;;  %v5359_v42 = vld [vmem:[%s7152_s13 + $0x560] sm:$0xf] }
 0x1f0   : > { %v2896_v47 = vpop.f32.mrf.mxu1  ;;  %3518 = vmatpush.bf16.msra.mxu1 %v6440_v22 }
 0x1f1   : > { %v3232_v6 = vadd.f32 %v3231_v33, %v3063_v61  ;;  %v2897_v44 = vadd.f32 %v2896_v47, %v7286_v62  ;;  %v6286_v61 = vld [vmem:[%s7152_s13 + $0x580] sm:$0xf0]  ;;  %v5367_v47 = vld [vmem:[%s7152_s13 + $0x568] sm:$0xf] }
 0x1f2   : > { %v3403_v10 = vpop.f32.mrf.mxu0  ;;  %v6282_v33 = vld [vmem:[%s7152_s13 + $0x564] sm:$0xf] }
 0x1f3   : > { %2935 = vmatmul.bf16.gmra.mxu1 %v5320_v30  ;;  %3104 = vmatmul.bf16.gmra.mxu2 %v5324_v29  ;;  %v7568_v37 = vadd.f32 %v3400_v25, %v3232_v6  ;;  %v5361_v29 = vld [vmem:[%s7152_s13 + $0x584] sm:$0xf0] }
 0x1f4   : > { %3273 = vmatmul.bf16.gmra.mxu3 %v5328_v19  ;;  %v6287_v19 = vld [vmem:[%s7152_s13 + $0x588] sm:$0xf0] }
 0x1f5   : > { %3442 = vmatmul.bf16.gmra.mxu0 %v5332_v27 }
 0x1f6   : > { %v3065_v5 = vpop.f32.mrf.mxu2 }
 0x1f7   : > { %v3066_v53 = vadd.f32 %v3065_v5, %v2897_v44  ;;  %v3234_v36 = vpop.f32.mrf.mxu3  ;;  %v5360_v44 = vor.u32 %v6286_v61, %v5359_v42 }
 0x1f8   : > { %v2898_v25 = vpop.f32.mrf.mxu1 }
 0x1f9   : > { %v3235_v60 = vadd.f32 %v3234_v36, %v3066_v53  ;;  %v2899_v30 = vadd.f32 %v2898_v25, %v7294_v7  ;;  %v5364_v53 = vor.u32 %v6282_v33, %v5361_v29  ;;  %v5368_v36 = vor.u32 %v6287_v19, %v5367_v47  ;;  %v6290_v33 = vld [vmem:[%s7152_s13 + $0x5a4] sm:$0xf]  ;;  %v5395_v47 = vld [vmem:[%s7152_s13 + $0x5a8] sm:$0xf]  ;;  %v6291_v19 = vld [vmem:[%s7152_s13 + $0x5ac] sm:$0xf] }
 0x1fa   : > { %v3405_v31 = vpop.f32.mrf.mxu0 }
 0x1fb   : > { %v7573_v62 = vadd.f32 %v3403_v10, %v3235_v60 }
 0x1fe   : > { %v3067_v27 = vpop.f32.mrf.mxu2 }
 0x1ff   : > { %v3068_v6 = vadd.f32 %v3067_v27, %v2899_v30  ;;  %v3236_v48 = vpop.f32.mrf.mxu3  ;;  %v5389_v30 = vld [vmem:[%s7152_s13 + $0x5c4] sm:$0xf0] }
 0x200   : > { %v2901_v5 = vpop.f32.mrf.mxu1 }
 0x201   : > { %v3237_v10 = vadd.f32 %v3236_v48, %v3068_v6  ;;  %v2902_v25 = vadd.f32 %v2901_v5, %v7310_v23  ;;  %v5397_v6 = vld [vmem:[%s7152_s13 + $0x5cc] sm:$0xf0] }
 0x202   : > { %v3408_v60 = vpop.f32.mrf.mxu0  ;;  %v5403_v48 = vld [vmem:[%s7152_s13 + $0x5b0] sm:$0xf] }
 0x203   : > { %2940 = vmatmul.bf16.gmra.mxu1 %v5356_v20  ;;  %3109 = vmatmul.bf16.gmra.mxu2 %v5360_v44  ;;  %v7582_v7 = vadd.f32 %v3405_v31, %v3237_v10  ;;  %v6295_v31 = vld [vmem:[%s7152_s13 + $0x5c8] sm:$0xf0]  ;;  %v6296_v20 = vld [vmem:[%s7152_s13 + $0x5d0] sm:$0xf0] }
 0x204   : > { %3278 = vmatmul.bf16.gmra.mxu3 %v5364_v53  ;;  %v5392_v53 = vor.u32 %v6290_v33, %v5389_v30 }
 0x205   : > { %3447 = vmatmul.bf16.gmra.mxu0 %v5368_v36  ;;  %v5396_v36 = vor.u32 %v6295_v31, %v5395_v47 }
 0x206   : > { %v3070_v22 = vpop.f32.mrf.mxu2 }
 0x207   : > { %v3071_v57 = vadd.f32 %v3070_v22, %v2902_v25  ;;  %v3239_v11 = vpop.f32.mrf.mxu3  ;;  %v5400_v25 = vor.u32 %v6291_v19, %v5397_v6  ;;  %v5404_v22 = vor.u32 %v6296_v20, %v5403_v48  ;;  %v6299_v19 = vld [vmem:[%s7152_s13 + $0x5ec] sm:$0xf]  ;;  %v5431_v48 = vld [vmem:[%s7152_s13 + $0x5f0] sm:$0xf]  ;;  %v6300_v20 = vld [vmem:[%s7152_s13 + $0x5f4] sm:$0xf] }
 0x208   : > { %v2903_v45 = vpop.f32.mrf.mxu1 }
 0x209   : > { %v3240_v42 = vadd.f32 %v3239_v11, %v3071_v57  ;;  %v2904_v27 = vadd.f32 %v2903_v45, %v7318_v34 }
 0x20a   : > { %v3410_v61 = vpop.f32.mrf.mxu0 }
 0x20b   : > { %v7587_v29 = vadd.f32 %v3408_v60, %v3240_v42 }
 0x20e   : > { %v3072_v23 = vpop.f32.mrf.mxu2 }
 0x20f   : > { %v3073_v44 = vadd.f32 %v3072_v23, %v2904_v27  ;;  %v3241_v5 = vpop.f32.mrf.mxu3  ;;  %v5425_v27 = vld [vmem:[%s7152_s13 + $0x60c] sm:$0xf0] }
 0x210   : > { %v2906_v10 = vpop.f32.mrf.mxu1 }
 0x211   : > { %v3242_v60 = vadd.f32 %v3241_v5, %v3073_v44  ;;  %v2907_v11 = vadd.f32 %v2906_v10, %v7334_v56  ;;  %v5433_v44 = vld [vmem:[%s7152_s13 + $0x614] sm:$0xf0] }
 0x212   : > { %v3413_v57 = vpop.f32.mrf.mxu0  ;;  %v5439_v5 = vld [vmem:[%s7152_s13 + $0x5f8] sm:$0xf] }
 0x213   : > { %2945 = vmatmul.bf16.gmra.mxu1 %v5392_v53  ;;  %3114 = vmatmul.bf16.gmra.mxu2 %v5396_v36  ;;  %v7596_v34 = vadd.f32 %v3410_v61, %v3242_v60  ;;  %v6304_v61 = vld [vmem:[%s7152_s13 + $0x610] sm:$0xf0]  ;;  %v6305_v53 = vld [vmem:[%s7152_s13 + $0x618] sm:$0xf0] }
 0x214   : > { %3283 = vmatmul.bf16.gmra.mxu3 %v5400_v25  ;;  %v5428_v25 = vor.u32 %v6299_v19, %v5425_v27 }
 0x215   : > { %3452 = vmatmul.bf16.gmra.mxu0 %v5404_v22  ;;  %v5432_v22 = vor.u32 %v6304_v61, %v5431_v48 }
 0x216   : > { %v3075_v45 = vpop.f32.mrf.mxu2 }
 0x217   : > { %v3076_v42 = vadd.f32 %v3075_v45, %v2907_v11  ;;  %v3244_v33 = vpop.f32.mrf.mxu3  ;;  %v5436_v11 = vor.u32 %v6300_v20, %v5433_v44  ;;  %v5440_v45 = vor.u32 %v6305_v53, %v5439_v5  ;;  %v6308_v20 = vld [vmem:[%s7152_s13 + $0x634] sm:$0xf]  ;;  %v5467_v5 = vld [vmem:[%s7152_s13 + $0x638] sm:$0xf]  ;;  %v6309_v53 = vld [vmem:[%s7152_s13 + $0x63c] sm:$0xf] }
 0x218   : > { %v2908_v30 = vpop.f32.mrf.mxu1 }
 0x219   : > { %v3245_v47 = vadd.f32 %v3244_v33, %v3076_v42  ;;  %v2909_v23 = vadd.f32 %v2908_v30, %v7342_v2 }
 0x21a   : > { %v3415_v31 = vpop.f32.mrf.mxu0 }
 0x21b   : > { %v7601_v6 = vadd.f32 %v3413_v57, %v3245_v47 }
 0x21e   : > { %v3077_v56 = vpop.f32.mrf.mxu2 }
 0x21f   : > { %v3078_v36 = vadd.f32 %v3077_v56, %v2909_v23  ;;  %v3246_v10 = vpop.f32.mrf.mxu3  ;;  %v5461_v23 = vld [vmem:[%s7152_s13 + $0x654] sm:$0xf0] }
 0x220   : > { %v2911_v60 = vpop.f32.mrf.mxu1 }
 0x221   : > { %v3247_v57 = vadd.f32 %v3246_v10, %v3078_v36  ;;  %v2912_v33 = vadd.f32 %v2911_v60, %v7358_v24  ;;  %v5469_v36 = vld [vmem:[%s7152_s13 + $0x65c] sm:$0xf0] }
 0x222   : > { %v3418_v42 = vpop.f32.mrf.mxu0  ;;  %v5475_v10 = vld [vmem:[%s7152_s13 + $0x640] sm:$0xf] }
 0x223   : > { %2950 = vmatmul.bf16.gmra.mxu1 %v5428_v25  ;;  %3119 = vmatmul.bf16.gmra.mxu2 %v5432_v22  ;;  %v7610_v2 = vadd.f32 %v3415_v31, %v3247_v57  ;;  %v6313_v31 = vld [vmem:[%s7152_s13 + $0x658] sm:$0xf0]  ;;  %v6314_v25 = vld [vmem:[%s7152_s13 + $0x660] sm:$0xf0] }
 0x224   : > { %3288 = vmatmul.bf16.gmra.mxu3 %v5436_v11  ;;  %v5464_v11 = vor.u32 %v6308_v20, %v5461_v23 }
 0x225   : > { %3457 = vmatmul.bf16.gmra.mxu0 %v5440_v45  ;;  %v5468_v45 = vor.u32 %v6313_v31, %v5467_v5 }
 0x226   : > { %v3080_v30 = vpop.f32.mrf.mxu2 }
 0x227   : > { %v3081_v47 = vadd.f32 %v3080_v30, %v2912_v33  ;;  %v3249_v19 = vpop.f32.mrf.mxu3  ;;  %v5472_v33 = vor.u32 %v6309_v53, %v5469_v36  ;;  %v5476_v30 = vor.u32 %v6314_v25, %v5475_v10  ;;  %v6463_v36 = vld [vmem:[#allocation5 + $0x208] sm:$0xff]  ;;  %v6317_v10 = vld [vmem:[%s7152_s13 + $0x67c] sm:$0xf]  ;;  %v5497_v25 = vld [vmem:[%s7152_s13 + $0x69c] sm:$0xf0] }
 0x228   : > { %v2913_v27 = vpop.f32.mrf.mxu1  ;;  %4026 = vmatpush.bf16.msra.mxu0 %v6463_v36 }
 0x229   : > { %v3250_v48 = vadd.f32 %v3249_v19, %v3081_v47  ;;  %v2914_v56 = vadd.f32 %v2913_v27, %v7366_v43  ;;  %v6447_v43 = vld [vmem:[#allocation5 + $0x188] sm:$0xff] }
 0x22a   : > { %v3420_v61 = vpop.f32.mrf.mxu0  ;;  %v6455_v27 = vld [vmem:[#allocation5 + $0x1c8] sm:$0xff]  ;;  %3688 = vmatpush.bf16.msra.mxu2 %v6447_v43 }
 0x22b   : > { %v7615_v44 = vadd.f32 %v3418_v42, %v3250_v48  ;;  %3857 = vmatpush.bf16.msra.mxu3 %v6455_v27  ;;  %v5500_v27 = vor.u32 %v6317_v10, %v5497_v25 }
 0x22e   : > { %v3082_v24 = vpop.f32.mrf.mxu2 }
 0x22f   : > { %v3083_v22 = vadd.f32 %v3082_v24, %v2914_v56  ;;  %v3251_v60 = vpop.f32.mrf.mxu3  ;;  %v6439_v56 = vld [vmem:[#allocation5 + $0x148] sm:$0xff]  ;;  %v5503_v24 = vld [vmem:[%s7152_s13 + $0x680] sm:$0xf] }
 0x230   : > { %v2916_v57 = vpop.f32.mrf.mxu1  ;;  %3519 = vmatpush.bf16.msra.mxu1 %v6439_v56 }
 0x231   : > { %v3252_v47 = vadd.f32 %v3251_v60, %v3083_v22  ;;  %v2917_v48 = vadd.f32 %v2916_v57, %v7382_v14  ;;  %v6322_v22 = vld [vmem:[%s7152_s13 + $0x6a0] sm:$0xf0]  ;;  %v5511_v57 = vld [vmem:[%s7152_s13 + $0x688] sm:$0xf] }
 0x232   : > { %v3423_v19 = vpop.f32.mrf.mxu0  ;;  %v6318_v60 = vld [vmem:[%s7152_s13 + $0x684] sm:$0xf] }
 0x233   : > { %2955 = vmatmul.bf16.gmra.mxu1 %v5464_v11  ;;  %3124 = vmatmul.bf16.gmra.mxu2 %v5468_v45  ;;  %v7624_v42 = vadd.f32 %v3420_v61, %v3252_v47  ;;  %v5505_v45 = vld [vmem:[%s7152_s13 + $0x6a4] sm:$0xf0] }
 0x234   : > { %3293 = vmatmul.bf16.gmra.mxu3 %v5472_v33  ;;  %v6323_v33 = vld [vmem:[%s7152_s13 + $0x6a8] sm:$0xf0] }
 0x235   : > { %3462 = vmatmul.bf16.gmra.mxu0 %v5476_v30 }
 0x236   : > { %v3085_v20 = vpop.f32.mrf.mxu2 }
 0x237   : > { %v3086_v23 = vadd.f32 %v3085_v20, %v2917_v48  ;;  %v3254_v5 = vpop.f32.mrf.mxu3  ;;  %v5504_v48 = vor.u32 %v6322_v22, %v5503_v24 }
 0x238   : > { %v2918_v61 = vpop.f32.mrf.mxu1 }
 0x239   : > { %v3255_v31 = vadd.f32 %v3254_v5, %v3086_v23  ;;  %v2919_v11 = vadd.f32 %v2918_v61, %v7390_v54  ;;  %v5508_v23 = vor.u32 %v6318_v60, %v5505_v45  ;;  %v5512_v5 = vor.u32 %v6323_v33, %v5511_v57  ;;  %v6326_v60 = vld [vmem:[%s7152_s13 + $0x6c4] sm:$0xf]  ;;  %v5539_v57 = vld [vmem:[%s7152_s13 + $0x6c8] sm:$0xf]  ;;  %v6327_v33 = vld [vmem:[%s7152_s13 + $0x6cc] sm:$0xf] }
 0x23a   : > { %v3425_v53 = vpop.f32.mrf.mxu0 }
 0x23b   : > { %v7629_v14 = vadd.f32 %v3423_v19, %v3255_v31 }
 0x23e   : > { %v3087_v30 = vpop.f32.mrf.mxu2 }
 0x23f   : > { %v3088_v47 = vadd.f32 %v3087_v30, %v2919_v11  ;;  %v3256_v43 = vpop.f32.mrf.mxu3  ;;  %v5533_v11 = vld [vmem:[%s7152_s13 + $0x6e4] sm:$0xf0] }
 0x240   : > { %v2921_v20 = vpop.f32.mrf.mxu1 }
 0x241   : > { %v3257_v19 = vadd.f32 %v3256_v43, %v3088_v47  ;;  %v2922_v61 = vadd.f32 %v2921_v20, %v7406_v0  ;;  %v5541_v47 = vld [vmem:[%s7152_s13 + $0x6ec] sm:$0xf0] }
 0x242   : > { %v3428_v31 = vpop.f32.mrf.mxu0  ;;  %v5547_v43 = vld [vmem:[%s7152_s13 + $0x6d0] sm:$0xf] }
 0x243   : > { %2960 = vmatmul.bf16.gmra.mxu1 %v5500_v27  ;;  %3129 = vmatmul.bf16.gmra.mxu2 %v5504_v48  ;;  %v7638_v54 = vadd.f32 %v3425_v53, %v3257_v19  ;;  %v6331_v53 = vld [vmem:[%s7152_s13 + $0x6e8] sm:$0xf0]  ;;  %v6332_v27 = vld [vmem:[%s7152_s13 + $0x6f0] sm:$0xf0] }
 0x244   : > { %3298 = vmatmul.bf16.gmra.mxu3 %v5508_v23  ;;  %v5536_v23 = vor.u32 %v6326_v60, %v5533_v11 }
 0x245   : > { %3467 = vmatmul.bf16.gmra.mxu0 %v5512_v5  ;;  %v5540_v5 = vor.u32 %v6331_v53, %v5539_v57 }
 0x246   : > { %v3090_v56 = vpop.f32.mrf.mxu2 }
 0x247   : > { %v3091_v36 = vadd.f32 %v3090_v56, %v2922_v61  ;;  %v3259_v10 = vpop.f32.mrf.mxu3  ;;  %v5544_v61 = vor.u32 %v6327_v33, %v5541_v47  ;;  %v5548_v56 = vor.u32 %v6332_v27, %v5547_v43  ;;  %v6335_v33 = vld [vmem:[%s7152_s13 + $0x70c] sm:$0xf]  ;;  %v5575_v43 = vld [vmem:[%s7152_s13 + $0x710] sm:$0xf]  ;;  %v6336_v27 = vld [vmem:[%s7152_s13 + $0x714] sm:$0xf] }
 0x248   : > { %v2923_v25 = vpop.f32.mrf.mxu1 }
 0x249   : > { %v3260_v24 = vadd.f32 %v3259_v10, %v3091_v36  ;;  %v2924_v30 = vadd.f32 %v2923_v25, %v7414_v9 }
 0x24a   : > { %v3430_v22 = vpop.f32.mrf.mxu0 }
 0x24b   : > { %v7643_v45 = vadd.f32 %v3428_v31, %v3260_v24 }
 0x24e   : > { %v3092_v0 = vpop.f32.mrf.mxu2 }
 0x24f   : > { %v3093_v48 = vadd.f32 %v3092_v0, %v2924_v30  ;;  %v3261_v20 = vpop.f32.mrf.mxu3  ;;  %v5569_v30 = vld [vmem:[%s7152_s13 + $0x72c] sm:$0xf0] }
 0x250   : > { %v2926_v19 = vpop.f32.mrf.mxu1 }
 0x251   : > { %v3262_v31 = vadd.f32 %v3261_v20, %v3093_v48  ;;  %v2927_v10 = vadd.f32 %v2926_v19, %v7242_v26  ;;  %v5577_v48 = vld [vmem:[%s7152_s13 + $0x734] sm:$0xf0] }
 0x252   : > { %v3433_v36 = vpop.f32.mrf.mxu0  ;;  %v5583_v20 = vld [vmem:[%s7152_s13 + $0x718] sm:$0xf] }
 0x253   : > { %2965 = vmatmul.bf16.gmra.mxu1 %v5536_v23  ;;  %3134 = vmatmul.bf16.gmra.mxu2 %v5540_v5  ;;  %v7652_v9 = vadd.f32 %v3430_v22, %v3262_v31  ;;  %v6340_v22 = vld [vmem:[%s7152_s13 + $0x730] sm:$0xf0]  ;;  %v6341_v23 = vld [vmem:[%s7152_s13 + $0x738] sm:$0xf0] }
 0x254   : > { %3303 = vmatmul.bf16.gmra.mxu3 %v5544_v61  ;;  %v5572_v61 = vor.u32 %v6335_v33, %v5569_v30 }
 0x255   : > { %3472 = vmatmul.bf16.gmra.mxu0 %v5548_v56  ;;  %v5576_v56 = vor.u32 %v6340_v22, %v5575_v43 }
 0x256   : > { %v3095_v25 = vpop.f32.mrf.mxu2 }
 0x257   : > { %v3096_v24 = vadd.f32 %v3095_v25, %v2927_v10  ;;  %v3264_v60 = vpop.f32.mrf.mxu3  ;;  %v5580_v10 = vor.u32 %v6336_v27, %v5577_v48  ;;  %v5584_v25 = vor.u32 %v6341_v23, %v5583_v20  ;;  %v6344_v27 = vld [vmem:[%s7152_s13 + $0x754] sm:$0xf]  ;;  %v5611_v20 = vld [vmem:[%s7152_s13 + $0x758] sm:$0xf]  ;;  %v6345_v23 = vld [vmem:[%s7152_s13 + $0x75c] sm:$0xf] }
 0x258   : > { %v2928_v11 = vpop.f32.mrf.mxu1 }
 0x259   : > { %v3265_v57 = vadd.f32 %v3264_v60, %v3096_v24  ;;  %v2929_v0 = vadd.f32 %v2928_v11, %v7258_v38 }
 0x25a   : > { %v3435_v53 = vpop.f32.mrf.mxu0 }
 0x25b   : > { %v7657_v47 = vadd.f32 %v3433_v36, %v3265_v57 }
 0x25e   : > { %v3097_v26 = vpop.f32.mrf.mxu2 }
 0x25f   : > { %v3098_v5 = vadd.f32 %v3097_v26, %v2929_v0  ;;  %v3266_v19 = vpop.f32.mrf.mxu3  ;;  %v5605_v0 = vld [vmem:[%s7152_s13 + $0x774] sm:$0xf0] }
 0x260   : > { %v2931_v31 = vpop.f32.mrf.mxu1 }
 0x261   : > { %v3267_v36 = vadd.f32 %v3266_v19, %v3098_v5  ;;  %v2932_v60 = vadd.f32 %v2931_v31, %v7266_v46  ;;  %v5613_v5 = vld [vmem:[%s7152_s13 + $0x77c] sm:$0xf0] }
 0x262   : > { %v3438_v24 = vpop.f32.mrf.mxu0  ;;  %v5619_v19 = vld [vmem:[%s7152_s13 + $0x760] sm:$0xf] }
 0x263   : > { %2970 = vmatmul.bf16.gmra.mxu1 %v5572_v61  ;;  %3139 = vmatmul.bf16.gmra.mxu2 %v5576_v56  ;;  %v7666_v38 = vadd.f32 %v3435_v53, %v3267_v36  ;;  %v6349_v53 = vld [vmem:[%s7152_s13 + $0x778] sm:$0xf0]  ;;  %v6350_v61 = vld [vmem:[%s7152_s13 + $0x780] sm:$0xf0] }
 0x264   : > { %3308 = vmatmul.bf16.gmra.mxu3 %v5580_v10  ;;  %v5608_v10 = vor.u32 %v6344_v27, %v5605_v0 }
 0x265   : > { %3477 = vmatmul.bf16.gmra.mxu0 %v5584_v25  ;;  %v5612_v25 = vor.u32 %v6349_v53, %v5611_v20 }
 0x266   : > { %v3100_v11 = vpop.f32.mrf.mxu2 }
 0x267   : > { %v3101_v57 = vadd.f32 %v3100_v11, %v2932_v60  ;;  %v3269_v33 = vpop.f32.mrf.mxu3  ;;  %v5616_v60 = vor.u32 %v6345_v23, %v5613_v5  ;;  %v5620_v11 = vor.u32 %v6350_v61, %v5619_v19  ;;  %v6462_v5 = vld [vmem:[#allocation5 + $0x200] sm:$0xff]  ;;  %v6353_v19 = vld [vmem:[%s7152_s13 + $0x79c] sm:$0xf] }
 0x268   : > { %v2933_v30 = vpop.f32.mrf.mxu1  ;;  %v5641_v61 = vld [vmem:[%s7152_s13 + $0x7bc] sm:$0xf0]  ;;  %4027 = vmatpush.bf16.msra.mxu0 %v6462_v5 }
 0x269   : > { %v3270_v43 = vadd.f32 %v3269_v33, %v3101_v57  ;;  %v2934_v26 = vadd.f32 %v2933_v30, %v7282_v58  ;;  %v6446_v58 = vld [vmem:[#allocation5 + $0x180] sm:$0xff] }
 0x26a   : > { %v3440_v22 = vpop.f32.mrf.mxu0  ;;  %v6454_v30 = vld [vmem:[#allocation5 + $0x1c0] sm:$0xff]  ;;  %3689 = vmatpush.bf16.msra.mxu2 %v6446_v58 }
 0x26b   : > { %v7671_v48 = vadd.f32 %v3438_v24, %v3270_v43  ;;  %3858 = vmatpush.bf16.msra.mxu3 %v6454_v30  ;;  %v5644_v30 = vor.u32 %v6353_v19, %v5641_v61 }
 0x26e   : > { %v3102_v46 = vpop.f32.mrf.mxu2 }
 0x26f   : > { %v3103_v56 = vadd.f32 %v3102_v46, %v2934_v26  ;;  %v3271_v31 = vpop.f32.mrf.mxu3  ;;  %v6438_v26 = vld [vmem:[#allocation5 + $0x140] sm:$0xff] }
 0x270   : > { %v2936_v36 = vpop.f32.mrf.mxu1  ;;  %3520 = vmatpush.bf16.msra.mxu1 %v6438_v26  ;;  %v5647_v46 = vld [vmem:[%s7152_s13 + $0x7a0] sm:$0xf] }
 0x271   : > { %v3272_v57 = vadd.f32 %v3271_v31, %v3103_v56  ;;  %v2937_v43 = vadd.f32 %v2936_v36, %v7290_v4  ;;  %v6358_v56 = vld [vmem:[%s7152_s13 + $0x7c0] sm:$0xf0]  ;;  %v5655_v36 = vld [vmem:[%s7152_s13 + $0x7a8] sm:$0xf] }
 0x272   : > { %v3443_v33 = vpop.f32.mrf.mxu0  ;;  %v6354_v31 = vld [vmem:[%s7152_s13 + $0x7a4] sm:$0xf] }
 0x273   : > { %2975 = vmatmul.bf16.gmra.mxu1 %v5608_v10  ;;  %3144 = vmatmul.bf16.gmra.mxu2 %v5612_v25  ;;  %v7680_v24 = vadd.f32 %v3440_v22, %v3272_v57  ;;  %v5649_v25 = vld [vmem:[%s7152_s13 + $0x7c4] sm:$0xf0] }
 0x274   : > { %3313 = vmatmul.bf16.gmra.mxu3 %v5616_v60  ;;  %v6359_v60 = vld [vmem:[%s7152_s13 + $0x7c8] sm:$0xf0] }
 0x275   : > { %3482 = vmatmul.bf16.gmra.mxu0 %v5620_v11 }
 0x276   : > { %v3105_v27 = vpop.f32.mrf.mxu2 }
 0x277   : > { %v3106_v0 = vadd.f32 %v3105_v27, %v2937_v43  ;;  %v3274_v20 = vpop.f32.mrf.mxu3  ;;  %v5648_v43 = vor.u32 %v6358_v56, %v5647_v46 }
 0x278   : > { %v2938_v22 = vpop.f32.mrf.mxu1 }
 0x279   : > { %v3275_v53 = vadd.f32 %v3274_v20, %v3106_v0  ;;  %v2939_v10 = vadd.f32 %v2938_v22, %v7306_v18  ;;  %v5652_v0 = vor.u32 %v6354_v31, %v5649_v25  ;;  %v5656_v20 = vor.u32 %v6359_v60, %v5655_v36  ;;  %v6362_v31 = vld [vmem:[%s7152_s13 + $0x7e4] sm:$0xf]  ;;  %v5683_v36 = vld [vmem:[%s7152_s13 + $0x7e8] sm:$0xf]  ;;  %v6363_v60 = vld [vmem:[%s7152_s13 + $0x7ec] sm:$0xf] }
 0x27a   : > { %v3445_v23 = vpop.f32.mrf.mxu0 }
 0x27b   : > { %v7685_v4 = vadd.f32 %v3443_v33, %v3275_v53 }
 0x27e   : > { %v3107_v11 = vpop.f32.mrf.mxu2 }
 0x27f   : > { %v3108_v57 = vadd.f32 %v3107_v11, %v2939_v10  ;;  %v3276_v58 = vpop.f32.mrf.mxu3  ;;  %v5677_v10 = vld [vmem:[%s7152_s13 + $0x804] sm:$0xf0] }
 0x280   : > { %v2941_v27 = vpop.f32.mrf.mxu1 }
 0x281   : > { %v3277_v33 = vadd.f32 %v3276_v58, %v3108_v57  ;;  %v2942_v22 = vadd.f32 %v2941_v27, %v7314_v32  ;;  %v5685_v57 = vld [vmem:[%s7152_s13 + $0x80c] sm:$0xf0] }
 0x282   : > { %v3448_v53 = vpop.f32.mrf.mxu0  ;;  %v5691_v58 = vld [vmem:[%s7152_s13 + $0x7f0] sm:$0xf] }
 0x283   : > { %2980 = vmatmul.bf16.gmra.mxu1 %v5644_v30  ;;  %3149 = vmatmul.bf16.gmra.mxu2 %v5648_v43  ;;  %v7694_v18 = vadd.f32 %v3445_v23, %v3277_v33  ;;  %v6367_v23 = vld [vmem:[%s7152_s13 + $0x808] sm:$0xf0]  ;;  %v6368_v30 = vld [vmem:[%s7152_s13 + $0x810] sm:$0xf0] }
 0x284   : > { %3318 = vmatmul.bf16.gmra.mxu3 %v5652_v0  ;;  %v5680_v0 = vor.u32 %v6362_v31, %v5677_v10 }
 0x285   : > { %3487 = vmatmul.bf16.gmra.mxu0 %v5656_v20  ;;  %v5684_v20 = vor.u32 %v6367_v23, %v5683_v36 }
 0x286   : > { %v3110_v26 = vpop.f32.mrf.mxu2 }
 0x287   : > { %v3111_v5 = vadd.f32 %v3110_v26, %v2942_v22  ;;  %v3279_v19 = vpop.f32.mrf.mxu3  ;;  %v5688_v22 = vor.u32 %v6363_v60, %v5685_v57  ;;  %v5692_v26 = vor.u32 %v6368_v30, %v5691_v58  ;;  %v6371_v60 = vld [vmem:[%s7152_s13 + $0x82c] sm:$0xf]  ;;  %v5719_v58 = vld [vmem:[%s7152_s13 + $0x830] sm:$0xf]  ;;  %v6372_v30 = vld [vmem:[%s7152_s13 + $0x834] sm:$0xf] }
 0x288   : > { %v2943_v61 = vpop.f32.mrf.mxu1 }
 0x289   : > { %v3280_v46 = vadd.f32 %v3279_v19, %v3111_v5  ;;  %v2944_v11 = vadd.f32 %v2943_v61, %v7330_v52 }
 0x28a   : > { %v3450_v56 = vpop.f32.mrf.mxu0 }
 0x28b   : > { %v7699_v25 = vadd.f32 %v3448_v53, %v3280_v46 }
 0x28d   : > { %8368 = vst [vmem:[#allocation38_spill] sm:$0xff] %v7699_v25 }
 0x28e   : > { %v3112_v32 = vpop.f32.mrf.mxu2 }
 0x28f   : > { %v3113_v43 = vadd.f32 %v3112_v32, %v2944_v11  ;;  %v3281_v27 = vpop.f32.mrf.mxu3  ;;  %v5713_v11 = vld [vmem:[%s7152_s13 + $0x84c] sm:$0xf0] }
 0x290   : > { %v2946_v33 = vpop.f32.mrf.mxu1 }
 0x291   : > { %v3282_v53 = vadd.f32 %v3281_v27, %v3113_v43  ;;  %v2947_v19 = vadd.f32 %v2946_v33, %v7338_v63  ;;  %v5721_v43 = vld [vmem:[%s7152_s13 + $0x854] sm:$0xf0] }
 0x292   : > { %v3453_v5 = vpop.f32.mrf.mxu0  ;;  %v5727_v27 = vld [vmem:[%s7152_s13 + $0x838] sm:$0xf] }
 0x293   : > { %2985 = vmatmul.bf16.gmra.mxu1 %v5680_v0  ;;  %3154 = vmatmul.bf16.gmra.mxu2 %v5684_v20  ;;  %v7708_v52 = vadd.f32 %v3450_v56, %v3282_v53  ;;  %v6376_v56 = vld [vmem:[%s7152_s13 + $0x850] sm:$0xf0]  ;;  %v6377_v0 = vld [vmem:[%s7152_s13 + $0x858] sm:$0xf0] }
 0x294   : > { %3323 = vmatmul.bf16.gmra.mxu3 %v5688_v22  ;;  %v5716_v22 = vor.u32 %v6371_v60, %v5713_v11 }
 0x295   : > { %8369 = vst [vmem:[#allocation39_spill] sm:$0xff] %v7708_v52  ;;  %3492 = vmatmul.bf16.gmra.mxu0 %v5692_v26  ;;  %v5720_v26 = vor.u32 %v6376_v56, %v5719_v58 }
 0x296   : > { %v3115_v61 = vpop.f32.mrf.mxu2 }
 0x297   : > { %v3116_v46 = vadd.f32 %v3115_v61, %v2947_v19  ;;  %v3284_v31 = vpop.f32.mrf.mxu3  ;;  %v5724_v19 = vor.u32 %v6372_v30, %v5721_v43  ;;  %v5728_v61 = vor.u32 %v6377_v0, %v5727_v27  ;;  %v6380_v30 = vld [vmem:[%s7152_s13 + $0x874] sm:$0xf]  ;;  %v5755_v27 = vld [vmem:[%s7152_s13 + $0x878] sm:$0xf]  ;;  %v6381_v0 = vld [vmem:[%s7152_s13 + $0x87c] sm:$0xf] }
 0x298   : > { %v2948_v10 = vpop.f32.mrf.mxu1 }
 0x299   : > { %v3285_v36 = vadd.f32 %v3284_v31, %v3116_v46  ;;  %v2949_v32 = vadd.f32 %v2948_v10, %v7354_v16 }
 0x29a   : > { %v3455_v23 = vpop.f32.mrf.mxu0 }
 0x29b   : > { %v7713_v57 = vadd.f32 %v3453_v5, %v3285_v36 }
 0x29d   : > { %8370 = vst [vmem:[#allocation40_spill] sm:$0xff] %v7713_v57  ;;  %v7891_v57 = vld [vmem:[#allocation8] ss:$0 sm:$0xff] }
 0x29e   : > { %v3117_v63 = vpop.f32.mrf.mxu2 }
 0x29f   : > { %v3118_v20 = vadd.f32 %v3117_v63, %v2949_v32  ;;  %v3286_v33 = vpop.f32.mrf.mxu3  ;;  %v5749_v32 = vld [vmem:[%s7152_s13 + $0x894] sm:$0xf0]  ;;  %v8373_v63 = vld [vmem:[#allocation26_spill] sm:$0xff] }
 0x2a0   : > { %v2951_v53 = vpop.f32.mrf.mxu1 }
 0x2a1   : > { %v3287_v5 = vadd.f32 %v3286_v33, %v3118_v20  ;;  %v2952_v31 = vadd.f32 %v2951_v53, %v7362_v40  ;;  %v5757_v33 = vld [vmem:[%s7152_s13 + $0x89c] sm:$0xf0] }
 0x2a2   : > { %v3458_v46 = vpop.f32.mrf.mxu0 }
 0x2a3   : > { %2990 = vmatmul.bf16.gmra.mxu1 %v5716_v22  ;;  %3159 = vmatmul.bf16.gmra.mxu2 %v5720_v26  ;;  %v7722_v16 = vadd.f32 %v3455_v23, %v3287_v5  ;;  %v6385_v23 = vld [vmem:[%s7152_s13 + $0x898] sm:$0xf0]  ;;  %v5763_v22 = vld [vmem:[%s7152_s13 + $0x880] sm:$0xf]  ;;  %v6386_v26 = vld [vmem:[%s7152_s13 + $0x8a0] sm:$0xf0] }
 0x2a4   : > { %3328 = vmatmul.bf16.gmra.mxu3 %v5724_v19  ;;  %v5756_v5 = vor.u32 %v6385_v23, %v5755_v27 }
 0x2a5   : > { %8371 = vst [vmem:[#allocation41_spill] sm:$0xff] %v7722_v16  ;;  %3497 = vmatmul.bf16.gmra.mxu0 %v5728_v61  ;;  %v5752_v61 = vor.u32 %v6380_v30, %v5749_v32 }
 0x2a6   : > { %v3120_v10 = vpop.f32.mrf.mxu2 }
 0x2a7   : > { %v3121_v36 = vadd.f32 %v3120_v10, %v2952_v31  ;;  %v3289_v60 = vpop.f32.mrf.mxu3  ;;  %v5760_v10 = vor.u32 %v6381_v0, %v5757_v33  ;;  %v6389_v33 = vld [vmem:[%s7152_s13 + $0x8bc] sm:$0xf] }
 0x2a8   : > { %v2953_v11 = vpop.f32.mrf.mxu1 }
 0x2a9   : > { %v3290_v58 = vadd.f32 %v3289_v60, %v3121_v36  ;;  %v2954_v20 = vadd.f32 %v2953_v11, %v8373_v63  ;;  %v5764_v36 = vor.u32 %v6386_v26, %v5763_v22  ;;  %v5785_v22 = vld [vmem:[%s7152_s13 + $0x8dc] sm:$0xf0] }
 0x2aa   : > { %v3460_v56 = vpop.f32.mrf.mxu0 }
 0x2ab   : > { %v7727_v43 = vadd.f32 %v3458_v46, %v3290_v58  ;;  %v8375_v58 = vld [vmem:[#allocation28_spill] sm:$0xff] }
 0x2ad   : > { %8372 = vst [vmem:[#allocation42_spill] sm:$0xff] %v7727_v43 }
 0x2ae   : > { %v3122_v40 = vpop.f32.mrf.mxu2 }
 0x2af   : > { %v3123_v53 = vadd.f32 %v3122_v40, %v2954_v20  ;;  %v3291_v19 = vpop.f32.mrf.mxu3  ;;  %v5791_v40 = vld [vmem:[%s7152_s13 + $0x8c0] sm:$0xf] }
 0x2b0   : > { %v2956_v31 = vpop.f32.mrf.mxu1 }
 0x2b1   : > { %v3292_v46 = vadd.f32 %v3291_v19, %v3123_v53  ;;  %v2957_v30 = vadd.f32 %v2956_v31, %v8375_v58  ;;  %v6390_v53 = vld [vmem:[%s7152_s13 + $0x8c4] sm:$0xf]  ;;  %v8377_v19 = vld [vmem:[#allocation30_spill] sm:$0xff] }
 0x2b2   : > { %v3463_v60 = vpop.f32.mrf.mxu0 }
 0x2b3   : > { %2995 = vmatmul.bf16.gmra.mxu1 %v5752_v61  ;;  %3164 = vmatmul.bf16.gmra.mxu2 %v5756_v5  ;;  %v7736_v11 = vadd.f32 %v3460_v56, %v3292_v46  ;;  %v6394_v56 = vld [vmem:[%s7152_s13 + $0x8e0] sm:$0xf0]  ;;  %v5793_v5 = vld [vmem:[%s7152_s13 + $0x8e4] sm:$0xf0] }
 0x2b4   : > { %3333 = vmatmul.bf16.gmra.mxu3 %v5760_v10  ;;  %v5799_v10 = vld [vmem:[%s7152_s13 + $0x8c8] sm:$0xf] }
 0x2b5   : > { %8374 = vst [vmem:[#allocation26_spill] sm:$0xff] %v7736_v11  ;;  %3502 = vmatmul.bf16.gmra.mxu0 %v5764_v36  ;;  %v6395_v36 = vld [vmem:[%s7152_s13 + $0x8e8] sm:$0xf0] }
 0x2b6   : > { %v3125_v32 = vpop.f32.mrf.mxu2 }
 0x2b7   : > { %v3126_v27 = vadd.f32 %v3125_v32, %v2957_v30  ;;  %v3294_v23 = vpop.f32.mrf.mxu3  ;;  %v5788_v30 = vor.u32 %v6389_v33, %v5785_v22  ;;  %v5792_v32 = vor.u32 %v6394_v56, %v5791_v40 }
 0x2b8   : > { %v2958_v0 = vpop.f32.mrf.mxu1 }
 0x2b9   : > { %v3295_v63 = vadd.f32 %v3294_v23, %v3126_v27  ;;  %v2959_v61 = vadd.f32 %v2958_v0, %v8377_v19  ;;  %v5796_v27 = vor.u32 %v6390_v53, %v5793_v5  ;;  %v5800_v23 = vor.u32 %v6395_v36, %v5799_v10  ;;  %v8379_v19 = vld [vmem:[#allocation32_spill] sm:$0xff]  ;;  %v6112_v10 = vld [vmem:[%s7152_s13 + $0x14] sm:$0xf]  ;;  %v4685_v36 = vld [vmem:[%s7152_s13 + $0x34] sm:$0xf0] }
 0x2ba   : > { %v3465_v20 = vpop.f32.mrf.mxu0 }
 0x2bb   : > { %v7741_v26 = vadd.f32 %v3463_v60, %v3295_v63 }
 0x2bd   : > { %8376 = vst [vmem:[#allocation28_spill] sm:$0xff] %v7741_v26 }
 0x2be   : > { %v3127_v31 = vpop.f32.mrf.mxu2 }
 0x2bf   : > { %v3128_v46 = vadd.f32 %v3127_v31, %v2959_v61  ;;  %v3296_v58 = vpop.f32.mrf.mxu3 }
 0x2c0   : > { %v2961_v11 = vpop.f32.mrf.mxu1 }
 0x2c1   : > { %v3297_v60 = vadd.f32 %v3296_v58, %v3128_v46  ;;  %v2962_v33 = vadd.f32 %v2961_v11, %v8379_v19  ;;  %v4691_v46 = vld [vmem:[%s7152_s13 + $0x18] sm:$0xf]  ;;  %v6113_v58 = vld [vmem:[%s7152_s13 + $0x1c] sm:$0xf] }
 0x2c2   : > { %v3468_v63 = vpop.f32.mrf.mxu0 }
 0x2c3   : > { %3000 = vmatmul.bf16.gmra.mxu1 %v5788_v30  ;;  %3169 = vmatmul.bf16.gmra.mxu2 %v5792_v32  ;;  %v7750_v0 = vadd.f32 %v3465_v20, %v3297_v60  ;;  %v6117_v20 = vld [vmem:[%s7152_s13 + $0x38] sm:$0xf0]  ;;  %v6118_v60 = vld [vmem:[%s7152_s13 + $0x40] sm:$0xf0] }
 0x2c4   : > { %3338 = vmatmul.bf16.gmra.mxu3 %v5796_v27  ;;  %v8381_v30 = vld [vmem:[#allocation34_spill] sm:$0xff] }
 0x2c5   : > { %8378 = vst [vmem:[#allocation30_spill] sm:$0xff] %v7750_v0  ;;  %3507 = vmatmul.bf16.gmra.mxu0 %v5800_v23  ;;  %v4693_v27 = vld [vmem:[%s7152_s13 + $0x3c] sm:$0xf0] }
 0x2c6   : > { %v3130_v22 = vpop.f32.mrf.mxu2  ;;  %v4699_v23 = vld [vmem:[%s7152_s13 + $0x20] sm:$0xf] }
 0x2c7   : > { %v3131_v40 = vadd.f32 %v3130_v22, %v2962_v33  ;;  %v3299_v56 = vpop.f32.mrf.mxu3  ;;  %v4688_v33 = vor.u32 %v6112_v10, %v4685_v36  ;;  %v4692_v22 = vor.u32 %v6117_v20, %v4691_v46 }
 0x2c8   : > { %v2963_v53 = vpop.f32.mrf.mxu1 }
 0x2c9   : > { %v3300_v61 = vadd.f32 %v3299_v56, %v3131_v40  ;;  %v2964_v32 = vadd.f32 %v2963_v53, %v8381_v30  ;;  %v4696_v40 = vor.u32 %v6113_v58, %v4693_v27  ;;  %v4700_v56 = vor.u32 %v6118_v60, %v4699_v23  ;;  %v8383_v30 = vld [vmem:[#allocation15_spill] sm:$0xff]  ;;  %v6121_v27 = vld [vmem:[%s7152_s13 + $0x5c] sm:$0xf]  ;;  %v4721_v23 = vld [vmem:[%s7152_s13 + $0x7c] sm:$0xf0] }
 0x2ca   : > { %v3470_v5 = vpop.f32.mrf.mxu0 }
 0x2cb   : > { %v7755_v31 = vadd.f32 %v3468_v63, %v3300_v61 }
 0x2cd   : > { %8380 = vst [vmem:[#allocation32_spill] sm:$0xff] %v7755_v31 }
 0x2ce   : > { %v3132_v11 = vpop.f32.mrf.mxu2 }
 0x2cf   : > { %v3133_v19 = vadd.f32 %v3132_v11, %v2964_v32  ;;  %v3301_v0 = vpop.f32.mrf.mxu3  ;;  %v4727_v11 = vld [vmem:[%s7152_s13 + $0x60] sm:$0xf] }
 0x2d0   : > { %v2966_v26 = vpop.f32.mrf.mxu1 }
 0x2d1   : > { %v3302_v63 = vadd.f32 %v3301_v0, %v3133_v19  ;;  %v2967_v10 = vadd.f32 %v2966_v26, %v8383_v30  ;;  %v6122_v19 = vld [vmem:[%s7152_s13 + $0x64] sm:$0xf] }
 0x2d2   : > { %v3473_v61 = vpop.f32.mrf.mxu0 }
 0x2d3   : > { %3521 = vmatmul.bf16.vlgmr.msra.gmra.mxu1 %v4688_v33  ;;  %3690 = vmatmul.bf16.vlgmr.msra.gmra.mxu2 %v4692_v22  ;;  %v7764_v53 = vadd.f32 %v3470_v5, %v3302_v63  ;;  %v6126_v5 = vld [vmem:[%s7152_s13 + $0x80] sm:$0xf0]  ;;  %v8385_v33 = vld [vmem:[#allocation16_spill] sm:$0xff] }
 0x2d4   : > { %3859 = vmatmul.bf16.vlgmr.msra.gmra.mxu3 %v4696_v40  ;;  %v4729_v40 = vld [vmem:[%s7152_s13 + $0x84] sm:$0xf0]  ;;  %v6127_v63 = vld [vmem:[%s7152_s13 + $0x88] sm:$0xf0] }
 0x2d5   : > { %8382 = vst [vmem:[#allocation34_spill] sm:$0xff] %v7764_v53  ;;  %4028 = vmatmul.bf16.vlgmr.msra.gmra.mxu0 %v4700_v56  ;;  %v4735_v56 = vld [vmem:[%s7152_s13 + $0x68] sm:$0xf] }
 0x2d6   : > { %v3135_v36 = vpop.f32.mrf.mxu2 }
 0x2d7   : > { %v3136_v46 = vadd.f32 %v3135_v36, %v2967_v10  ;;  %v3304_v20 = vpop.f32.mrf.mxu3  ;;  %v4724_v10 = vor.u32 %v6121_v27, %v4721_v23  ;;  %v4728_v36 = vor.u32 %v6126_v5, %v4727_v11 }
 0x2d8   : > { %v2968_v58 = vpop.f32.mrf.mxu1 }
 0x2d9   : > { %v3305_v0 = vadd.f32 %v3304_v20, %v3136_v46  ;;  %v2969_v22 = vadd.f32 %v2968_v58, %v8385_v33  ;;  %v4732_v46 = vor.u32 %v6122_v19, %v4729_v40  ;;  %v4736_v20 = vor.u32 %v6127_v63, %v4735_v56  ;;  %v8387_v33 = vld [vmem:[#allocation17_spill] sm:$0xff]  ;;  %v6130_v40 = vld [vmem:[%s7152_s13 + $0xa4] sm:$0xf]  ;;  %v4757_v56 = vld [vmem:[%s7152_s13 + $0xc4] sm:$0xf0] }
 0x2da   : > { %v3475_v32 = vpop.f32.mrf.mxu0 }
 0x2db   : > { %v7769_v60 = vadd.f32 %v3473_v61, %v3305_v0 }
 0x2dd   : > { %8384 = vst [vmem:[#allocation15_spill] sm:$0xff] %v7769_v60 }
 0x2de   : > { %v3137_v26 = vpop.f32.mrf.mxu2 }
 0x2df   : > { %v3138_v30 = vadd.f32 %v3137_v26, %v2969_v22  ;;  %v3306_v53 = vpop.f32.mrf.mxu3  ;;  %v4763_v26 = vld [vmem:[%s7152_s13 + $0xa8] sm:$0xf] }
 0x2e0   : > { %v2971_v31 = vpop.f32.mrf.mxu1 }
 0x2e1   : > { %v3307_v61 = vadd.f32 %v3306_v53, %v3138_v30  ;;  %v2972_v27 = vadd.f32 %v2971_v31, %v8387_v33  ;;  %v6131_v30 = vld [vmem:[%s7152_s13 + $0xac] sm:$0xf] }
 0x2e2   : > { %v3478_v0 = vpop.f32.mrf.mxu0 }
 0x2e3   : > { %3526 = vmatmul.bf16.gmra.mxu1 %v4724_v10  ;;  %3695 = vmatmul.bf16.gmra.mxu2 %v4728_v36  ;;  %v7778_v58 = vadd.f32 %v3475_v32, %v3307_v61  ;;  %v6135_v32 = vld [vmem:[%s7152_s13 + $0xc8] sm:$0xf0]  ;;  %v8389_v10 = vld [vmem:[#allocation18_spill] sm:$0xff]  ;;  %v6136_v61 = vld [vmem:[%s7152_s13 + $0xd0] sm:$0xf0] }
 0x2e4   : > { %3864 = vmatmul.bf16.gmra.mxu3 %v4732_v46  ;;  %v4765_v46 = vld [vmem:[%s7152_s13 + $0xcc] sm:$0xf0] }
 0x2e5   : > { %8386 = vst [vmem:[#allocation16_spill] sm:$0xff] %v7778_v58  ;;  %4033 = vmatmul.bf16.gmra.mxu0 %v4736_v20  ;;  %v4771_v20 = vld [vmem:[%s7152_s13 + $0xb0] sm:$0xf] }
 0x2e6   : > { %v3140_v23 = vpop.f32.mrf.mxu2 }
 0x2e7   : > { %v3141_v11 = vadd.f32 %v3140_v23, %v2972_v27  ;;  %v3309_v5 = vpop.f32.mrf.mxu3  ;;  %v4760_v27 = vor.u32 %v6130_v40, %v4757_v56  ;;  %v4764_v23 = vor.u32 %v6135_v32, %v4763_v26 }
 0x2e8   : > { %v2973_v19 = vpop.f32.mrf.mxu1 }
 0x2e9   : > { %v3310_v53 = vadd.f32 %v3309_v5, %v3141_v11  ;;  %v2974_v36 = vadd.f32 %v2973_v19, %v8389_v10  ;;  %v4768_v11 = vor.u32 %v6131_v30, %v4765_v46  ;;  %v4772_v5 = vor.u32 %v6136_v61, %v4771_v20  ;;  %v8391_v10 = vld [vmem:[#allocation19_spill] sm:$0xff]  ;;  %v6139_v46 = vld [vmem:[%s7152_s13 + $0xec] sm:$0xf]  ;;  %v4793_v20 = vld [vmem:[%s7152_s13 + $0x10c] sm:$0xf0] }
 0x2ea   : > { %v3480_v22 = vpop.f32.mrf.mxu0 }
 0x2eb   : > { %v7783_v63 = vadd.f32 %v3478_v0, %v3310_v53 }
 0x2ed   : > { %8388 = vst [vmem:[#allocation17_spill] sm:$0xff] %v7783_v63 }
 0x2ee   : > { %v3142_v31 = vpop.f32.mrf.mxu2 }
 0x2ef   : > { %v3143_v33 = vadd.f32 %v3142_v31, %v2974_v36  ;;  %v3311_v58 = vpop.f32.mrf.mxu3  ;;  %v4799_v31 = vld [vmem:[%s7152_s13 + $0xf0] sm:$0xf] }
 0x2f0   : > { %v2976_v60 = vpop.f32.mrf.mxu1 }
 0x2f1   : > { %v3312_v0 = vadd.f32 %v3311_v58, %v3143_v33  ;;  %v2977_v40 = vadd.f32 %v2976_v60, %v8391_v10  ;;  %v6140_v33 = vld [vmem:[%s7152_s13 + $0xf4] sm:$0xf] }
 0x2f2   : > { %v3483_v53 = vpop.f32.mrf.mxu0 }
 0x2f3   : > { %3531 = vmatmul.bf16.gmra.mxu1 %v4760_v27  ;;  %3700 = vmatmul.bf16.gmra.mxu2 %v4764_v23  ;;  %v7792_v19 = vadd.f32 %v3480_v22, %v3312_v0  ;;  %v6144_v22 = vld [vmem:[%s7152_s13 + $0x110] sm:$0xf0]  ;;  %v8393_v27 = vld [vmem:[#allocation20_spill] sm:$0xff]  ;;  %v6145_v0 = vld [vmem:[%s7152_s13 + $0x118] sm:$0xf0] }
 0x2f4   : > { %3869 = vmatmul.bf16.gmra.mxu3 %v4768_v11  ;;  %v4801_v11 = vld [vmem:[%s7152_s13 + $0x114] sm:$0xf0] }
 0x2f5   : > { %8390 = vst [vmem:[#allocation18_spill] sm:$0xff] %v7792_v19  ;;  %4038 = vmatmul.bf16.gmra.mxu0 %v4772_v5  ;;  %v4807_v5 = vld [vmem:[%s7152_s13 + $0xf8] sm:$0xf] }
 0x2f6   : > { %v3145_v56 = vpop.f32.mrf.mxu2 }
 0x2f7   : > { %v3146_v26 = vadd.f32 %v3145_v56, %v2977_v40  ;;  %v3314_v32 = vpop.f32.mrf.mxu3  ;;  %v4796_v40 = vor.u32 %v6139_v46, %v4793_v20  ;;  %v4800_v56 = vor.u32 %v6144_v22, %v4799_v31 }
 0x2f8   : > { %v2978_v30 = vpop.f32.mrf.mxu1 }
 0x2f9   : > { %v3315_v58 = vadd.f32 %v3314_v32, %v3146_v26  ;;  %v2979_v23 = vadd.f32 %v2978_v30, %v8393_v27  ;;  %v4804_v26 = vor.u32 %v6140_v33, %v4801_v11  ;;  %v4808_v32 = vor.u32 %v6145_v0, %v4807_v5  ;;  %v8395_v27 = vld [vmem:[#allocation21_spill] sm:$0xff] }
 0x2fa   : > { %v3485_v36 = vpop.f32.mrf.mxu0  ;;  %v6148_v11 = vld [vmem:[%s7152_s13 + $0x134] sm:$0xf]  ;;  %v4829_v5 = vld [vmem:[%s7152_s13 + $0x154] sm:$0xf0] }
 0x2fb   : > { %v7797_v61 = vadd.f32 %v3483_v53, %v3315_v58 }
 0x2fd   : > { %8392 = vst [vmem:[#allocation19_spill] sm:$0xff] %v7797_v61 }
 0x2fe   : > { %v3147_v60 = vpop.f32.mrf.mxu2 }
 0x2ff   : > { %v3148_v10 = vadd.f32 %v3147_v60, %v2979_v23  ;;  %v3316_v19 = vpop.f32.mrf.mxu3  ;;  %v4835_v60 = vld [vmem:[%s7152_s13 + $0x138] sm:$0xf] }
 0x300   : > { %v2981_v63 = vpop.f32.mrf.mxu1 }
 0x301   : > { %v3317_v53 = vadd.f32 %v3316_v19, %v3148_v10  ;;  %v2982_v46 = vadd.f32 %v2981_v63, %v8395_v27  ;;  %v6149_v10 = vld [vmem:[%s7152_s13 + $0x13c] sm:$0xf] }
 0x302   : > { %v3488_v58 = vpop.f32.mrf.mxu0 }
 0x303   : > { %3536 = vmatmul.bf16.gmra.mxu1 %v4796_v40  ;;  %3705 = vmatmul.bf16.gmra.mxu2 %v4800_v56  ;;  %v7806_v30 = vadd.f32 %v3485_v36, %v3317_v53  ;;  %v6153_v36 = vld [vmem:[%s7152_s13 + $0x158] sm:$0xf0]  ;;  %v6154_v53 = vld [vmem:[%s7152_s13 + $0x160] sm:$0xf0] }
 0x304   : > { %3874 = vmatmul.bf16.gmra.mxu3 %v4804_v26  ;;  %v8397_v40 = vld [vmem:[#allocation22_spill] sm:$0xff] }
 0x305   : > { %8394 = vst [vmem:[#allocation20_spill] sm:$0xff] %v7806_v30  ;;  %4043 = vmatmul.bf16.gmra.mxu0 %v4808_v32  ;;  %v4837_v26 = vld [vmem:[%s7152_s13 + $0x15c] sm:$0xf0] }
 0x306   : > { %v3150_v20 = vpop.f32.mrf.mxu2  ;;  %v4843_v32 = vld [vmem:[%s7152_s13 + $0x140] sm:$0xf] }
 0x307   : > { %v3151_v31 = vadd.f32 %v3150_v20, %v2982_v46  ;;  %v3319_v22 = vpop.f32.mrf.mxu3  ;;  %v4832_v46 = vor.u32 %v6148_v11, %v4829_v5  ;;  %v4836_v20 = vor.u32 %v6153_v36, %v4835_v60 }
 0x308   : > { %v2983_v33 = vpop.f32.mrf.mxu1 }
 0x309   : > { %v3320_v19 = vadd.f32 %v3319_v22, %v3151_v31  ;;  %v2984_v56 = vadd.f32 %v2983_v33, %v8397_v40  ;;  %v4840_v31 = vor.u32 %v6149_v10, %v4837_v26  ;;  %v4844_v22 = vor.u32 %v6154_v53, %v4843_v32  ;;  %v8399_v40 = vld [vmem:[#allocation23_spill] sm:$0xff]  ;;  %v6157_v26 = vld [vmem:[%s7152_s13 + $0x17c] sm:$0xf]  ;;  %v4865_v32 = vld [vmem:[%s7152_s13 + $0x19c] sm:$0xf0] }
 0x30a   : > { %v3490_v23 = vpop.f32.mrf.mxu0 }
 0x30b   : > { %v7811_v0 = vadd.f32 %v3488_v58, %v3320_v19 }
 0x30d   : > { %8396 = vst [vmem:[#allocation21_spill] sm:$0xff] %v7811_v0 }
 0x30e   : > { %v3152_v63 = vpop.f32.mrf.mxu2 }
 0x30f   : > { %v3153_v27 = vadd.f32 %v3152_v63, %v2984_v56  ;;  %v3321_v30 = vpop.f32.mrf.mxu3  ;;  %v4871_v63 = vld [vmem:[%s7152_s13 + $0x180] sm:$0xf] }
 0x310   : > { %v2986_v61 = vpop.f32.mrf.mxu1 }
 0x311   : > { %v3322_v58 = vadd.f32 %v3321_v30, %v3153_v27  ;;  %v2987_v11 = vadd.f32 %v2986_v61, %v8399_v40  ;;  %v6158_v27 = vld [vmem:[%s7152_s13 + $0x184] sm:$0xf] }
 0x312   : > { %v3493_v19 = vpop.f32.mrf.mxu0 }
 0x313   : > { %3541 = vmatmul.bf16.gmra.mxu1 %v4832_v46  ;;  %3710 = vmatmul.bf16.gmra.mxu2 %v4836_v20  ;;  %v7820_v33 = vadd.f32 %v3490_v23, %v3322_v58  ;;  %v6162_v23 = vld [vmem:[%s7152_s13 + $0x1a0] sm:$0xf0]  ;;  %v8401_v46 = vld [vmem:[#allocation24_spill] sm:$0xff] }
 0x314   : > { %3879 = vmatmul.bf16.gmra.mxu3 %v4840_v31  ;;  %v4873_v31 = vld [vmem:[%s7152_s13 + $0x1a4] sm:$0xf0]  ;;  %v6163_v58 = vld [vmem:[%s7152_s13 + $0x1a8] sm:$0xf0] }
 0x315   : > { %8398 = vst [vmem:[#allocation22_spill] sm:$0xff] %v7820_v33  ;;  %4048 = vmatmul.bf16.gmra.mxu0 %v4844_v22  ;;  %v4879_v22 = vld [vmem:[%s7152_s13 + $0x188] sm:$0xf] }
 0x316   : > { %v3155_v5 = vpop.f32.mrf.mxu2 }
 0x317   : > { %v3156_v60 = vadd.f32 %v3155_v5, %v2987_v11  ;;  %v3324_v36 = vpop.f32.mrf.mxu3  ;;  %v4868_v11 = vor.u32 %v6157_v26, %v4865_v32  ;;  %v4872_v5 = vor.u32 %v6162_v23, %v4871_v63 }
 0x318   : > { %v2988_v10 = vpop.f32.mrf.mxu1 }
 0x319   : > { %v3325_v30 = vadd.f32 %v3324_v36, %v3156_v60  ;;  %v2989_v20 = vadd.f32 %v2988_v10, %v8401_v46  ;;  %v4876_v60 = vor.u32 %v6158_v27, %v4873_v31  ;;  %v4880_v36 = vor.u32 %v6163_v58, %v4879_v22  ;;  %v8403_v46 = vld [vmem:[#allocation25_spill] sm:$0xff]  ;;  %v6166_v31 = vld [vmem:[%s7152_s13 + $0x1c4] sm:$0xf]  ;;  %v4901_v22 = vld [vmem:[%s7152_s13 + $0x1e4] sm:$0xf0] }
 0x31a   : > { %v3495_v56 = vpop.f32.mrf.mxu0 }
 0x31b   : > { %v7825_v53 = vadd.f32 %v3493_v19, %v3325_v30 }
 0x31d   : > { %8400 = vst [vmem:[#allocation23_spill] sm:$0xff] %v7825_v53 }
 0x31e   : > { %v3157_v61 = vpop.f32.mrf.mxu2 }
 0x31f   : > { %v3158_v40 = vadd.f32 %v3157_v61, %v2989_v20  ;;  %v3326_v33 = vpop.f32.mrf.mxu3  ;;  %v4907_v61 = vld [vmem:[%s7152_s13 + $0x1c8] sm:$0xf] }
 0x320   : > { %v2991_v0 = vpop.f32.mrf.mxu1 }
 0x321   : > { %v3327_v19 = vadd.f32 %v3326_v33, %v3158_v40  ;;  %v2992_v26 = vadd.f32 %v2991_v0, %v8403_v46  ;;  %v6167_v40 = vld [vmem:[%s7152_s13 + $0x1cc] sm:$0xf] }
 0x322   : > { %v3498_v30 = vpop.f32.mrf.mxu0 }
 0x323   : > { %3546 = vmatmul.bf16.gmra.mxu1 %v4868_v11  ;;  %3715 = vmatmul.bf16.gmra.mxu2 %v4872_v5  ;;  %v7834_v10 = vadd.f32 %v3495_v56, %v3327_v19  ;;  %v6171_v56 = vld [vmem:[%s7152_s13 + $0x1e8] sm:$0xf0]  ;;  %v8405_v11 = vld [vmem:[#allocation27_spill] sm:$0xff]  ;;  %v6172_v19 = vld [vmem:[%s7152_s13 + $0x1f0] sm:$0xf0] }
 0x324   : > { %3884 = vmatmul.bf16.gmra.mxu3 %v4876_v60  ;;  %v4909_v60 = vld [vmem:[%s7152_s13 + $0x1ec] sm:$0xf0] }
 0x325   : > { %8402 = vst [vmem:[#allocation24_spill] sm:$0xff] %v7834_v10  ;;  %4053 = vmatmul.bf16.gmra.mxu0 %v4880_v36  ;;  %v4915_v36 = vld [vmem:[%s7152_s13 + $0x1d0] sm:$0xf] }
 0x326   : > { %v3160_v32 = vpop.f32.mrf.mxu2 }
 0x327   : > { %v3161_v63 = vadd.f32 %v3160_v32, %v2992_v26  ;;  %v3329_v23 = vpop.f32.mrf.mxu3  ;;  %v4904_v26 = vor.u32 %v6166_v31, %v4901_v22  ;;  %v4908_v32 = vor.u32 %v6171_v56, %v4907_v61 }
 0x328   : > { %v2993_v27 = vpop.f32.mrf.mxu1 }
 0x329   : > { %v3330_v33 = vadd.f32 %v3329_v23, %v3161_v63  ;;  %v2994_v5 = vadd.f32 %v2993_v27, %v8405_v11  ;;  %v4912_v63 = vor.u32 %v6167_v40, %v4909_v60  ;;  %v4916_v23 = vor.u32 %v6172_v19, %v4915_v36  ;;  %v8407_v11 = vld [vmem:[#allocation29_spill] sm:$0xff]  ;;  %v6175_v60 = vld [vmem:[%s7152_s13 + $0x20c] sm:$0xf]  ;;  %v4937_v36 = vld [vmem:[%s7152_s13 + $0x22c] sm:$0xf0] }
 0x32a   : > { %v3500_v20 = vpop.f32.mrf.mxu0 }
 0x32b   : > { %v7839_v58 = vadd.f32 %v3498_v30, %v3330_v33 }
 0x32d   : > { %8404 = vst [vmem:[#allocation25_spill] sm:$0xff] %v7839_v58 }
 0x32e   : > { %v3162_v0 = vpop.f32.mrf.mxu2 }
 0x32f   : > { %v3163_v46 = vadd.f32 %v3162_v0, %v2994_v5  ;;  %v3331_v10 = vpop.f32.mrf.mxu3  ;;  %v4943_v0 = vld [vmem:[%s7152_s13 + $0x210] sm:$0xf] }
 0x330   : > { %v2996_v53 = vpop.f32.mrf.mxu1 }
 0x331   : > { %v3332_v30 = vadd.f32 %v3331_v10, %v3163_v46  ;;  %v2997_v31 = vadd.f32 %v2996_v53, %v8407_v11  ;;  %v6176_v46 = vld [vmem:[%s7152_s13 + $0x214] sm:$0xf] }
 0x332   : > { %v3503_v33 = vpop.f32.mrf.mxu0 }
 0x333   : > { %3551 = vmatmul.bf16.gmra.mxu1 %v4904_v26  ;;  %3720 = vmatmul.bf16.gmra.mxu2 %v4908_v32  ;;  %v7848_v27 = vadd.f32 %v3500_v20, %v3332_v30  ;;  %v6180_v20 = vld [vmem:[%s7152_s13 + $0x230] sm:$0xf0]  ;;  %v8409_v26 = vld [vmem:[#allocation31_spill] sm:$0xff]  ;;  %v6181_v30 = vld [vmem:[%s7152_s13 + $0x238] sm:$0xf0] }
 0x334   : > { %3889 = vmatmul.bf16.gmra.mxu3 %v4912_v63  ;;  %v4945_v63 = vld [vmem:[%s7152_s13 + $0x234] sm:$0xf0] }
 0x335   : > { %8406 = vst [vmem:[#allocation27_spill] sm:$0xff] %v7848_v27  ;;  %4058 = vmatmul.bf16.gmra.mxu0 %v4916_v23  ;;  %v4951_v23 = vld [vmem:[%s7152_s13 + $0x218] sm:$0xf] }
 0x336   : > { %v3165_v22 = vpop.f32.mrf.mxu2 }
 0x337   : > { %v3166_v61 = vadd.f32 %v3165_v22, %v2997_v31  ;;  %v3334_v56 = vpop.f32.mrf.mxu3  ;;  %v4940_v31 = vor.u32 %v6175_v60, %v4937_v36  ;;  %v4944_v22 = vor.u32 %v6180_v20, %v4943_v0 }
 0x338   : > { %v2998_v40 = vpop.f32.mrf.mxu1 }
 0x339   : > { %v3335_v10 = vadd.f32 %v3334_v56, %v3166_v61  ;;  %v2999_v32 = vadd.f32 %v2998_v40, %v8409_v26  ;;  %v4948_v61 = vor.u32 %v6176_v46, %v4945_v63  ;;  %v4952_v56 = vor.u32 %v6181_v30, %v4951_v23  ;;  %v8411_v26 = vld [vmem:[#allocation33_spill] sm:$0xff] }
 0x33a   : > { %v3505_v5 = vpop.f32.mrf.mxu0  ;;  %v6184_v63 = vld [vmem:[%s7152_s13 + $0x254] sm:$0xf]  ;;  %v4973_v23 = vld [vmem:[%s7152_s13 + $0x274] sm:$0xf0] }
 0x33b   : > { %v7853_v19 = vadd.f32 %v3503_v33, %v3335_v10 }
 0x33d   : > { %8408 = vst [vmem:[#allocation29_spill] sm:$0xff] %v7853_v19 }
 0x33e   : > { %v3167_v53 = vpop.f32.mrf.mxu2 }
 0x33f   : > { %v3168_v11 = vadd.f32 %v3167_v53, %v2999_v32  ;;  %v3336_v27 = vpop.f32.mrf.mxu3  ;;  %v4979_v53 = vld [vmem:[%s7152_s13 + $0x258] sm:$0xf] }
 0x340   : > { %v3001_v58 = vpop.f32.mrf.mxu1 }
 0x341   : > { %v3337_v33 = vadd.f32 %v3336_v27, %v3168_v11  ;;  %v3002_v60 = vadd.f32 %v3001_v58, %v8411_v26  ;;  %v6185_v11 = vld [vmem:[%s7152_s13 + $0x25c] sm:$0xf] }
 0x342   : > { %v3508_v10 = vpop.f32.mrf.mxu0 }
 0x343   : > { %3556 = vmatmul.bf16.gmra.mxu1 %v4940_v31  ;;  %3725 = vmatmul.bf16.gmra.mxu2 %v4944_v22  ;;  %v7862_v40 = vadd.f32 %v3505_v5, %v3337_v33  ;;  %v6189_v5 = vld [vmem:[%s7152_s13 + $0x278] sm:$0xf0]  ;;  %v8413_v31 = vld [vmem:[#allocation35_spill] sm:$0xff] }
 0x344   : > { %3894 = vmatmul.bf16.gmra.mxu3 %v4948_v61  ;;  %v4981_v61 = vld [vmem:[%s7152_s13 + $0x27c] sm:$0xf0]  ;;  %v6190_v33 = vld [vmem:[%s7152_s13 + $0x280] sm:$0xf0] }
 0x345   : > { %8410 = vst [vmem:[#allocation31_spill] sm:$0xff] %v7862_v40  ;;  %4063 = vmatmul.bf16.gmra.mxu0 %v4952_v56  ;;  %v4987_v56 = vld [vmem:[%s7152_s13 + $0x260] sm:$0xf] }
 0x346   : > { %v3170_v36 = vpop.f32.mrf.mxu2 }
 0x347   : > { %v3171_v0 = vadd.f32 %v3170_v36, %v3002_v60  ;;  %v3339_v20 = vpop.f32.mrf.mxu3  ;;  %v4976_v60 = vor.u32 %v6184_v63, %v4973_v23  ;;  %v4980_v36 = vor.u32 %v6189_v5, %v4979_v53 }
 0x348   : > { %v3003_v46 = vpop.f32.mrf.mxu1 }
 0x349   : > { %v3340_v27 = vadd.f32 %v3339_v20, %v3171_v0  ;;  %v3004_v22 = vadd.f32 %v3003_v46, %v8413_v31  ;;  %v4984_v0 = vor.u32 %v6185_v11, %v4981_v61  ;;  %v4988_v20 = vor.u32 %v6190_v33, %v4987_v56  ;;  %v6193_v61 = vld [vmem:[%s7152_s13 + $0x29c] sm:$0xf]  ;;  %v5009_v56 = vld [vmem:[%s7152_s13 + $0x2bc] sm:$0xf0] }
 0x34a   : > { %v3510_v32 = vpop.f32.mrf.mxu0  ;;  %v5015_v33 = vld [vmem:[%s7152_s13 + $0x2a0] sm:$0xf] }
 0x34b   : > { %v7867_v30 = vadd.f32 %v3508_v10, %v3340_v27  ;;  %v8415_v27 = vld [vmem:[#allocation36_spill] sm:$0xff] }
 0x34d   : > { %8412 = vst [vmem:[#allocation33_spill] sm:$0xff] %v7867_v30 }
 0x34e   : > { %v3172_v58 = vpop.f32.mrf.mxu2 }
 0x34f   : > { %v3173_v26 = vadd.f32 %v3172_v58, %v3004_v22  ;;  %v3341_v40 = vpop.f32.mrf.mxu3  ;;  %v7879_v22 = vld [vmem:[#allocation7] ss:$0 sm:$0xff] }
 0x350   : > { %v3522_v19 = vpop.f32.mrf.mxu1 }
 0x351   : > { %v3342_v43 = vadd.f32 %v3341_v40, %v3173_v26  ;;  %v3523_v63 = vadd.f32 %v3522_v19, %v8415_v27  ;;  %v8416_v26 = vld [vmem:[#allocation37_spill] sm:$0xff]  ;;  %v5023_v19 = vld [vmem:[%s7152_s13 + $0x2a8] sm:$0xf] }
 0x352   : > { %v4029_v10 = vpop.f32.mrf.mxu0 }
 0x353   : > { %3561 = vmatmul.bf16.gmra.mxu1 %v4976_v60  ;;  %3730 = vmatmul.bf16.gmra.mxu2 %v4980_v36  ;;  %v7876_v46 = vadd.f32 %v3510_v32, %v3342_v43  ;;  %v6198_v43 = vld [vmem:[%s7152_s13 + $0x2c0] sm:$0xf0]  ;;  %v5017_v36 = vld [vmem:[%s7152_s13 + $0x2c4] sm:$0xf0] }
 0x354   : > { %3899 = vmatmul.bf16.gmra.mxu3 %v4984_v0  ;;  %v6194_v32 = vld [vmem:[%s7152_s13 + $0x2a4] sm:$0xf]  ;;  %v6199_v0 = vld [vmem:[%s7152_s13 + $0x2c8] sm:$0xf0] }
 0x355   : > { %8414 = vst [vmem:[#allocation35_spill] sm:$0xff] %v7876_v46  ;;  %4068 = vmatmul.bf16.gmra.mxu0 %v4988_v20  ;;  %v5016_v46 = vor.u32 %v6198_v43, %v5015_v33  ;;  %v5024_v30 = vor.u32 %v6199_v0, %v5023_v19  ;;  %v5051_v19 = vld [vmem:[%s7152_s13 + $0x2e8] sm:$0xf]  ;;  %v6203_v0 = vld [vmem:[%s7152_s13 + $0x2ec] sm:$0xf] }
 0x356   : > { %v3691_v23 = vpop.f32.mrf.mxu2 }
 0x357   : > { %v3692_v53 = vadd.f32 %v3691_v23, %v3523_v63  ;;  %v3860_v5 = vpop.f32.mrf.mxu3  ;;  %v5012_v23 = vor.u32 %v6193_v61, %v5009_v56 }
 0x358   : > { %v3524_v40 = vpop.f32.mrf.mxu1 }
 0x359   : > { %v3861_v11 = vadd.f32 %v3860_v5, %v3692_v53  ;;  %v3525_v60 = vadd.f32 %v3524_v40, %v8416_v26  ;;  %v5020_v5 = vor.u32 %v6194_v32, %v5017_v36  ;;  %v5045_v36 = vld [vmem:[%s7152_s13 + $0x304] sm:$0xf0] }
 0x35a   : > { %v4031_v31 = vpop.f32.mrf.mxu0 }
 0x35b   : > { %v4030_v58 = vadd.f32 %v4029_v10, %v3861_v11 }
 0x35d   : > { %v4193_v16 = vmul.f32 %v7879_v22, %v4030_v58 }
 0x35e   : > { %v3693_v20 = vpop.f32.mrf.mxu2 }
 0x35f   : > { %v3694_v27 = vadd.f32 %v3693_v20, %v3525_v60  ;;  %v3862_v63 = vpop.f32.mrf.mxu3  ;;  %v4261_v40 = vadd.f32 %v7891_v57, %v4193_v16  ;;  %v6202_v60 = vld [vmem:[%s7152_s13 + $0x2e4] sm:$0xf] }
 0x360   : > { %v3527_v53 = vpop.f32.mrf.mxu1 }
 0x361   : > { %v3863_v52 = vadd.f32 %v3862_v63, %v3694_v27  ;;  %v3528_v56 = vadd.f32 %v3527_v53, %v7447_v59  ;;  %v6207_v59 = vld [vmem:[%s7152_s13 + $0x308] sm:$0xf0]  ;;  %v5053_v63 = vld [vmem:[%s7152_s13 + $0x30c] sm:$0xf0]  ;;  %v6208_v53 = vld [vmem:[%s7152_s13 + $0x310] sm:$0xf0] }
 0x362   : > { %v4034_v10 = vpop.f32.mrf.mxu0 }
 0x363   : > { %v4032_v11 = vadd.f32 %v4031_v31, %v3863_v52  ;;  %3566 = vmatmul.bf16.gmra.mxu1 %v5012_v23  ;;  %3735 = vmatmul.bf16.gmra.mxu2 %v5016_v46  ;;  %v5059_v23 = vld [vmem:[%s7152_s13 + $0x2f0] sm:$0xf] }
 0x364   : > { %3904 = vmatmul.bf16.gmra.mxu3 %v5020_v5 }
 0x365   : > { %4073 = vmatmul.bf16.gmra.mxu0 %v5024_v30  ;;  %v4194_v61 = vmul.f32 %v7879_v22, %v4032_v11  ;;  %v4325_v30 = vmax.f32 %v4261_v40, 0.0 }
 0x366   : > { %v3696_v33 = vpop.f32.mrf.mxu2 }
 0x367   : > { %v4262_v43 = vadd.f32 %v7891_v57, %v4194_v61  ;;  %v3697_v52 = vadd.f32 %v3696_v33, %v3528_v56  ;;  %v3865_v31 = vpop.f32.mrf.mxu3  ;;  %v5048_v61 = vor.u32 %v6202_v60, %v5045_v36  ;;  %v5052_v56 = vor.u32 %v6207_v59, %v5051_v19 }
 0x368   : > { %v3529_v46 = vpop.f32.mrf.mxu1 }
 0x369   : > { %v4326_v32 = vmax.f32 %v4262_v43, 0.0  ;;  %v3866_v16 = vadd.f32 %v3865_v31, %v3697_v52  ;;  %v3530_v27 = vadd.f32 %v3529_v46, %v7456_v17  ;;  %v5056_v43 = vor.u32 %v6203_v0, %v5053_v63  ;;  %v6211_v63 = vld [vmem:[%s7152_s13 + $0x32c] sm:$0xf] }
 0x36a   : > { %v4036_v58 = vpop.f32.mrf.mxu0  ;;  %v5060_v52 = vor.u32 %v6208_v53, %v5059_v23  ;;  %v5087_v23 = vld [vmem:[%s7152_s13 + $0x330] sm:$0xf]  ;;  %v6216_v53 = vld [vmem:[%s7152_s13 + $0x350] sm:$0xf0] }
 0x36b   : > { %v6474_v26 = vpack.c.bf16 %v4326_v32, %v4325_v30  ;;  %v4035_v20 = vadd.f32 %v4034_v10, %v3866_v16 }
 0x36d   : > { %6475 = vst [vmem:[%s7903_s23] sm:$0xff] %v6474_v26   ;;  %v4195_v31 = vmul.f32 %v7879_v22, %v4035_v20 }
 0x36e   : > { %v3698_v5 = vpop.f32.mrf.mxu2 }
 0x36f   : > { %v3699_v11 = vadd.f32 %v3698_v5, %v3530_v27  ;;  %v3867_v40 = vpop.f32.mrf.mxu3  ;;  %v4263_v17 = vadd.f32 %v7891_v57, %v4195_v31  ;;  %v5089_v5 = vld [vmem:[%s7152_s13 + $0x354] sm:$0xf0] }
 0x370   : > { %v3532_v33 = vpop.f32.mrf.mxu1 }
 0x371   : > { %v3868_v30 = vadd.f32 %v3867_v40, %v3699_v11  ;;  %v3533_v46 = vadd.f32 %v3532_v33, %v7461_v1  ;;  %v4327_v19 = vmax.f32 %v4263_v17, 0.0  ;;  %v6212_v1 = vld [vmem:[%s7152_s13 + $0x334] sm:$0xf] }
 0x372   : > { %v4039_v32 = vpop.f32.mrf.mxu0 }
 0x373   : > { %v4037_v25 = vadd.f32 %v4036_v58, %v3868_v30  ;;  %3571 = vmatmul.bf16.gmra.mxu1 %v5048_v61  ;;  %3740 = vmatmul.bf16.gmra.mxu2 %v5052_v56  ;;  %v5095_v61 = vld [vmem:[%s7152_s13 + $0x338] sm:$0xf]  ;;  %v6217_v56 = vld [vmem:[%s7152_s13 + $0x358] sm:$0xf0]  ;;  %v5088_v30 = vor.u32 %v6216_v53, %v5087_v23 }
 0x374   : > { %3909 = vmatmul.bf16.gmra.mxu3 %v5056_v43 }
 0x375   : > { %4078 = vmatmul.bf16.gmra.mxu0 %v5060_v52  ;;  %v4196_v10 = vmul.f32 %v7879_v22, %v4037_v25  ;;  %v5081_v25 = vld [vmem:[%s7152_s13 + $0x34c] sm:$0xf0] }
 0x376   : > { %v3701_v16 = vpop.f32.mrf.mxu2  ;;  %v5084_v31 = vor.u32 %v6211_v63, %v5081_v25 }
 0x377   : > { %v4264_v58 = vadd.f32 %v7891_v57, %v4196_v10  ;;  %v3702_v26 = vadd.f32 %v3701_v16, %v3533_v46  ;;  %v3870_v60 = vpop.f32.mrf.mxu3  ;;  %v5092_v10 = vor.u32 %v6212_v1, %v5089_v5  ;;  %v5096_v46 = vor.u32 %v6217_v56, %v5095_v61  ;;  %v6220_v5 = vld [vmem:[%s7152_s13 + $0x374] sm:$0xf]  ;;  %v6225_v61 = vld [vmem:[%s7152_s13 + $0x398] sm:$0xf0]  ;;  %v5125_v56 = vld [vmem:[%s7152_s13 + $0x39c] sm:$0xf0] }
 0x378   : > { %v3534_v36 = vpop.f32.mrf.mxu1 }
 0x379   : > { %v4328_v59 = vmax.f32 %v4264_v58, 0.0  ;;  %v3871_v0 = vadd.f32 %v3870_v60, %v3702_v26  ;;  %v3535_v40 = vadd.f32 %v3534_v36, %v7470_v8 }
 0x37a   : > { %v4041_v20 = vpop.f32.mrf.mxu0 }
 0x37b   : > { %v6479_v27 = vpack.c.bf16 %v4328_v59, %v4327_v19  ;;  %v4040_v11 = vadd.f32 %v4039_v32, %v3871_v0 }
 0x37d   : > { %6631 = vst [vmem:[%s7903_s23 + $0x8] sm:$0xff] %v6479_v27   ;;  %v4197_v16 = vmul.f32 %v7879_v22, %v4040_v11  ;;  %v5117_v11 = vld [vmem:[%s7152_s13 + $0x394] sm:$0xf0] }
 0x37e   : > { %v3703_v33 = vpop.f32.mrf.mxu2 }
 0x37f   : > { %v3704_v43 = vadd.f32 %v3703_v33, %v3535_v40  ;;  %v3872_v52 = vpop.f32.mrf.mxu3  ;;  %v4265_v8 = vadd.f32 %v7891_v57, %v4197_v16  ;;  %v5123_v40 = vld [vmem:[%s7152_s13 + $0x378] sm:$0xf] }
 0x380   : > { %v3537_v17 = vpop.f32.mrf.mxu1  ;;  %v5124_v16 = vor.u32 %v6225_v61, %v5123_v40  ;;  %v6229_v61 = vld [vmem:[%s7152_s13 + $0x3bc] sm:$0xf] }
 0x381   : > { %v3873_v58 = vadd.f32 %v3872_v52, %v3704_v43  ;;  %v3538_v36 = vadd.f32 %v3537_v17, %v7475_v39  ;;  %v4329_v63 = vmax.f32 %v4265_v8, 0.0  ;;  %v6221_v39 = vld [vmem:[%s7152_s13 + $0x37c] sm:$0xf]  ;;  %v5131_v52 = vld [vmem:[%s7152_s13 + $0x380] sm:$0xf] }
 0x382   : > { %v4044_v26 = vpop.f32.mrf.mxu0 }
 0x383   : > { %v4042_v60 = vadd.f32 %v4041_v20, %v3873_v58  ;;  %3576 = vmatmul.bf16.gmra.mxu1 %v5084_v31  ;;  %3745 = vmatmul.bf16.gmra.mxu2 %v5088_v30  ;;  %v6226_v31 = vld [vmem:[%s7152_s13 + $0x3a0] sm:$0xf0] }
 0x384   : > { %3914 = vmatmul.bf16.gmra.mxu3 %v5092_v10  ;;  %v5132_v8 = vor.u32 %v6226_v31, %v5131_v52 }
 0x385   : > { %4083 = vmatmul.bf16.gmra.mxu0 %v5096_v46  ;;  %v4198_v32 = vmul.f32 %v7879_v22, %v4042_v60  ;;  %v5120_v46 = vor.u32 %v6220_v5, %v5117_v11  ;;  %v5128_v60 = vor.u32 %v6221_v39, %v5125_v56  ;;  %v5153_v39 = vld [vmem:[%s7152_s13 + $0x3dc] sm:$0xf0] }
 0x386   : > { %v3706_v19 = vpop.f32.mrf.mxu2  ;;  %v5159_v56 = vld [vmem:[%s7152_s13 + $0x3c0] sm:$0xf] }
 0x387   : > { %v4266_v59 = vadd.f32 %v7891_v57, %v4198_v32  ;;  %v3707_v0 = vadd.f32 %v3706_v19, %v3538_v36  ;;  %v3875_v20 = vpop.f32.mrf.mxu3 }
 0x388   : > { %v3539_v27 = vpop.f32.mrf.mxu1 }
 0x389   : > { %v4330_v25 = vmax.f32 %v4266_v59, 0.0  ;;  %v3876_v23 = vadd.f32 %v3875_v20, %v3707_v0  ;;  %v3540_v43 = vadd.f32 %v3539_v27, %v7484_v35 }
 0x38a   : > { %v4046_v53 = vpop.f32.mrf.mxu0 }
 0x38b   : > { %v6484_v1 = vpack.c.bf16 %v4330_v25, %v4329_v63  ;;  %v4045_v33 = vadd.f32 %v4044_v26, %v3876_v23 }
 0x38d   : > { %6632 = vst [vmem:[%s7903_s23 + $0x10] sm:$0xff] %v6484_v1   ;;  %v4199_v32 = vmul.f32 %v7879_v22, %v4045_v33  ;;  %v6234_v33 = vld [vmem:[%s7152_s13 + $0x3e0] sm:$0xf0] }
 0x38e   : > { %v3708_v30 = vpop.f32.mrf.mxu2 }
 0x38f   : > { %v3709_v17 = vadd.f32 %v3708_v30, %v3540_v43  ;;  %v3877_v10 = vpop.f32.mrf.mxu3  ;;  %v4267_v35 = vadd.f32 %v7891_v57, %v4199_v32  ;;  %v5161_v43 = vld [vmem:[%s7152_s13 + $0x3e4] sm:$0xf0] }
 0x390   : > { %v3542_v58 = vpop.f32.mrf.mxu1  ;;  %v5167_v30 = vld [vmem:[%s7152_s13 + $0x3c8] sm:$0xf] }
 0x391   : > { %v3878_v36 = vadd.f32 %v3877_v10, %v3709_v17  ;;  %v3543_v0 = vadd.f32 %v3542_v58, %v7489_v41  ;;  %v6230_v41 = vld [vmem:[%s7152_s13 + $0x3c4] sm:$0xf]  ;;  %v6235_v17 = vld [vmem:[%s7152_s13 + $0x3e8] sm:$0xf0]  ;;  %v5156_v58 = vor.u32 %v6229_v61, %v5153_v39 }
 0x392   : > { %v4049_v19 = vpop.f32.mrf.mxu0  ;;  %v5164_v32 = vor.u32 %v6230_v41, %v5161_v43  ;;  %v6238_v39 = vld [vmem:[%s7152_s13 + $0x404] sm:$0xf]  ;;  %v6243_v41 = vld [vmem:[%s7152_s13 + $0x428] sm:$0xf0]  ;;  %v5197_v43 = vld [vmem:[%s7152_s13 + $0x42c] sm:$0xf0] }
 0x393   : > { %v4047_v59 = vadd.f32 %v4046_v53, %v3878_v36  ;;  %3581 = vmatmul.bf16.gmra.mxu1 %v5120_v46  ;;  %3750 = vmatmul.bf16.gmra.mxu2 %v5124_v16  ;;  %v4331_v53 = vmax.f32 %v4267_v35, 0.0  ;;  %v5168_v36 = vor.u32 %v6235_v17, %v5167_v30  ;;  %v5203_v30 = vld [vmem:[%s7152_s13 + $0x410] sm:$0xf]  ;;  %v6244_v17 = vld [vmem:[%s7152_s13 + $0x430] sm:$0xf0] }
 0x394   : > { %3919 = vmatmul.bf16.gmra.mxu3 %v5128_v60  ;;  %v5160_v60 = vor.u32 %v6234_v33, %v5159_v56  ;;  %v5189_v56 = vld [vmem:[%s7152_s13 + $0x424] sm:$0xf0] }
 0x395   : > { %4088 = vmatmul.bf16.gmra.mxu0 %v5132_v8  ;;  %v4200_v26 = vmul.f32 %v7879_v22, %v4047_v59  ;;  %v5195_v33 = vld [vmem:[%s7152_s13 + $0x408] sm:$0xf] }
 0x396   : > { %v3711_v20 = vpop.f32.mrf.mxu2 }
 0x397   : > { %v4268_v27 = vadd.f32 %v7891_v57, %v4200_v26  ;;  %v3712_v63 = vadd.f32 %v3711_v20, %v3543_v0  ;;  %v3880_v25 = vpop.f32.mrf.mxu3 }
 0x398   : > { %v3544_v23 = vpop.f32.mrf.mxu1 }
 0x399   : > { %v4332_v1 = vmax.f32 %v4268_v27, 0.0  ;;  %v3881_v5 = vadd.f32 %v3880_v25, %v3712_v63  ;;  %v3545_v31 = vadd.f32 %v3544_v23, %v7498_v3 }
 0x39a   : > { %v4051_v11 = vpop.f32.mrf.mxu0 }
 0x39b   : > { %v6489_v40 = vpack.c.bf16 %v4332_v1, %v4331_v53  ;;  %v4050_v52 = vadd.f32 %v4049_v19, %v3881_v5 }
 0x39d   : > { %6633 = vst [vmem:[%s7903_s23 + $0x18] sm:$0xff] %v6489_v40   ;;  %v4201_v59 = vmul.f32 %v7879_v22, %v4050_v52 }
 0x39e   : > { %v3713_v10 = vpop.f32.mrf.mxu2 }
 0x39f   : > { %v3714_v46 = vadd.f32 %v3713_v10, %v3545_v31  ;;  %v3882_v16 = vpop.f32.mrf.mxu3  ;;  %v4269_v3 = vadd.f32 %v7891_v57, %v4201_v59 }
 0x3a0   : > { %v3547_v8 = vpop.f32.mrf.mxu1 }
 0x3a1   : > { %v3883_v35 = vadd.f32 %v3882_v16, %v3714_v46  ;;  %v3548_v20 = vadd.f32 %v3547_v8, %v7503_v50  ;;  %v4333_v1 = vmax.f32 %v4269_v3, 0.0  ;;  %v6239_v50 = vld [vmem:[%s7152_s13 + $0x40c] sm:$0xf] }
 0x3a2   : > { %v4054_v26 = vpop.f32.mrf.mxu0 }
 0x3a3   : > { %v4052_v0 = vadd.f32 %v4051_v11, %v3883_v35  ;;  %3586 = vmatmul.bf16.gmra.mxu1 %v5156_v58  ;;  %3755 = vmatmul.bf16.gmra.mxu2 %v5160_v60  ;;  %v5192_v58 = vor.u32 %v6238_v39, %v5189_v56  ;;  %v5196_v60 = vor.u32 %v6243_v41, %v5195_v33  ;;  %v5225_v39 = vld [vmem:[%s7152_s13 + $0x46c] sm:$0xf0]  ;;  %v6252_v33 = vld [vmem:[%s7152_s13 + $0x470] sm:$0xf0]  ;;  %v5233_v41 = vld [vmem:[%s7152_s13 + $0x474] sm:$0xf0] }
 0x3a4   : > { %3924 = vmatmul.bf16.gmra.mxu3 %v5164_v32  ;;  %v5200_v32 = vor.u32 %v6239_v50, %v5197_v43  ;;  %v5231_v56 = vld [vmem:[%s7152_s13 + $0x450] sm:$0xf] }
 0x3a5   : > { %4093 = vmatmul.bf16.gmra.mxu0 %v5168_v36  ;;  %v4202_v19 = vmul.f32 %v7879_v22, %v4052_v0  ;;  %v5204_v36 = vor.u32 %v6244_v17, %v5203_v30 }
 0x3a6   : > { %v3716_v27 = vpop.f32.mrf.mxu2 }
 0x3a7   : > { %v4270_v63 = vadd.f32 %v7891_v57, %v4202_v19  ;;  %v3717_v25 = vadd.f32 %v3716_v27, %v3548_v20  ;;  %v3885_v23 = vpop.f32.mrf.mxu3 }
 0x3a8   : > { %v3549_v53 = vpop.f32.mrf.mxu1 }
 0x3a9   : > { %v4334_v5 = vmax.f32 %v4270_v63, 0.0  ;;  %v3886_v11 = vadd.f32 %v3885_v23, %v3717_v25  ;;  %v3550_v31 = vadd.f32 %v3549_v53, %v7512_v15 }
 0x3aa   : > { %v4056_v40 = vpop.f32.mrf.mxu0 }
 0x3ab   : > { %v6494_v61 = vpack.c.bf16 %v4334_v5, %v4333_v1  ;;  %v4055_v52 = vadd.f32 %v4054_v26, %v3886_v11 }
 0x3ad   : > { %6634 = vst [vmem:[%s7903_s23 + $0x20] sm:$0xff] %v6494_v61   ;;  %v4203_v59 = vmul.f32 %v7879_v22, %v4055_v52  ;;  %v6247_v61 = vld [vmem:[%s7152_s13 + $0x44c] sm:$0xf]  ;;  %v5239_v52 = vld [vmem:[%s7152_s13 + $0x458] sm:$0xf] }
 0x3ae   : > { %v3718_v10 = vpop.f32.mrf.mxu2 }
 0x3af   : > { %v3719_v46 = vadd.f32 %v3718_v10, %v3550_v31  ;;  %v3887_v16 = vpop.f32.mrf.mxu3  ;;  %v4271_v15 = vadd.f32 %v7891_v57, %v4203_v59  ;;  %v6253_v31 = vld [vmem:[%s7152_s13 + $0x478] sm:$0xf0] }
 0x3b0   : > { %v3552_v8 = vpop.f32.mrf.mxu1 }
 0x3b1   : > { %v3888_v35 = vadd.f32 %v3887_v16, %v3719_v46  ;;  %v3553_v19 = vadd.f32 %v3552_v8, %v7517_v21  ;;  %v4335_v53 = vmax.f32 %v4271_v15, 0.0  ;;  %v6248_v21 = vld [vmem:[%s7152_s13 + $0x454] sm:$0xf]  ;;  %v5228_v46 = vor.u32 %v6247_v61, %v5225_v39  ;;  %v6261_v61 = vld [vmem:[%s7152_s13 + $0x4b8] sm:$0xf0] }
 0x3b2   : > { %v4059_v0 = vpop.f32.mrf.mxu0  ;;  %v5232_v16 = vor.u32 %v6252_v33, %v5231_v56  ;;  %v5240_v8 = vor.u32 %v6253_v31, %v5239_v52  ;;  %v5269_v39 = vld [vmem:[%s7152_s13 + $0x4bc] sm:$0xf0] }
 0x3b3   : > { %v4057_v3 = vadd.f32 %v4056_v40, %v3888_v35  ;;  %3591 = vmatmul.bf16.gmra.mxu1 %v5192_v58  ;;  %3760 = vmatmul.bf16.gmra.mxu2 %v5196_v60  ;;  %v5236_v60 = vor.u32 %v6248_v21, %v5233_v41  ;;  %v5275_v21 = vld [vmem:[%s7152_s13 + $0x4a0] sm:$0xf]  ;;  %v6262_v41 = vld [vmem:[%s7152_s13 + $0x4c0] sm:$0xf0] }
 0x3b4   : > { %3929 = vmatmul.bf16.gmra.mxu3 %v5200_v32 }
 0x3b5   : > { %4098 = vmatmul.bf16.gmra.mxu0 %v5204_v36  ;;  %v4204_v26 = vmul.f32 %v7879_v22, %v4057_v3 }
 0x3b6   : > { %v3721_v20 = vpop.f32.mrf.mxu2 }
 0x3b7   : > { %v4272_v27 = vadd.f32 %v7891_v57, %v4204_v26  ;;  %v3722_v63 = vadd.f32 %v3721_v20, %v3553_v19  ;;  %v3890_v25 = vpop.f32.mrf.mxu3 }
 0x3b8   : > { %v3554_v23 = vpop.f32.mrf.mxu1 }
 0x3b9   : > { %v4336_v1 = vmax.f32 %v4272_v27, 0.0  ;;  %v3891_v5 = vadd.f32 %v3890_v25, %v3722_v63  ;;  %v3555_v43 = vadd.f32 %v3554_v23, %v7526_v55 }
 0x3ba   : > { %v4061_v11 = vpop.f32.mrf.mxu0 }
 0x3bb   : > { %v6499_v40 = vpack.c.bf16 %v4336_v1, %v4335_v53  ;;  %v4060_v50 = vadd.f32 %v4059_v0, %v3891_v5  ;;  %v6256_v5 = vld [vmem:[%s7152_s13 + $0x494] sm:$0xf] }
 0x3bd   : > { %6635 = vst [vmem:[%s7903_s23 + $0x28] sm:$0xff] %v6499_v40   ;;  %v4205_v32 = vmul.f32 %v7879_v22, %v4060_v50  ;;  %v5267_v40 = vld [vmem:[%s7152_s13 + $0x498] sm:$0xf] }
 0x3be   : > { %v3723_v30 = vpop.f32.mrf.mxu2 }
 0x3bf   : > { %v3724_v17 = vadd.f32 %v3723_v30, %v3555_v43  ;;  %v3892_v10 = vpop.f32.mrf.mxu3  ;;  %v4273_v55 = vadd.f32 %v7891_v57, %v4205_v32  ;;  %v5268_v30 = vor.u32 %v6261_v61, %v5267_v40  ;;  %v5311_v40 = vld [vmem:[%s7152_s13 + $0x4e8] sm:$0xf]  ;;  %v6271_v61 = vld [vmem:[%s7152_s13 + $0x508] sm:$0xf0] }
 0x3c0   : > { %v3557_v58 = vpop.f32.mrf.mxu1 }
 0x3c1   : > { %v3893_v36 = vadd.f32 %v3892_v10, %v3724_v17  ;;  %v3558_v3 = vadd.f32 %v3557_v58, %v7531_v13  ;;  %v4337_v63 = vmax.f32 %v4273_v55, 0.0  ;;  %v6257_v13 = vld [vmem:[%s7152_s13 + $0x49c] sm:$0xf] }
 0x3c2   : > { %v4064_v59 = vpop.f32.mrf.mxu0  ;;  %v5272_v10 = vor.u32 %v6257_v13, %v5269_v39 }
 0x3c3   : > { %v4062_v35 = vadd.f32 %v4061_v11, %v3893_v36  ;;  %3596 = vmatmul.bf16.gmra.mxu1 %v5228_v46  ;;  %3765 = vmatmul.bf16.gmra.mxu2 %v5232_v16  ;;  %v5261_v11 = vld [vmem:[%s7152_s13 + $0x4b4] sm:$0xf0]  ;;  %v5276_v46 = vor.u32 %v6262_v41, %v5275_v21 }
 0x3c4   : > { %3934 = vmatmul.bf16.gmra.mxu3 %v5236_v60  ;;  %v5264_v31 = vor.u32 %v6256_v5, %v5261_v11 }
 0x3c5   : > { %4103 = vmatmul.bf16.gmra.mxu0 %v5240_v8  ;;  %v4206_v0 = vmul.f32 %v7879_v22, %v4062_v35 }
 0x3c6   : > { %v3726_v15 = vpop.f32.mrf.mxu2 }
 0x3c7   : > { %v4274_v26 = vadd.f32 %v7891_v57, %v4206_v0  ;;  %v3727_v19 = vadd.f32 %v3726_v15, %v3558_v3  ;;  %v3895_v20 = vpop.f32.mrf.mxu3 }
 0x3c8   : > { %v3559_v27 = vpop.f32.mrf.mxu1 }
 0x3c9   : > { %v4338_v25 = vmax.f32 %v4274_v26, 0.0  ;;  %v3896_v23 = vadd.f32 %v3895_v20, %v3727_v19  ;;  %v3560_v33 = vadd.f32 %v3559_v27, %v7540_v12 }
 0x3ca   : > { %v4066_v53 = vpop.f32.mrf.mxu0 }
 0x3cb   : > { %v6504_v1 = vpack.c.bf16 %v4338_v25, %v4337_v63  ;;  %v4065_v56 = vadd.f32 %v4064_v59, %v3896_v23  ;;  %v6265_v63 = vld [vmem:[%s7152_s13 + $0x4dc] sm:$0xf]  ;;  %v5297_v25 = vld [vmem:[%s7152_s13 + $0x4fc] sm:$0xf0] }
 0x3cc   : > { %v5303_v23 = vld [vmem:[%s7152_s13 + $0x4e0] sm:$0xf] }
 0x3cd   : > { %6636 = vst [vmem:[%s7903_s23 + $0x30] sm:$0xff] %v6504_v1   ;;  %v4207_v16 = vmul.f32 %v7879_v22, %v4065_v56  ;;  %v5305_v1 = vld [vmem:[%s7152_s13 + $0x504] sm:$0xf0] }
 0x3ce   : > { %v3728_v50 = vpop.f32.mrf.mxu2 }
 0x3cf   : > { %v3729_v43 = vadd.f32 %v3728_v50, %v3560_v33  ;;  %v3897_v52 = vpop.f32.mrf.mxu3  ;;  %v4275_v12 = vadd.f32 %v7891_v57, %v4207_v16  ;;  %v5300_v33 = vor.u32 %v6265_v63, %v5297_v25  ;;  %v5347_v63 = vld [vmem:[%s7152_s13 + $0x530] sm:$0xf]  ;;  %v6280_v25 = vld [vmem:[%s7152_s13 + $0x550] sm:$0xf0] }
 0x3d0   : > { %v3562_v17 = vpop.f32.mrf.mxu1 }
 0x3d1   : > { %v3898_v58 = vadd.f32 %v3897_v52, %v3729_v43  ;;  %v3563_v36 = vadd.f32 %v3562_v17, %v7545_v51  ;;  %v4339_v15 = vmax.f32 %v4275_v12, 0.0  ;;  %v6266_v51 = vld [vmem:[%s7152_s13 + $0x4e4] sm:$0xf]  ;;  %v5312_v43 = vor.u32 %v6271_v61, %v5311_v40 }
 0x3d2   : > { %v4069_v60 = vpop.f32.mrf.mxu0  ;;  %v5308_v50 = vor.u32 %v6266_v51, %v5305_v1  ;;  %v5348_v61 = vor.u32 %v6280_v25, %v5347_v63 }
 0x3d3   : > { %v4067_v8 = vadd.f32 %v4066_v53, %v3898_v58  ;;  %3601 = vmatmul.bf16.gmra.mxu1 %v5264_v31  ;;  %3770 = vmatmul.bf16.gmra.mxu2 %v5268_v30  ;;  %v6270_v53 = vld [vmem:[%s7152_s13 + $0x500] sm:$0xf0] }
 0x3d4   : > { %3939 = vmatmul.bf16.gmra.mxu3 %v5272_v10  ;;  %v5304_v21 = vor.u32 %v6270_v53, %v5303_v23 }
 0x3d5   : > { %4108 = vmatmul.bf16.gmra.mxu0 %v5276_v46  ;;  %v4208_v32 = vmul.f32 %v7879_v22, %v4067_v8 }
 0x3d6   : > { %v3731_v59 = vpop.f32.mrf.mxu2 }
 0x3d7   : > { %v4276_v35 = vadd.f32 %v7891_v57, %v4208_v32  ;;  %v3732_v55 = vadd.f32 %v3731_v59, %v3563_v36  ;;  %v3900_v0 = vpop.f32.mrf.mxu3 }
 0x3d8   : > { %v3564_v3 = vpop.f32.mrf.mxu1 }
 0x3d9   : > { %v4340_v26 = vmax.f32 %v4276_v35, 0.0  ;;  %v3901_v19 = vadd.f32 %v3900_v0, %v3732_v55  ;;  %v3565_v11 = vadd.f32 %v3564_v3, %v7554_v28  ;;  %v6274_v0 = vld [vmem:[%s7152_s13 + $0x524] sm:$0xf]  ;;  %v5333_v3 = vld [vmem:[%s7152_s13 + $0x544] sm:$0xf0] }
 0x3da   : > { %v4071_v20 = vpop.f32.mrf.mxu0  ;;  %v5336_v1 = vor.u32 %v6274_v0, %v5333_v3 }
 0x3db   : > { %v6509_v27 = vpack.c.bf16 %v4340_v26, %v4339_v15  ;;  %v4070_v5 = vadd.f32 %v4069_v60, %v3901_v19  ;;  %v5339_v15 = vld [vmem:[%s7152_s13 + $0x528] sm:$0xf]  ;;  %v6279_v26 = vld [vmem:[%s7152_s13 + $0x548] sm:$0xf0]  ;;  %v5341_v19 = vld [vmem:[%s7152_s13 + $0x54c] sm:$0xf0] }
 0x3dd   : > { %6637 = vst [vmem:[%s7903_s23 + $0x38] sm:$0xff] %v6509_v27   ;;  %v4209_v52 = vmul.f32 %v7879_v22, %v4070_v5  ;;  %v5340_v5 = vor.u32 %v6279_v26, %v5339_v15 }
 0x3de   : > { %v3733_v13 = vpop.f32.mrf.mxu2 }
 0x3df   : > { %v3734_v39 = vadd.f32 %v3733_v13, %v3565_v11  ;;  %v3902_v56 = vpop.f32.mrf.mxu3  ;;  %v4277_v28 = vadd.f32 %v7891_v57, %v4209_v52 }
 0x3e0   : > { %v3567_v41 = vpop.f32.mrf.mxu1 }
 0x3e1   : > { %v3903_v31 = vadd.f32 %v3902_v56, %v3734_v39  ;;  %v3568_v46 = vadd.f32 %v3567_v41, %v7559_v49  ;;  %v4341_v32 = vmax.f32 %v4277_v28, 0.0  ;;  %v6275_v49 = vld [vmem:[%s7152_s13 + $0x52c] sm:$0xf] }
 0x3e2   : > { %v4074_v30 = vpop.f32.mrf.mxu0  ;;  %v5344_v40 = vor.u32 %v6275_v49, %v5341_v19 }
 0x3e3   : > { %v4072_v17 = vadd.f32 %v4071_v20, %v3903_v31  ;;  %3606 = vmatmul.bf16.gmra.mxu1 %v5300_v33  ;;  %3775 = vmatmul.bf16.gmra.mxu2 %v5304_v21 }
 0x3e4   : > { %3944 = vmatmul.bf16.gmra.mxu3 %v5308_v50 }
 0x3e5   : > { %4113 = vmatmul.bf16.gmra.mxu0 %v5312_v43  ;;  %v4210_v10 = vmul.f32 %v7879_v22, %v4072_v17 }
 0x3e6   : > { %v3736_v16 = vpop.f32.mrf.mxu2 }
 0x3e7   : > { %v4278_v58 = vadd.f32 %v7891_v57, %v4210_v10  ;;  %v3737_v60 = vadd.f32 %v3736_v16, %v3568_v46  ;;  %v3905_v8 = vpop.f32.mrf.mxu3 }
 0x3e8   : > { %v3569_v12 = vpop.f32.mrf.mxu1 }
 0x3e9   : > { %v4342_v36 = vmax.f32 %v4278_v58, 0.0  ;;  %v3906_v59 = vadd.f32 %v3905_v8, %v3737_v60  ;;  %v3570_v27 = vadd.f32 %v3569_v12, %v7568_v37  ;;  %v6283_v58 = vld [vmem:[%s7152_s13 + $0x56c] sm:$0xf]  ;;  %v5369_v60 = vld [vmem:[%s7152_s13 + $0x58c] sm:$0xf0] }
 0x3ea   : > { %v4076_v35 = vpop.f32.mrf.mxu0  ;;  %v5375_v8 = vld [vmem:[%s7152_s13 + $0x570] sm:$0xf]  ;;  %v6288_v12 = vld [vmem:[%s7152_s13 + $0x590] sm:$0xf0]  ;;  %v5372_v26 = vor.u32 %v6283_v58, %v5369_v60 }
 0x3eb   : > { %v6514_v55 = vpack.c.bf16 %v4342_v36, %v4341_v32  ;;  %v4075_v20 = vadd.f32 %v4074_v30, %v3906_v59  ;;  %v5377_v32 = vld [vmem:[%s7152_s13 + $0x594] sm:$0xf0]  ;;  %v5376_v49 = vor.u32 %v6288_v12, %v5375_v8 }
 0x3ed   : > { %6638 = vst [vmem:[%s7903_s23 + $0x40] sm:$0xff] %v6514_v55   ;;  %v4211_v13 = vmul.f32 %v7879_v22, %v4075_v20  ;;  %v6289_v55 = vld [vmem:[%s7152_s13 + $0x598] sm:$0xf0] }
 0x3ee   : > { %v3738_v23 = vpop.f32.mrf.mxu2 }
 0x3ef   : > { %v3739_v53 = vadd.f32 %v3738_v23, %v3570_v27  ;;  %v3907_v51 = vpop.f32.mrf.mxu3  ;;  %v4279_v37 = vadd.f32 %v7891_v57, %v4211_v13 }
 0x3f0   : > { %v3572_v11 = vpop.f32.mrf.mxu1 }
 0x3f1   : > { %v3908_v39 = vadd.f32 %v3907_v51, %v3739_v53  ;;  %v3573_v41 = vadd.f32 %v3572_v11, %v7573_v62  ;;  %v4343_v17 = vmax.f32 %v4279_v37, 0.0  ;;  %v6284_v62 = vld [vmem:[%s7152_s13 + $0x574] sm:$0xf] }
 0x3f2   : > { %v4079_v56 = vpop.f32.mrf.mxu0  ;;  %v5380_v20 = vor.u32 %v6284_v62, %v5377_v32 }
 0x3f3   : > { %v4077_v33 = vadd.f32 %v4076_v35, %v3908_v39  ;;  %3611 = vmatmul.bf16.gmra.mxu1 %v5336_v1  ;;  %3780 = vmatmul.bf16.gmra.mxu2 %v5340_v5  ;;  %v5383_v35 = vld [vmem:[%s7152_s13 + $0x578] sm:$0xf] }
 0x3f4   : > { %3949 = vmatmul.bf16.gmra.mxu3 %v5344_v40  ;;  %v5384_v27 = vor.u32 %v6289_v55, %v5383_v35 }
 0x3f5   : > { %4118 = vmatmul.bf16.gmra.mxu0 %v5348_v61  ;;  %v4212_v21 = vmul.f32 %v7879_v22, %v4077_v33 }
 0x3f6   : > { %v3741_v50 = vpop.f32.mrf.mxu2 }
 0x3f7   : > { %v4280_v43 = vadd.f32 %v7891_v57, %v4212_v21  ;;  %v3742_v52 = vadd.f32 %v3741_v50, %v3573_v41  ;;  %v3910_v31 = vpop.f32.mrf.mxu3  ;;  %v6292_v41 = vld [vmem:[%s7152_s13 + $0x5b4] sm:$0xf]  ;;  %v5405_v50 = vld [vmem:[%s7152_s13 + $0x5d4] sm:$0xf0] }
 0x3f8   : > { %v3574_v30 = vpop.f32.mrf.mxu1  ;;  %v5408_v60 = vor.u32 %v6292_v41, %v5405_v50 }
 0x3f9   : > { %v4344_v28 = vmax.f32 %v4280_v43, 0.0  ;;  %v3911_v10 = vadd.f32 %v3910_v31, %v3742_v52  ;;  %v3575_v59 = vadd.f32 %v3574_v30, %v7582_v7  ;;  %v5411_v43 = vld [vmem:[%s7152_s13 + $0x5b8] sm:$0xf]  ;;  %v6297_v52 = vld [vmem:[%s7152_s13 + $0x5d8] sm:$0xf0] }
 0x3fa   : > { %v4081_v46 = vpop.f32.mrf.mxu0  ;;  %v5413_v31 = vld [vmem:[%s7152_s13 + $0x5dc] sm:$0xf0]  ;;  %v5412_v8 = vor.u32 %v6297_v52, %v5411_v43 }
 0x3fb   : > { %v6519_v16 = vpack.c.bf16 %v4344_v28, %v4343_v17  ;;  %v4080_v36 = vadd.f32 %v4079_v56, %v3911_v10  ;;  %v5419_v28 = vld [vmem:[%s7152_s13 + $0x5c0] sm:$0xf]  ;;  %v6298_v10 = vld [vmem:[%s7152_s13 + $0x5e0] sm:$0xf0] }
 0x3fc   : > { %v5420_v32 = vor.u32 %v6298_v10, %v5419_v28 }
 0x3fd   : > { %6639 = vst [vmem:[%s7903_s23 + $0x48] sm:$0xff] %v6519_v16   ;;  %v4213_v63 = vmul.f32 %v7879_v22, %v4080_v36 }
 0x3fe   : > { %v3743_v0 = vpop.f32.mrf.mxu2 }
 0x3ff   : > { %v3744_v3 = vadd.f32 %v3743_v0, %v3575_v59  ;;  %v3912_v15 = vpop.f32.mrf.mxu3  ;;  %v4281_v7 = vadd.f32 %v7891_v57, %v4213_v63 }
 0x400   : > { %v3577_v19 = vpop.f32.mrf.mxu1 }
 0x401   : > { %v3913_v25 = vadd.f32 %v3912_v15, %v3744_v3  ;;  %v3578_v1 = vadd.f32 %v3577_v19, %v7587_v29  ;;  %v4345_v39 = vmax.f32 %v4281_v7, 0.0  ;;  %v6293_v29 = vld [vmem:[%s7152_s13 + $0x5bc] sm:$0xf] }
 0x402   : > { %v4084_v23 = vpop.f32.mrf.mxu0  ;;  %v5416_v62 = vor.u32 %v6293_v29, %v5413_v31  ;;  %v6301_v7 = vld [vmem:[%s7152_s13 + $0x5fc] sm:$0xf] }
 0x403   : > { %v4082_v53 = vadd.f32 %v4081_v46, %v3913_v25  ;;  %3616 = vmatmul.bf16.gmra.mxu1 %v5372_v26  ;;  %3785 = vmatmul.bf16.gmra.mxu2 %v5376_v49 }
 0x404   : > { %3954 = vmatmul.bf16.gmra.mxu3 %v5380_v20 }
 0x405   : > { %4123 = vmatmul.bf16.gmra.mxu0 %v5384_v27  ;;  %v4214_v51 = vmul.f32 %v7879_v22, %v4082_v53 }
 0x406   : > { %v3746_v5 = vpop.f32.mrf.mxu2 }
 0x407   : > { %v4282_v11 = vadd.f32 %v7891_v57, %v4214_v51  ;;  %v3747_v40 = vadd.f32 %v3746_v5, %v3578_v1  ;;  %v3915_v61 = vpop.f32.mrf.mxu3  ;;  %v5441_v51 = vld [vmem:[%s7152_s13 + $0x61c] sm:$0xf0]  ;;  %v6306_v5 = vld [vmem:[%s7152_s13 + $0x620] sm:$0xf0] }
 0x408   : > { %v3579_v13 = vpop.f32.mrf.mxu1  ;;  %v5447_v1 = vld [vmem:[%s7152_s13 + $0x600] sm:$0xf] }
 0x409   : > { %v4346_v56 = vmax.f32 %v4282_v11, 0.0  ;;  %v3916_v33 = vadd.f32 %v3915_v61, %v3747_v40  ;;  %v3580_v17 = vadd.f32 %v3579_v13, %v7596_v34  ;;  %v5449_v11 = vld [vmem:[%s7152_s13 + $0x624] sm:$0xf0]  ;;  %v5448_v41 = vor.u32 %v6306_v5, %v5447_v1 }
 0x40a   : > { %v4086_v37 = vpop.f32.mrf.mxu0  ;;  %v5455_v13 = vld [vmem:[%s7152_s13 + $0x608] sm:$0xf] }
 0x40b   : > { %v6524_v21 = vpack.c.bf16 %v4346_v56, %v4345_v39  ;;  %v4085_v30 = vadd.f32 %v4084_v23, %v3916_v33  ;;  %v6307_v39 = vld [vmem:[%s7152_s13 + $0x628] sm:$0xf0] }
 0x40c   : > { %v5456_v52 = vor.u32 %v6307_v39, %v5455_v13 }
 0x40d   : > { %6640 = vst [vmem:[%s7903_s23 + $0x50] sm:$0xff] %v6524_v21   ;;  %v4215_v36 = vmul.f32 %v7879_v22, %v4085_v30  ;;  %v5444_v21 = vor.u32 %v6301_v7, %v5441_v51  ;;  %v8090_v7 = vld [vmem:[#allocation7] ss:$0 sm:$0xff] }
 0x40e   : > { %v3748_v46 = vpop.f32.mrf.mxu2 }
 0x40f   : > { %v3749_v16 = vadd.f32 %v3748_v46, %v3580_v17  ;;  %v3917_v58 = vpop.f32.mrf.mxu3  ;;  %v4283_v34 = vadd.f32 %v7891_v57, %v4215_v36 }
 0x410   : > { %v3582_v12 = vpop.f32.mrf.mxu1 }
 0x411   : > { %v3918_v59 = vadd.f32 %v3917_v58, %v3749_v16  ;;  %v3583_v3 = vadd.f32 %v3582_v12, %v7601_v6  ;;  %v4347_v27 = vmax.f32 %v4283_v34, 0.0  ;;  %v6302_v6 = vld [vmem:[%s7152_s13 + $0x604] sm:$0xf]  ;;  %v6315_v34 = vld [vmem:[%s7152_s13 + $0x668] sm:$0xf0] }
 0x412   : > { %v4089_v35 = vpop.f32.mrf.mxu0  ;;  %v5452_v43 = vor.u32 %v6302_v6, %v5449_v11 }
 0x413   : > { %v4087_v55 = vadd.f32 %v4086_v37, %v3918_v59  ;;  %3621 = vmatmul.bf16.gmra.mxu1 %v5408_v60  ;;  %3790 = vmatmul.bf16.gmra.mxu2 %v5412_v8 }
 0x414   : > { %3959 = vmatmul.bf16.gmra.mxu3 %v5416_v62 }
 0x415   : > { %4128 = vmatmul.bf16.gmra.mxu0 %v5420_v32  ;;  %v4216_v0 = vmul.f32 %v7879_v22, %v4087_v55  ;;  %v5483_v55 = vld [vmem:[%s7152_s13 + $0x648] sm:$0xf] }
 0x416   : > { %v3751_v15 = vpop.f32.mrf.mxu2 }
 0x417   : > { %v4284_v26 = vadd.f32 %v7891_v57, %v4216_v0  ;;  %v3752_v49 = vadd.f32 %v3751_v15, %v3583_v3  ;;  %v3920_v19 = vpop.f32.mrf.mxu3  ;;  %v5485_v0 = vld [vmem:[%s7152_s13 + $0x66c] sm:$0xf0] }
 0x418   : > { %v3584_v20 = vpop.f32.mrf.mxu1  ;;  %v5491_v15 = vld [vmem:[%s7152_s13 + $0x650] sm:$0xf] }
 0x419   : > { %v4348_v63 = vmax.f32 %v4284_v26, 0.0  ;;  %v3921_v25 = vadd.f32 %v3920_v19, %v3752_v49  ;;  %v3585_v61 = vadd.f32 %v3584_v20, %v7610_v2  ;;  %v6316_v26 = vld [vmem:[%s7152_s13 + $0x670] sm:$0xf0] }
 0x41a   : > { %v4091_v23 = vpop.f32.mrf.mxu0 }
 0x41b   : > { %v6529_v53 = vpack.c.bf16 %v4348_v63, %v4347_v27  ;;  %v4090_v40 = vadd.f32 %v4089_v35, %v3921_v25  ;;  %v6310_v35 = vld [vmem:[%s7152_s13 + $0x644] sm:$0xf]  ;;  %v5484_v63 = vor.u32 %v6315_v34, %v5483_v55 }
 0x41d   : > { %6641 = vst [vmem:[%s7903_s23 + $0x58] sm:$0xff] %v6529_v53   ;;  %v4217_v29 = vmul.f32 %v7879_v22, %v4090_v40  ;;  %v5492_v53 = vor.u32 %v6316_v26, %v5491_v15 }
 0x41e   : > { %v3753_v56 = vpop.f32.mrf.mxu2 }
 0x41f   : > { %v3754_v33 = vadd.f32 %v3753_v56, %v3585_v61  ;;  %v3922_v37 = vpop.f32.mrf.mxu3  ;;  %v4285_v2 = vadd.f32 %v7891_v57, %v4217_v29  ;;  %v6319_v29 = vld [vmem:[%s7152_s13 + $0x68c] sm:$0xf] }
 0x420   : > { %v3587_v50 = vpop.f32.mrf.mxu1 }
 0x421   : > { %v3923_v31 = vadd.f32 %v3922_v37, %v3754_v33  ;;  %v3588_v10 = vadd.f32 %v3587_v50, %v7615_v44  ;;  %v4349_v12 = vmax.f32 %v4285_v2, 0.0  ;;  %v6311_v44 = vld [vmem:[%s7152_s13 + $0x64c] sm:$0xf]  ;;  %v5521_v2 = vld [vmem:[%s7152_s13 + $0x6b4] sm:$0xf0] }
 0x422   : > { %v4094_v30 = vpop.f32.mrf.mxu0 }
 0x423   : > { %v4092_v17 = vadd.f32 %v4091_v23, %v3923_v31  ;;  %3626 = vmatmul.bf16.gmra.mxu1 %v5444_v21  ;;  %3795 = vmatmul.bf16.gmra.mxu2 %v5448_v41  ;;  %v5488_v23 = vor.u32 %v6311_v44, %v5485_v0  ;;  %v5513_v31 = vld [vmem:[%s7152_s13 + $0x6ac] sm:$0xf0] }
 0x424   : > { %3964 = vmatmul.bf16.gmra.mxu3 %v5452_v43 }
 0x425   : > { %4133 = vmatmul.bf16.gmra.mxu0 %v5456_v52  ;;  %v4218_v28 = vmul.f32 %v7879_v22, %v4092_v17  ;;  %v5477_v22 = vld [vmem:[%s7152_s13 + $0x664] sm:$0xf0]  ;;  %v6324_v17 = vld [vmem:[%s7152_s13 + $0x6b0] sm:$0xf0] }
 0x426   : > { %v3756_v46 = vpop.f32.mrf.mxu2  ;;  %v5480_v27 = vor.u32 %v6310_v35, %v5477_v22 }
 0x427   : > { %v4286_v16 = vadd.f32 %v7891_v57, %v4218_v28  ;;  %v3757_v58 = vadd.f32 %v3756_v46, %v3588_v10  ;;  %v3925_v60 = vpop.f32.mrf.mxu3  ;;  %v5527_v46 = vld [vmem:[%s7152_s13 + $0x698] sm:$0xf] }
 0x428   : > { %v3589_v8 = vpop.f32.mrf.mxu1 }
 0x429   : > { %v4350_v62 = vmax.f32 %v4286_v16, 0.0  ;;  %v3926_v32 = vadd.f32 %v3925_v60, %v3757_v58  ;;  %v3590_v57 = vadd.f32 %v3589_v8, %v7624_v42  ;;  %v8093_v42 = vld [vmem:[#allocation8] ss:$0 sm:$0xff]  ;;  %v6325_v16 = vld [vmem:[%s7152_s13 + $0x6b8] sm:$0xf0] }
 0x42a   : > { %v4096_v36 = vpop.f32.mrf.mxu0 }
 0x42b   : > { %v6534_v59 = vpack.c.bf16 %v4350_v62, %v4349_v12  ;;  %v4095_v3 = vadd.f32 %v4094_v30, %v3926_v32  ;;  %v5519_v30 = vld [vmem:[%s7152_s13 + $0x690] sm:$0xf]  ;;  %v5516_v12 = vor.u32 %v6319_v29, %v5513_v31 }
 0x42c   : > { %v5520_v62 = vor.u32 %v6324_v17, %v5519_v30 }
 0x42d   : > { %6642 = vst [vmem:[%s7903_s23 + $0x60] sm:$0xff] %v6534_v59   ;;  %v4219_v51 = vmul.f32 %v8090_v7, %v4095_v3  ;;  %v5528_v59 = vor.u32 %v6325_v16, %v5527_v46 }
 0x42e   : > { %v3758_v49 = vpop.f32.mrf.mxu2 }
 0x42f   : > { %v3759_v19 = vadd.f32 %v3758_v49, %v3590_v57  ;;  %v3927_v20 = vpop.f32.mrf.mxu3  ;;  %v4287_v11 = vadd.f32 %v8093_v42, %v4219_v51  ;;  %v5555_v51 = vld [vmem:[%s7152_s13 + $0x6d8] sm:$0xf] }
 0x430   : > { %v3592_v25 = vpop.f32.mrf.mxu1 }
 0x431   : > { %v3928_v1 = vadd.f32 %v3927_v20, %v3759_v19  ;;  %v3593_v61 = vadd.f32 %v3592_v25, %v7629_v14  ;;  %v4351_v21 = vmax.f32 %v4287_v11, 0.0  ;;  %v6320_v14 = vld [vmem:[%s7152_s13 + $0x694] sm:$0xf] }
 0x432   : > { %v4099_v5 = vpop.f32.mrf.mxu0 }
 0x433   : > { %v4097_v6 = vadd.f32 %v4096_v36, %v3928_v1  ;;  %3631 = vmatmul.bf16.gmra.mxu1 %v5480_v27  ;;  %3800 = vmatmul.bf16.gmra.mxu2 %v5484_v63  ;;  %v5524_v36 = vor.u32 %v6320_v14, %v5521_v2  ;;  %v6333_v1 = vld [vmem:[%s7152_s13 + $0x6f8] sm:$0xf0] }
 0x434   : > { %3969 = vmatmul.bf16.gmra.mxu3 %v5488_v23  ;;  %v6328_v23 = vld [vmem:[%s7152_s13 + $0x6d4] sm:$0xf] }
 0x435   : > { %4138 = vmatmul.bf16.gmra.mxu0 %v5492_v53  ;;  %v4220_v40 = vmul.f32 %v8090_v7, %v4097_v6  ;;  %v5549_v53 = vld [vmem:[%s7152_s13 + $0x6f4] sm:$0xf0] }
 0x436   : > { %v3761_v13 = vpop.f32.mrf.mxu2 }
 0x437   : > { %v4288_v39 = vadd.f32 %v8093_v42, %v4220_v40  ;;  %v3762_v56 = vadd.f32 %v3761_v13, %v3593_v61  ;;  %v3930_v33 = vpop.f32.mrf.mxu3  ;;  %v5563_v40 = vld [vmem:[%s7152_s13 + $0x6e0] sm:$0xf]  ;;  %v6334_v61 = vld [vmem:[%s7152_s13 + $0x700] sm:$0xf0] }
 0x438   : > { %v3594_v37 = vpop.f32.mrf.mxu1 }
 0x439   : > { %v4352_v41 = vmax.f32 %v4288_v39, 0.0  ;;  %v3931_v50 = vadd.f32 %v3930_v33, %v3762_v56  ;;  %v3595_v10 = vadd.f32 %v3594_v37, %v7638_v54  ;;  %v5552_v33 = vor.u32 %v6328_v23, %v5549_v53 }
 0x43a   : > { %v4101_v43 = vpop.f32.mrf.mxu0  ;;  %v5556_v37 = vor.u32 %v6333_v1, %v5555_v51 }
 0x43b   : > { %v6539_v52 = vpack.c.bf16 %v4352_v41, %v4351_v21  ;;  %v4100_v28 = vadd.f32 %v4099_v5, %v3931_v50  ;;  %v5557_v5 = vld [vmem:[%s7152_s13 + $0x6fc] sm:$0xf0]  ;;  %v5564_v50 = vor.u32 %v6334_v61, %v5563_v40 }
 0x43d   : > { %6643 = vst [vmem:[%s7903_s23 + $0x68] sm:$0xff] %v6539_v52   ;;  %v4221_v35 = vmul.f32 %v8090_v7, %v4100_v28 }
 0x43e   : > { %v3763_v58 = vpop.f32.mrf.mxu2 }
 0x43f   : > { %v3764_v60 = vadd.f32 %v3763_v58, %v3595_v10  ;;  %v3932_v8 = vpop.f32.mrf.mxu3  ;;  %v4289_v54 = vadd.f32 %v8093_v42, %v4221_v35  ;;  %v5593_v35 = vld [vmem:[%s7152_s13 + $0x744] sm:$0xf0] }
 0x440   : > { %v3597_v32 = vpop.f32.mrf.mxu1 }
 0x441   : > { %v3933_v22 = vadd.f32 %v3932_v8, %v3764_v60  ;;  %v3598_v0 = vadd.f32 %v3597_v32, %v7643_v45  ;;  %v4353_v19 = vmax.f32 %v4289_v54, 0.0  ;;  %v6329_v45 = vld [vmem:[%s7152_s13 + $0x6dc] sm:$0xf]  ;;  %v5585_v32 = vld [vmem:[%s7152_s13 + $0x73c] sm:$0xf0] }
 0x442   : > { %v4104_v55 = vpop.f32.mrf.mxu0  ;;  %v5560_v41 = vor.u32 %v6329_v45, %v5557_v5  ;;  %v6343_v54 = vld [vmem:[%s7152_s13 + $0x748] sm:$0xf0] }
 0x443   : > { %v4102_v34 = vadd.f32 %v4101_v43, %v3933_v22  ;;  %3636 = vmatmul.bf16.gmra.mxu1 %v5516_v12  ;;  %3805 = vmatmul.bf16.gmra.mxu2 %v5520_v62  ;;  %v6337_v62 = vld [vmem:[%s7152_s13 + $0x71c] sm:$0xf] }
 0x444   : > { %3974 = vmatmul.bf16.gmra.mxu3 %v5524_v36  ;;  %v5591_v36 = vld [vmem:[%s7152_s13 + $0x720] sm:$0xf] }
 0x445   : > { %4143 = vmatmul.bf16.gmra.mxu0 %v5528_v59  ;;  %v4222_v44 = vmul.f32 %v8090_v7, %v4102_v34  ;;  %v6342_v59 = vld [vmem:[%s7152_s13 + $0x740] sm:$0xf0]  ;;  %v5599_v34 = vld [vmem:[%s7152_s13 + $0x728] sm:$0xf] }
 0x446   : > { %v3766_v3 = vpop.f32.mrf.mxu2 }
 0x447   : > { %v4290_v57 = vadd.f32 %v8093_v42, %v4222_v44  ;;  %v3767_v15 = vadd.f32 %v3766_v3, %v3598_v0  ;;  %v3935_v26 = vpop.f32.mrf.mxu3 }
 0x448   : > { %v3599_v49 = vpop.f32.mrf.mxu1 }
 0x449   : > { %v4354_v20 = vmax.f32 %v4290_v57, 0.0  ;;  %v3936_v27 = vadd.f32 %v3935_v26, %v3767_v15  ;;  %v3600_v11 = vadd.f32 %v3599_v49, %v7652_v9  ;;  %v5588_v57 = vor.u32 %v6337_v62, %v5585_v32 }
 0x44a   : > { %v4106_v63 = vpop.f32.mrf.mxu0  ;;  %v5592_v15 = vor.u32 %v6342_v59, %v5591_v36 }
 0x44b   : > { %v6544_v25 = vpack.c.bf16 %v4354_v20, %v4353_v19  ;;  %v4105_v6 = vadd.f32 %v4104_v55, %v3936_v27  ;;  %v5600_v19 = vor.u32 %v6343_v54, %v5599_v34 }
 0x44d   : > { %6644 = vst [vmem:[%s7903_s23 + $0x70] sm:$0xff] %v6544_v25   ;;  %v4223_v43 = vmul.f32 %v8090_v7, %v4105_v6 }
 0x44e   : > { %v3768_v13 = vpop.f32.mrf.mxu2 }
 0x44f   : > { %v3769_v39 = vadd.f32 %v3768_v13, %v3600_v11  ;;  %v3937_v56 = vpop.f32.mrf.mxu3  ;;  %v4291_v9 = vadd.f32 %v8093_v42, %v4223_v43 }
 0x450   : > { %v3602_v21 = vpop.f32.mrf.mxu1 }
 0x451   : > { %v3938_v52 = vadd.f32 %v3937_v56, %v3769_v39  ;;  %v3603_v17 = vadd.f32 %v3602_v21, %v7657_v47  ;;  %v4355_v16 = vmax.f32 %v4291_v9, 0.0  ;;  %v6338_v47 = vld [vmem:[%s7152_s13 + $0x724] sm:$0xf]  ;;  %v6351_v21 = vld [vmem:[%s7152_s13 + $0x788] sm:$0xf0] }
 0x452   : > { %v4109_v29 = vpop.f32.mrf.mxu0  ;;  %v5596_v49 = vor.u32 %v6338_v47, %v5593_v35  ;;  %v6346_v56 = vld [vmem:[%s7152_s13 + $0x764] sm:$0xf] }
 0x453   : > { %v4107_v31 = vadd.f32 %v4106_v63, %v3938_v52  ;;  %3641 = vmatmul.bf16.gmra.mxu1 %v5552_v33  ;;  %3810 = vmatmul.bf16.gmra.mxu2 %v5556_v37  ;;  %v5621_v33 = vld [vmem:[%s7152_s13 + $0x784] sm:$0xf0]  ;;  %v5635_v52 = vld [vmem:[%s7152_s13 + $0x770] sm:$0xf] }
 0x454   : > { %3979 = vmatmul.bf16.gmra.mxu3 %v5560_v41  ;;  %v5627_v37 = vld [vmem:[%s7152_s13 + $0x768] sm:$0xf]  ;;  %v5629_v41 = vld [vmem:[%s7152_s13 + $0x78c] sm:$0xf0] }
 0x455   : > { %4148 = vmatmul.bf16.gmra.mxu0 %v5564_v50  ;;  %v4224_v30 = vmul.f32 %v8090_v7, %v4107_v31 }
 0x456   : > { %v3771_v14 = vpop.f32.mrf.mxu2 }
 0x457   : > { %v4292_v2 = vadd.f32 %v8093_v42, %v4224_v30  ;;  %v3772_v28 = vadd.f32 %v3771_v14, %v3603_v17  ;;  %v3940_v10 = vpop.f32.mrf.mxu3  ;;  %v5624_v17 = vor.u32 %v6346_v56, %v5621_v33  ;;  %v5628_v14 = vor.u32 %v6351_v21, %v5627_v37 }
 0x458   : > { %v3604_v46 = vpop.f32.mrf.mxu1 }
 0x459   : > { %v4356_v58 = vmax.f32 %v4292_v2, 0.0  ;;  %v3941_v60 = vadd.f32 %v3940_v10, %v3772_v28  ;;  %v3605_v55 = vadd.f32 %v3604_v46, %v7666_v38 }
 0x45a   : > { %v4111_v8 = vpop.f32.mrf.mxu0 }
 0x45b   : > { %v6549_v12 = vpack.c.bf16 %v4356_v58, %v4355_v16  ;;  %v4110_v22 = vadd.f32 %v4109_v29, %v3941_v60  ;;  %v6352_v29 = vld [vmem:[%s7152_s13 + $0x790] sm:$0xf0] }
 0x45c   : > { %v5636_v10 = vor.u32 %v6352_v29, %v5635_v52  ;;  %v6364_v29 = vld [vmem:[%s7152_s13 + $0x7f4] sm:$0xf] }
 0x45d   : > { %6645 = vst [vmem:[%s7903_s23 + $0x78] sm:$0xff] %v6549_v12   ;;  %v4225_v20 = vmul.f32 %v8090_v7, %v4110_v22 }
 0x45e   : > { %v3773_v44 = vpop.f32.mrf.mxu2 }
 0x45f   : > { %v3774_v0 = vadd.f32 %v3773_v44, %v3605_v55  ;;  %v3942_v3 = vpop.f32.mrf.mxu3  ;;  %v4293_v38 = vadd.f32 %v8093_v42, %v4225_v20  ;;  %v6355_v44 = vld [vmem:[%s7152_s13 + $0x7ac] sm:$0xf]  ;;  %v6361_v20 = vld [vmem:[%s7152_s13 + $0x7d8] sm:$0xf0] }
 0x460   : > { %v3607_v26 = vpop.f32.mrf.mxu1 }
 0x461   : > { %v3943_v27 = vadd.f32 %v3942_v3, %v3774_v0  ;;  %v3608_v53 = vadd.f32 %v3607_v26, %v7671_v48  ;;  %v4357_v11 = vmax.f32 %v4293_v38, 0.0  ;;  %v6347_v48 = vld [vmem:[%s7152_s13 + $0x76c] sm:$0xf]  ;;  %v5657_v0 = vld [vmem:[%s7152_s13 + $0x7cc] sm:$0xf0] }
 0x462   : > { %v4114_v63 = vpop.f32.mrf.mxu0  ;;  %v5632_v28 = vor.u32 %v6347_v48, %v5629_v41  ;;  %v5663_v3 = vld [vmem:[%s7152_s13 + $0x7b0] sm:$0xf]  ;;  %v5660_v38 = vor.u32 %v6355_v44, %v5657_v0 }
 0x463   : > { %v4112_v25 = vadd.f32 %v4111_v8, %v3943_v27  ;;  %3646 = vmatmul.bf16.gmra.mxu1 %v5588_v57  ;;  %3815 = vmatmul.bf16.gmra.mxu2 %v5592_v15  ;;  %v6360_v57 = vld [vmem:[%s7152_s13 + $0x7d0] sm:$0xf0]  ;;  %v5665_v15 = vld [vmem:[%s7152_s13 + $0x7d4] sm:$0xf0] }
 0x464   : > { %3984 = vmatmul.bf16.gmra.mxu3 %v5596_v49 }
 0x465   : > { %4153 = vmatmul.bf16.gmra.mxu0 %v5600_v19  ;;  %v4226_v23 = vmul.f32 %v8090_v7, %v4112_v25  ;;  %v5671_v19 = vld [vmem:[%s7152_s13 + $0x7b8] sm:$0xf] }
 0x466   : > { %v3776_v51 = vpop.f32.mrf.mxu2 }
 0x467   : > { %v4294_v1 = vadd.f32 %v8093_v42, %v4226_v23  ;;  %v3777_v45 = vadd.f32 %v3776_v51, %v3608_v53  ;;  %v3945_v5 = vpop.f32.mrf.mxu3  ;;  %v5664_v23 = vor.u32 %v6360_v57, %v5663_v3 }
 0x468   : > { %v3609_v6 = vpop.f32.mrf.mxu1 }
 0x469   : > { %v4358_v40 = vmax.f32 %v4294_v1, 0.0  ;;  %v3946_v61 = vadd.f32 %v3945_v5, %v3777_v45  ;;  %v3610_v43 = vadd.f32 %v3609_v6, %v7680_v24  ;;  %v5672_v1 = vor.u32 %v6361_v20, %v5671_v19 }
 0x46a   : > { %v4116_v13 = vpop.f32.mrf.mxu0 }
 0x46b   : > { %v6554_v39 = vpack.c.bf16 %v4358_v40, %v4357_v11  ;;  %v4115_v50 = vadd.f32 %v4114_v63, %v3946_v61  ;;  %v8417_v61 = vld [vmem:[#allocation38_spill] sm:$0xff] }
 0x46d   : > { %6646 = vst [vmem:[%s7903_s23 + $0x80] sm:$0xff] %v6554_v39   ;;  %v4227_v46 = vmul.f32 %v8090_v7, %v4115_v50 }
 0x46e   : > { %v3778_v31 = vpop.f32.mrf.mxu2 }
 0x46f   : > { %v3779_v9 = vadd.f32 %v3778_v31, %v3610_v43  ;;  %v3947_v30 = vpop.f32.mrf.mxu3  ;;  %v4295_v24 = vadd.f32 %v8093_v42, %v4227_v46  ;;  %v5693_v31 = vld [vmem:[%s7152_s13 + $0x814] sm:$0xf0]  ;;  %v5707_v46 = vld [vmem:[%s7152_s13 + $0x800] sm:$0xf] }
 0x470   : > { %v3612_v2 = vpop.f32.mrf.mxu1 }
 0x471   : > { %v3948_v16 = vadd.f32 %v3947_v30, %v3779_v9  ;;  %v3613_v12 = vadd.f32 %v3612_v2, %v7685_v4  ;;  %v4359_v35 = vmax.f32 %v4295_v24, 0.0  ;;  %v6356_v4 = vld [vmem:[%s7152_s13 + $0x7b4] sm:$0xf]  ;;  %v5699_v9 = vld [vmem:[%s7152_s13 + $0x7f8] sm:$0xf] }
 0x472   : > { %v4119_v58 = vpop.f32.mrf.mxu0  ;;  %v5668_v51 = vor.u32 %v6356_v4, %v5665_v15  ;;  %v6369_v30 = vld [vmem:[%s7152_s13 + $0x818] sm:$0xf0] }
 0x473   : > { %v4117_v60 = vadd.f32 %v4116_v13, %v3948_v16  ;;  %3651 = vmatmul.bf16.gmra.mxu1 %v5624_v17  ;;  %3820 = vmatmul.bf16.gmra.mxu2 %v5628_v14  ;;  %v6365_v17 = vld [vmem:[%s7152_s13 + $0x7fc] sm:$0xf]  ;;  %v5701_v14 = vld [vmem:[%s7152_s13 + $0x81c] sm:$0xf0]  ;;  %v6370_v16 = vld [vmem:[%s7152_s13 + $0x820] sm:$0xf0] }
 0x474   : > { %3989 = vmatmul.bf16.gmra.mxu3 %v5632_v28  ;;  %v8418_v28 = vld [vmem:[#allocation39_spill] sm:$0xff] }
 0x475   : > { %4158 = vmatmul.bf16.gmra.mxu0 %v5636_v10  ;;  %v4228_v8 = vmul.f32 %v8090_v7, %v4117_v60 }
 0x476   : > { %v3781_v62 = vpop.f32.mrf.mxu2 }
 0x477   : > { %v4296_v32 = vadd.f32 %v8093_v42, %v4228_v8  ;;  %v3782_v36 = vadd.f32 %v3781_v62, %v3613_v12  ;;  %v3950_v59 = vpop.f32.mrf.mxu3  ;;  %v5696_v8 = vor.u32 %v6364_v29, %v5693_v31  ;;  %v5700_v12 = vor.u32 %v6369_v30, %v5699_v9  ;;  %v8421_v29 = vld [vmem:[#allocation42_spill] sm:$0xff] }
 0x478   : > { %v3614_v47 = vpop.f32.mrf.mxu1 }
 0x479   : > { %v4360_v22 = vmax.f32 %v4296_v32, 0.0  ;;  %v3951_v55 = vadd.f32 %v3950_v59, %v3782_v36  ;;  %v3615_v49 = vadd.f32 %v3614_v47, %v7694_v18  ;;  %v5704_v32 = vor.u32 %v6365_v17, %v5701_v14 }
 0x47a   : > { %v4121_v34 = vpop.f32.mrf.mxu0  ;;  %v5708_v36 = vor.u32 %v6370_v16, %v5707_v46 }
 0x47b   : > { %v6559_v54 = vpack.c.bf16 %v4360_v22, %v4359_v35  ;;  %v4120_v26 = vadd.f32 %v4119_v58, %v3951_v55 }
 0x47d   : > { %6647 = vst [vmem:[%s7903_s23 + $0x88] sm:$0xff] %v6559_v54   ;;  %v4229_v45 = vmul.f32 %v8090_v7, %v4120_v26  ;;  %v8419_v54 = vld [vmem:[#allocation40_spill] sm:$0xff] }
 0x47e   : > { %v3783_v27 = vpop.f32.mrf.mxu2 }
 0x47f   : > { %v3784_v63 = vadd.f32 %v3783_v27, %v3615_v49  ;;  %v3952_v25 = vpop.f32.mrf.mxu3  ;;  %v4297_v18 = vadd.f32 %v8093_v42, %v4229_v45  ;;  %v8420_v45 = vld [vmem:[#allocation41_spill] sm:$0xff] }
 0x480   : > { %v3617_v53 = vpop.f32.mrf.mxu1 }
 0x481   : > { %v3953_v5 = vadd.f32 %v3952_v25, %v3784_v63  ;;  %v3618_v13 = vadd.f32 %v3617_v53, %v8417_v61  ;;  %v4361_v48 = vmax.f32 %v4297_v18, 0.0  ;;  %v6373_v63 = vld [vmem:[%s7152_s13 + $0x83c] sm:$0xf]  ;;  %v5729_v25 = vld [vmem:[%s7152_s13 + $0x85c] sm:$0xf0] }
 0x482   : > { %v4124_v6 = vpop.f32.mrf.mxu0  ;;  %v6374_v53 = vld [vmem:[%s7152_s13 + $0x844] sm:$0xf] }
 0x483   : > { %v4122_v11 = vadd.f32 %v4121_v34, %v3953_v5  ;;  %3656 = vmatmul.bf16.gmra.mxu1 %v5660_v38  ;;  %3825 = vmatmul.bf16.gmra.mxu2 %v5664_v23  ;;  %v5735_v38 = vld [vmem:[%s7152_s13 + $0x840] sm:$0xf]  ;;  %v6378_v23 = vld [vmem:[%s7152_s13 + $0x860] sm:$0xf0] }
 0x484   : > { %3994 = vmatmul.bf16.gmra.mxu3 %v5668_v51  ;;  %v5737_v51 = vld [vmem:[%s7152_s13 + $0x864] sm:$0xf0] }
 0x485   : > { %4163 = vmatmul.bf16.gmra.mxu0 %v5672_v1  ;;  %v4230_v40 = vmul.f32 %v8090_v7, %v4122_v11  ;;  %v6379_v11 = vld [vmem:[%s7152_s13 + $0x868] sm:$0xf0] }
 0x486   : > { %v3786_v39 = vpop.f32.mrf.mxu2 }
 0x487   : > { %v4298_v56 = vadd.f32 %v8093_v42, %v4230_v40  ;;  %v3787_v33 = vadd.f32 %v3786_v39, %v3618_v13  ;;  %v3955_v37 = vpop.f32.mrf.mxu3  ;;  %v5732_v13 = vor.u32 %v6373_v63, %v5729_v25  ;;  %v5736_v39 = vor.u32 %v6378_v23, %v5735_v38  ;;  %v8423_v63 = vld [vmem:[#allocation28_spill] sm:$0xff] }
 0x488   : > { %v3619_v21 = vpop.f32.mrf.mxu1 }
 0x489   : > { %v4362_v41 = vmax.f32 %v4298_v56, 0.0  ;;  %v3956_v50 = vadd.f32 %v3955_v37, %v3787_v33  ;;  %v3620_v10 = vadd.f32 %v3619_v21, %v8418_v28  ;;  %v5740_v33 = vor.u32 %v6374_v53, %v5737_v51 }
 0x48a   : > { %v4126_v43 = vpop.f32.mrf.mxu0 }
 0x48b   : > { %v6564_v52 = vpack.c.bf16 %v4362_v41, %v4361_v48  ;;  %v4125_v2 = vadd.f32 %v4124_v6, %v3956_v50  ;;  %v5743_v6 = vld [vmem:[%s7152_s13 + $0x848] sm:$0xf] }
 0x48c   : > { %v5744_v37 = vor.u32 %v6379_v11, %v5743_v6 }
 0x48d   : > { %6648 = vst [vmem:[%s7903_s23 + $0x90] sm:$0xff] %v6564_v52   ;;  %v4231_v59 = vmul.f32 %v8090_v7, %v4125_v2 }
 0x48e   : > { %v3788_v58 = vpop.f32.mrf.mxu2 }
 0x48f   : > { %v3789_v60 = vadd.f32 %v3788_v58, %v3620_v10  ;;  %v3957_v24 = vpop.f32.mrf.mxu3  ;;  %v4299_v55 = vadd.f32 %v8093_v42, %v4231_v59  ;;  %v8422_v59 = vld [vmem:[#allocation26_spill] sm:$0xff] }
 0x490   : > { %v3622_v62 = vpop.f32.mrf.mxu1 }
 0x491   : > { %v3958_v47 = vadd.f32 %v3957_v24, %v3789_v60  ;;  %v3623_v44 = vadd.f32 %v3622_v62, %v8419_v54  ;;  %v4363_v26 = vmax.f32 %v4299_v55, 0.0  ;;  %v6382_v60 = vld [vmem:[%s7152_s13 + $0x884] sm:$0xf]  ;;  %v5765_v24 = vld [vmem:[%s7152_s13 + $0x8a4] sm:$0xf0] }
 0x492   : > { %v4129_v35 = vpop.f32.mrf.mxu0  ;;  %v6383_v62 = vld [vmem:[%s7152_s13 + $0x88c] sm:$0xf] }
 0x493   : > { %v4127_v22 = vadd.f32 %v4126_v43, %v3958_v47  ;;  %3661 = vmatmul.bf16.gmra.mxu1 %v5696_v8  ;;  %3830 = vmatmul.bf16.gmra.mxu2 %v5700_v12  ;;  %v5771_v8 = vld [vmem:[%s7152_s13 + $0x888] sm:$0xf]  ;;  %v6387_v12 = vld [vmem:[%s7152_s13 + $0x8a8] sm:$0xf0] }
 0x494   : > { %3999 = vmatmul.bf16.gmra.mxu3 %v5704_v32  ;;  %v5773_v32 = vld [vmem:[%s7152_s13 + $0x8ac] sm:$0xf0] }
 0x495   : > { %4168 = vmatmul.bf16.gmra.mxu0 %v5708_v36  ;;  %v4232_v34 = vmul.f32 %v8090_v7, %v4127_v22  ;;  %v6388_v22 = vld [vmem:[%s7152_s13 + $0x8b0] sm:$0xf0] }
 0x496   : > { %v3791_v0 = vpop.f32.mrf.mxu2 }
 0x497   : > { %v4300_v3 = vadd.f32 %v8093_v42, %v4232_v34  ;;  %v3792_v57 = vadd.f32 %v3791_v0, %v3623_v44  ;;  %v3960_v4 = vpop.f32.mrf.mxu3  ;;  %v5768_v44 = vor.u32 %v6382_v60, %v5765_v24  ;;  %v5772_v0 = vor.u32 %v6387_v12, %v5771_v8  ;;  %v8425_v60 = vld [vmem:[#allocation32_spill] sm:$0xff] }
 0x498   : > { %v3624_v15 = vpop.f32.mrf.mxu1 }
 0x499   : > { %v4364_v49 = vmax.f32 %v4300_v3, 0.0  ;;  %v3961_v19 = vadd.f32 %v3960_v4, %v3792_v57  ;;  %v3625_v5 = vadd.f32 %v3624_v15, %v8420_v45  ;;  %v5776_v57 = vor.u32 %v6383_v62, %v5773_v32 }
 0x49a   : > { %v4131_v20 = vpop.f32.mrf.mxu0 }
 0x49b   : > { %v6569_v27 = vpack.c.bf16 %v4364_v49, %v4363_v26  ;;  %v4130_v1 = vadd.f32 %v4129_v35, %v3961_v19  ;;  %v5779_v35 = vld [vmem:[%s7152_s13 + $0x890] sm:$0xf] }
 0x49c   : > { %v5780_v4 = vor.u32 %v6388_v22, %v5779_v35 }
 0x49d   : > { %6649 = vst [vmem:[%s7903_s23 + $0x98] sm:$0xff] %v6569_v27   ;;  %v4233_v21 = vmul.f32 %v8090_v7, %v4130_v1 }
 0x49e   : > { %v3793_v18 = vpop.f32.mrf.mxu2 }
 0x49f   : > { %v3794_v40 = vadd.f32 %v3793_v18, %v3625_v5  ;;  %v3962_v61 = vpop.f32.mrf.mxu3  ;;  %v4301_v43 = vadd.f32 %v8093_v42, %v4233_v21  ;;  %v8424_v21 = vld [vmem:[#allocation30_spill] sm:$0xff] }
 0x4a0   : > { %v3627_v56 = vpop.f32.mrf.mxu1 }
 0x4a1   : > { %v3963_v48 = vadd.f32 %v3962_v61, %v3794_v40  ;;  %v3628_v31 = vadd.f32 %v3627_v56, %v8421_v29  ;;  %v4365_v28 = vmax.f32 %v4301_v43, 0.0  ;;  %v6391_v40 = vld [vmem:[%s7152_s13 + $0x8cc] sm:$0xf]  ;;  %v5801_v61 = vld [vmem:[%s7152_s13 + $0x8ec] sm:$0xf0] }
 0x4a2   : > { %v4134_v41 = vpop.f32.mrf.mxu0  ;;  %v6392_v56 = vld [vmem:[%s7152_s13 + $0x8d4] sm:$0xf] }
 0x4a3   : > { %v4132_v50 = vadd.f32 %v4131_v20, %v3963_v48  ;;  %3666 = vmatmul.bf16.gmra.mxu1 %v5732_v13  ;;  %3835 = vmatmul.bf16.gmra.mxu2 %v5736_v39  ;;  %v5807_v13 = vld [vmem:[%s7152_s13 + $0x8d0] sm:$0xf]  ;;  %v6396_v39 = vld [vmem:[%s7152_s13 + $0x8f0] sm:$0xf0] }
 0x4a4   : > { %4004 = vmatmul.bf16.gmra.mxu3 %v5740_v33  ;;  %v5809_v33 = vld [vmem:[%s7152_s13 + $0x8f4] sm:$0xf0] }
 0x4a5   : > { %4173 = vmatmul.bf16.gmra.mxu0 %v5744_v37  ;;  %v4234_v52 = vmul.f32 %v8090_v7, %v4132_v50  ;;  %v6397_v50 = vld [vmem:[%s7152_s13 + $0x8f8] sm:$0xf0] }
 0x4a6   : > { %v3796_v9 = vpop.f32.mrf.mxu2 }
 0x4a7   : > { %v4302_v30 = vadd.f32 %v8093_v42, %v4234_v52  ;;  %v3797_v17 = vadd.f32 %v3796_v9, %v3628_v31  ;;  %v3965_v14 = vpop.f32.mrf.mxu3  ;;  %v5804_v31 = vor.u32 %v6391_v40, %v5801_v61  ;;  %v5808_v9 = vor.u32 %v6396_v39, %v5807_v13  ;;  %v8428_v61 = vld [vmem:[#allocation16_spill] sm:$0xff] }
 0x4a8   : > { %v3629_v2 = vpop.f32.mrf.mxu1 }
 0x4a9   : > { %v4366_v10 = vmax.f32 %v4302_v30, 0.0  ;;  %v3966_v46 = vadd.f32 %v3965_v14, %v3797_v17  ;;  %v3630_v47 = vadd.f32 %v3629_v2, %v8422_v59  ;;  %v5812_v17 = vor.u32 %v6392_v56, %v5809_v33 }
 0x4aa   : > { %v4136_v16 = vpop.f32.mrf.mxu0 }
 0x4ab   : > { %v6574_v58 = vpack.c.bf16 %v4366_v10, %v4365_v28  ;;  %v4135_v36 = vadd.f32 %v4134_v41, %v3966_v46  ;;  %v5815_v41 = vld [vmem:[%s7152_s13 + $0x8d8] sm:$0xf] }
 0x4ac   : > { %v5816_v14 = vor.u32 %v6397_v50, %v5815_v41 }
 0x4ad   : > { %6650 = vst [vmem:[%s7903_s23 + $0xa0] sm:$0xff] %v6574_v58   ;;  %v4235_v15 = vmul.f32 %v8090_v7, %v4135_v36 }
 0x4ae   : > { %v3798_v55 = vpop.f32.mrf.mxu2 }
 0x4af   : > { %v3799_v34 = vadd.f32 %v3798_v55, %v3630_v47  ;;  %v3967_v54 = vpop.f32.mrf.mxu3  ;;  %v4303_v20 = vadd.f32 %v8093_v42, %v4235_v15 }
 0x4b0   : > { %v3632_v3 = vpop.f32.mrf.mxu1 }
 0x4b1   : > { %v3968_v26 = vadd.f32 %v3967_v54, %v3799_v34  ;;  %v3633_v25 = vadd.f32 %v3632_v3, %v8423_v63  ;;  %v4367_v45 = vmax.f32 %v4303_v20, 0.0  ;;  %v8426_v54 = vld [vmem:[#allocation34_spill] sm:$0xff]  ;;  %v8427_v63 = vld [vmem:[#allocation15_spill] sm:$0xff] }
 0x4b2   : > { %v4139_v49 = vpop.f32.mrf.mxu0 }
 0x4b3   : > { %v4137_v19 = vadd.f32 %v4136_v16, %v3968_v26  ;;  %3671 = vmatmul.bf16.gmra.mxu1 %v5768_v44  ;;  %3840 = vmatmul.bf16.gmra.mxu2 %v5772_v0 }
 0x4b4   : > { %4009 = vmatmul.bf16.gmra.mxu3 %v5776_v57 }
 0x4b5   : > { %4178 = vmatmul.bf16.gmra.mxu0 %v5780_v4  ;;  %v4236_v27 = vmul.f32 %v8090_v7, %v4137_v19 }
 0x4b6   : > { %v3801_v38 = vpop.f32.mrf.mxu2 }
 0x4b7   : > { %v4304_v23 = vadd.f32 %v8093_v42, %v4236_v27  ;;  %v3802_v53 = vadd.f32 %v3801_v38, %v3633_v25  ;;  %v3970_v51 = vpop.f32.mrf.mxu3 }
 0x4b8   : > { %v3634_v1 = vpop.f32.mrf.mxu1 }
 0x4b9   : > { %v4368_v5 = vmax.f32 %v4304_v23, 0.0  ;;  %v3971_v6 = vadd.f32 %v3970_v51, %v3802_v53  ;;  %v3635_v48 = vadd.f32 %v3634_v1, %v8424_v21 }
 0x4ba   : > { %v4141_v11 = vpop.f32.mrf.mxu0 }
 0x4bb   : > { %v6579_v18 = vpack.c.bf16 %v4368_v5, %v4367_v45  ;;  %v4140_v37 = vadd.f32 %v4139_v49, %v3971_v6 }
 0x4bd   : > { %6651 = vst [vmem:[%s7903_s23 + $0xa8] sm:$0xff] %v6579_v18   ;;  %v4237_v2 = vmul.f32 %v8090_v7, %v4140_v37 }
 0x4be   : > { %v3803_v43 = vpop.f32.mrf.mxu2 }
 0x4bf   : > { %v3804_v52 = vadd.f32 %v3803_v43, %v3635_v48  ;;  %v3972_v29 = vpop.f32.mrf.mxu3  ;;  %v4305_v16 = vadd.f32 %v8093_v42, %v4237_v2 }
 0x4c0   : > { %v3637_v30 = vpop.f32.mrf.mxu1 }
 0x4c1   : > { %v3973_v28 = vadd.f32 %v3972_v29, %v3804_v52  ;;  %v3638_v24 = vadd.f32 %v3637_v30, %v8425_v60  ;;  %v4369_v59 = vmax.f32 %v4305_v16, 0.0  ;;  %v8429_v29 = vld [vmem:[#allocation17_spill] sm:$0xff] }
 0x4c2   : > { %v4144_v10 = vpop.f32.mrf.mxu0 }
 0x4c3   : > { %v4142_v46 = vadd.f32 %v4141_v11, %v3973_v28  ;;  %3676 = vmatmul.bf16.gmra.mxu1 %v5804_v31  ;;  %3845 = vmatmul.bf16.gmra.mxu2 %v5808_v9 }
 0x4c4   : > { %4014 = vmatmul.bf16.gmra.mxu3 %v5812_v17 }
 0x4c5   : > { %4183 = vmatmul.bf16.gmra.mxu0 %v5816_v14  ;;  %v4238_v58 = vmul.f32 %v8090_v7, %v4142_v46 }
 0x4c6   : > { %v3806_v8 = vpop.f32.mrf.mxu2 }
 0x4c7   : > { %v4306_v12 = vadd.f32 %v8093_v42, %v4238_v58  ;;  %v3807_v62 = vadd.f32 %v3806_v8, %v3638_v24  ;;  %v3975_v32 = vpop.f32.mrf.mxu3  ;;  %v8430_v24 = vld [vmem:[#allocation18_spill] sm:$0xff] }
 0x4c8   : > { %v3639_v36 = vpop.f32.mrf.mxu1 }
 0x4c9   : > { %v4370_v47 = vmax.f32 %v4306_v12, 0.0  ;;  %v3976_v35 = vadd.f32 %v3975_v32, %v3807_v62  ;;  %v3640_v44 = vadd.f32 %v3639_v36, %v8426_v54  ;;  %v8431_v54 = vld [vmem:[#allocation19_spill] sm:$0xff] }
 0x4ca   : > { %v4146_v22 = vpop.f32.mrf.mxu0 }
 0x4cb   : > { %v6584_v55 = vpack.c.bf16 %v4370_v47, %v4369_v59  ;;  %v4145_v34 = vadd.f32 %v4144_v10, %v3976_v35 }
 0x4cd   : > { %6652 = vst [vmem:[%s7903_s23 + $0xb0] sm:$0xff] %v6584_v55   ;;  %v4239_v15 = vmul.f32 %v8090_v7, %v4145_v34 }
 0x4ce   : > { %v3808_v0 = vpop.f32.mrf.mxu2 }
 0x4cf   : > { %v3809_v3 = vadd.f32 %v3808_v0, %v3640_v44  ;;  %v3977_v57 = vpop.f32.mrf.mxu3  ;;  %v4307_v20 = vadd.f32 %v8093_v42, %v4239_v15 }
 0x4d0   : > { %v3642_v4 = vpop.f32.mrf.mxu1 }
 0x4d1   : > { %v3978_v26 = vadd.f32 %v3977_v57, %v3809_v3  ;;  %v3643_v25 = vadd.f32 %v3642_v4, %v8427_v63  ;;  %v4371_v45 = vmax.f32 %v4307_v20, 0.0 }
 0x4d2   : > { %v4149_v49 = vpop.f32.mrf.mxu0 }
 0x4d3   : > { %v4147_v19 = vadd.f32 %v4146_v22, %v3978_v26 }
 0x4d5   : > { %v4240_v27 = vmul.f32 %v8090_v7, %v4147_v19 }
 0x4d6   : > { %v3811_v38 = vpop.f32.mrf.mxu2 }
 0x4d7   : > { %v4308_v23 = vadd.f32 %v8093_v42, %v4240_v27  ;;  %v3812_v53 = vadd.f32 %v3811_v38, %v3643_v25  ;;  %v3980_v51 = vpop.f32.mrf.mxu3  ;;  %v8432_v25 = vld [vmem:[#allocation20_spill] sm:$0xff] }
 0x4d8   : > { %v3644_v1 = vpop.f32.mrf.mxu1 }
 0x4d9   : > { %v4372_v5 = vmax.f32 %v4308_v23, 0.0  ;;  %v3981_v6 = vadd.f32 %v3980_v51, %v3812_v53  ;;  %v3645_v13 = vadd.f32 %v3644_v1, %v8428_v61  ;;  %v8433_v61 = vld [vmem:[#allocation21_spill] sm:$0xff] }
 0x4da   : > { %v4151_v11 = vpop.f32.mrf.mxu0 }
 0x4db   : > { %v6589_v18 = vpack.c.bf16 %v4372_v5, %v4371_v45  ;;  %v4150_v40 = vadd.f32 %v4149_v49, %v3981_v6 }
 0x4dd   : > { %6653 = vst [vmem:[%s7903_s23 + $0xb8] sm:$0xff] %v6589_v18   ;;  %v4241_v21 = vmul.f32 %v8090_v7, %v4150_v40 }
 0x4de   : > { %v3813_v39 = vpop.f32.mrf.mxu2 }
 0x4df   : > { %v3814_v56 = vadd.f32 %v3813_v39, %v3645_v13  ;;  %v3982_v33 = vpop.f32.mrf.mxu3  ;;  %v4309_v43 = vadd.f32 %v8093_v42, %v4241_v21 }
 0x4e0   : > { %v3647_v37 = vpop.f32.mrf.mxu1 }
 0x4e1   : > { %v3983_v48 = vadd.f32 %v3982_v33, %v3814_v56  ;;  %v3648_v31 = vadd.f32 %v3647_v37, %v8429_v29  ;;  %v4373_v28 = vmax.f32 %v4309_v43, 0.0 }
 0x4e2   : > { %v4154_v41 = vpop.f32.mrf.mxu0 }
 0x4e3   : > { %v4152_v50 = vadd.f32 %v4151_v11, %v3983_v48 }
 0x4e5   : > { %v4242_v52 = vmul.f32 %v8090_v7, %v4152_v50 }
 0x4e6   : > { %v3816_v9 = vpop.f32.mrf.mxu2 }
 0x4e7   : > { %v4310_v30 = vadd.f32 %v8093_v42, %v4242_v52  ;;  %v3817_v17 = vadd.f32 %v3816_v9, %v3648_v31  ;;  %v3985_v14 = vpop.f32.mrf.mxu3  ;;  %v8434_v31 = vld [vmem:[#allocation22_spill] sm:$0xff] }
 0x4e8   : > { %v3649_v2 = vpop.f32.mrf.mxu1 }
 0x4e9   : > { %v4374_v10 = vmax.f32 %v4310_v30, 0.0  ;;  %v3986_v46 = vadd.f32 %v3985_v14, %v3817_v17  ;;  %v3650_v8 = vadd.f32 %v3649_v2, %v8430_v24  ;;  %v8435_v24 = vld [vmem:[#allocation23_spill] sm:$0xff] }
 0x4ea   : > { %v4156_v16 = vpop.f32.mrf.mxu0 }
 0x4eb   : > { %v6594_v58 = vpack.c.bf16 %v4374_v10, %v4373_v28  ;;  %v4155_v60 = vadd.f32 %v4154_v41, %v3986_v46 }
 0x4ed   : > { %6654 = vst [vmem:[%s7903_s23 + $0xc0] sm:$0xff] %v6594_v58   ;;  %v4243_v59 = vmul.f32 %v8090_v7, %v4155_v60 }
 0x4ee   : > { %v3818_v12 = vpop.f32.mrf.mxu2 }
 0x4ef   : > { %v3819_v62 = vadd.f32 %v3818_v12, %v3650_v8  ;;  %v3987_v32 = vpop.f32.mrf.mxu3  ;;  %v4311_v55 = vadd.f32 %v8093_v42, %v4243_v59 }
 0x4f0   : > { %v3652_v36 = vpop.f32.mrf.mxu1 }
 0x4f1   : > { %v3988_v47 = vadd.f32 %v3987_v32, %v3819_v62  ;;  %v3653_v44 = vadd.f32 %v3652_v36, %v8431_v54  ;;  %v4375_v26 = vmax.f32 %v4311_v55, 0.0 }
 0x4f2   : > { %v4159_v35 = vpop.f32.mrf.mxu0 }
 0x4f3   : > { %v4157_v22 = vadd.f32 %v4156_v16, %v3988_v47 }
 0x4f5   : > { %v4244_v34 = vmul.f32 %v8090_v7, %v4157_v22 }
 0x4f6   : > { %v3821_v0 = vpop.f32.mrf.mxu2 }
 0x4f7   : > { %v4312_v3 = vadd.f32 %v8093_v42, %v4244_v34  ;;  %v3822_v57 = vadd.f32 %v3821_v0, %v3653_v44  ;;  %v3990_v4 = vpop.f32.mrf.mxu3  ;;  %v8436_v44 = vld [vmem:[#allocation24_spill] sm:$0xff] }
 0x4f8   : > { %v3654_v15 = vpop.f32.mrf.mxu1 }
 0x4f9   : > { %v4376_v49 = vmax.f32 %v4312_v3, 0.0  ;;  %v3991_v19 = vadd.f32 %v3990_v4, %v3822_v57  ;;  %v3655_v38 = vadd.f32 %v3654_v15, %v8432_v25 }
 0x4fa   : > { %v4161_v20 = vpop.f32.mrf.mxu0 }
 0x4fb   : > { %v6599_v27 = vpack.c.bf16 %v4376_v49, %v4375_v26  ;;  %v4160_v63 = vadd.f32 %v4159_v35, %v3991_v19 }
 0x4fd   : > { %6655 = vst [vmem:[%s7903_s23 + $0xc8] sm:$0xff] %v6599_v27   ;;  %v4245_v45 = vmul.f32 %v8090_v7, %v4160_v63  ;;  %v8273_v63 = vld [vmem:[#allocation7] ss:$0 sm:$0xff] }
 0x4fe   : > { %v3823_v23 = vpop.f32.mrf.mxu2 }
 0x4ff   : > { %v3824_v53 = vadd.f32 %v3823_v23, %v3655_v38  ;;  %v3992_v51 = vpop.f32.mrf.mxu3  ;;  %v4313_v18 = vadd.f32 %v8093_v42, %v4245_v45  ;;  %v8437_v38 = vld [vmem:[#allocation25_spill] sm:$0xff] }
 0x500   : > { %v3657_v1 = vpop.f32.mrf.mxu1 }
 0x501   : > { %v3993_v5 = vadd.f32 %v3992_v51, %v3824_v53  ;;  %v3658_v13 = vadd.f32 %v3657_v1, %v8433_v61  ;;  %v4377_v48 = vmax.f32 %v4313_v18, 0.0 }
 0x502   : > { %v4164_v6 = vpop.f32.mrf.mxu0 }
 0x503   : > { %v4162_v11 = vadd.f32 %v4161_v20, %v3993_v5 }
 0x505   : > { %v4246_v40 = vmul.f32 %v8090_v7, %v4162_v11 }
 0x506   : > { %v3826_v39 = vpop.f32.mrf.mxu2 }
 0x507   : > { %v4314_v56 = vadd.f32 %v8093_v42, %v4246_v40  ;;  %v3827_v33 = vadd.f32 %v3826_v39, %v3658_v13  ;;  %v3995_v37 = vpop.f32.mrf.mxu3  ;;  %v8438_v13 = vld [vmem:[#allocation27_spill] sm:$0xff] }
 0x508   : > { %v3659_v21 = vpop.f32.mrf.mxu1 }
 0x509   : > { %v4378_v41 = vmax.f32 %v4314_v56, 0.0  ;;  %v3996_v50 = vadd.f32 %v3995_v37, %v3827_v33  ;;  %v3660_v9 = vadd.f32 %v3659_v21, %v8434_v31  ;;  %v8439_v31 = vld [vmem:[#allocation29_spill] sm:$0xff] }
 0x50a   : > { %v4166_v43 = vpop.f32.mrf.mxu0 }
 0x50b   : > { %v6604_v52 = vpack.c.bf16 %v4378_v41, %v4377_v48  ;;  %v4165_v29 = vadd.f32 %v4164_v6, %v3996_v50 }
 0x50d   : > { %6656 = vst [vmem:[%s7903_s23 + $0xd0] sm:$0xff] %v6604_v52   ;;  %v4247_v28 = vmul.f32 %v8090_v7, %v4165_v29 }
 0x50e   : > { %v3828_v30 = vpop.f32.mrf.mxu2 }
 0x50f   : > { %v3829_v17 = vadd.f32 %v3828_v30, %v3660_v9  ;;  %v3997_v14 = vpop.f32.mrf.mxu3  ;;  %v4315_v58 = vadd.f32 %v8093_v42, %v4247_v28 }
 0x510   : > { %v3662_v2 = vpop.f32.mrf.mxu1 }
 0x511   : > { %v3998_v10 = vadd.f32 %v3997_v14, %v3829_v17  ;;  %v3663_v8 = vadd.f32 %v3662_v2, %v8435_v24  ;;  %v4379_v47 = vmax.f32 %v4315_v58, 0.0  ;;  %v8440_v24 = vld [vmem:[#allocation31_spill] sm:$0xff] }
 0x512   : > { %v4169_v46 = vpop.f32.mrf.mxu0 }
 0x513   : > { %v4167_v16 = vadd.f32 %v4166_v43, %v3998_v10  ;;  %v6793_v43 = vld [vmem:[#allocation8] ss:$0 sm:$0xff] }
 0x515   : > { %v4248_v60 = vmul.f32 %v8090_v7, %v4167_v16 }
 0x516   : > { %v3831_v12 = vpop.f32.mrf.mxu2 }
 0x517   : > { %v4316_v62 = vadd.f32 %v8093_v42, %v4248_v60  ;;  %v3832_v32 = vadd.f32 %v3831_v12, %v3663_v8  ;;  %v4000_v36 = vpop.f32.mrf.mxu3 }
 0x518   : > { %v3664_v59 = vpop.f32.mrf.mxu1 }
 0x519   : > { %v4380_v35 = vmax.f32 %v4316_v62, 0.0  ;;  %v4001_v22 = vadd.f32 %v4000_v36, %v3832_v32  ;;  %v3665_v0 = vadd.f32 %v3664_v59, %v8436_v44 }
 0x51a   : > { %v4171_v55 = vpop.f32.mrf.mxu0 }
 0x51b   : > { %v6609_v34 = vpack.c.bf16 %v4380_v35, %v4379_v47  ;;  %v4170_v54 = vadd.f32 %v4169_v46, %v4001_v22 }
 0x51d   : > { %6657 = vst [vmem:[%s7903_s23 + $0xd8] sm:$0xff] %v6609_v34   ;;  %v4249_v26 = vmul.f32 %v8090_v7, %v4170_v54  ;;  %v8441_v54 = vld [vmem:[#allocation33_spill] sm:$0xff] }
 0x51e   : > { %v3833_v3 = vpop.f32.mrf.mxu2 }
 0x51f   : > { %v3834_v57 = vadd.f32 %v3833_v3, %v3665_v0  ;;  %v4002_v4 = vpop.f32.mrf.mxu3  ;;  %v4317_v27 = vadd.f32 %v8093_v42, %v4249_v26 }
 0x520   : > { %v3667_v15 = vpop.f32.mrf.mxu1 }
 0x521   : > { %v4003_v49 = vadd.f32 %v4002_v4, %v3834_v57  ;;  %v3668_v23 = vadd.f32 %v3667_v15, %v8437_v38  ;;  %v4381_v6 = vmax.f32 %v4317_v27, 0.0  ;;  %v8442_v38 = vld [vmem:[#allocation35_spill] sm:$0xff] }
 0x522   : > { %v4174_v19 = vpop.f32.mrf.mxu0 }
 0x523   : > { %v4172_v20 = vadd.f32 %v4171_v55, %v4003_v49 }
 0x525   : > { %v4250_v25 = vmul.f32 %v8273_v63, %v4172_v20 }
 0x526   : > { %v3836_v53 = vpop.f32.mrf.mxu2 }
 0x527   : > { %v4318_v51 = vadd.f32 %v8093_v42, %v4250_v25  ;;  %v3837_v1 = vadd.f32 %v3836_v53, %v3668_v23  ;;  %v4005_v45 = vpop.f32.mrf.mxu3 }
 0x528   : > { %v3669_v5 = vpop.f32.mrf.mxu1 }
 0x529   : > { %v4382_v7 = vmax.f32 %v4318_v51, 0.0  ;;  %v4006_v11 = vadd.f32 %v4005_v45, %v3837_v1  ;;  %v3670_v39 = vadd.f32 %v3669_v5, %v8438_v13 }
 0x52a   : > { %v4176_v18 = vpop.f32.mrf.mxu0 }
 0x52b   : > { %v6614_v40 = vpack.c.bf16 %v4382_v7, %v4381_v6  ;;  %v4175_v61 = vadd.f32 %v4174_v19, %v4006_v11 }
 0x52d   : > { %6658 = vst [vmem:[%s7903_s23 + $0xe0] sm:$0xff] %v6614_v40   ;;  %v4251_v48 = vmul.f32 %v8273_v63, %v4175_v61 }
 0x52e   : > { %v3838_v56 = vpop.f32.mrf.mxu2 }
 0x52f   : > { %v3839_v33 = vadd.f32 %v3838_v56, %v3670_v39  ;;  %v4007_v37 = vpop.f32.mrf.mxu3  ;;  %v4319_v52 = vadd.f32 %v6793_v43, %v4251_v48 }
 0x530   : > { %v3672_v21 = vpop.f32.mrf.mxu1 }
 0x531   : > { %v4008_v41 = vadd.f32 %v4007_v37, %v3839_v33  ;;  %v3673_v9 = vadd.f32 %v3672_v21, %v8439_v31  ;;  %v4383_v10 = vmax.f32 %v4319_v52, 0.0 }
 0x532   : > { %v4179_v50 = vpop.f32.mrf.mxu0 }
 0x533   : > { %v4177_v42 = vadd.f32 %v4176_v18, %v4008_v41 }
 0x535   : > { %v4252_v29 = vmul.f32 %v8273_v63, %v4177_v42 }
 0x536   : > { %v3841_v30 = vpop.f32.mrf.mxu2 }
 0x537   : > { %v4320_v17 = vadd.f32 %v6793_v43, %v4252_v29  ;;  %v3842_v14 = vadd.f32 %v3841_v30, %v3673_v9  ;;  %v4010_v2 = vpop.f32.mrf.mxu3 }
 0x538   : > { %v3674_v28 = vpop.f32.mrf.mxu1 }
 0x539   : > { %v4384_v46 = vmax.f32 %v4320_v17, 0.0  ;;  %v4011_v16 = vadd.f32 %v4010_v2, %v3842_v14  ;;  %v3675_v8 = vadd.f32 %v3674_v28, %v8440_v24 }
 0x53a   : > { %v4181_v12 = vpop.f32.mrf.mxu0 }
 0x53b   : > { %v6619_v58 = vpack.c.bf16 %v4384_v46, %v4383_v10  ;;  %v4180_v60 = vadd.f32 %v4179_v50, %v4011_v16 }
 0x53d   : > { %6659 = vst [vmem:[%s7903_s23 + $0xe8] sm:$0xff] %v6619_v58   ;;  %v4253_v47 = vmul.f32 %v8273_v63, %v4180_v60 }
 0x53e   : > { %v3843_v62 = vpop.f32.mrf.mxu2 }
 0x53f   : > { %v3844_v32 = vadd.f32 %v3843_v62, %v3675_v8  ;;  %v4012_v36 = vpop.f32.mrf.mxu3  ;;  %v4321_v55 = vadd.f32 %v6793_v43, %v4253_v47 }
 0x540   : > { %v3677_v59 = vpop.f32.mrf.mxu1 }
 0x541   : > { %v4013_v35 = vadd.f32 %v4012_v36, %v3844_v32  ;;  %v3678_v44 = vadd.f32 %v3677_v59, %v8441_v54  ;;  %v4385_v26 = vmax.f32 %v4321_v55, 0.0 }
 0x542   : > { %v4184_v15 = vpop.f32.mrf.mxu0 }
 0x543   : > { %v4182_v22 = vadd.f32 %v4181_v12, %v4013_v35 }
 0x545   : > { %v4254_v34 = vmul.f32 %v8273_v63, %v4182_v22 }
 0x546   : > { %v3846_v0 = vpop.f32.mrf.mxu2 }
 0x547   : > { %v4322_v3 = vadd.f32 %v6793_v43, %v4254_v34  ;;  %v3847_v57 = vadd.f32 %v3846_v0, %v3678_v44  ;;  %v4015_v4 = vpop.f32.mrf.mxu3 }
 0x548   : > { %v3679_v20 = vpop.f32.mrf.mxu1 }
 0x549   : > { %v4386_v49 = vmax.f32 %v4322_v3, 0.0  ;;  %v4016_v19 = vadd.f32 %v4015_v4, %v3847_v57  ;;  %v3680_v23 = vadd.f32 %v3679_v20, %v8442_v38 }
 0x54a   : > { %v4186_v6 = vpop.f32.mrf.mxu0 }
 0x54b   : > { %v6624_v27 = vpack.c.bf16 %v4386_v49, %v4385_v26  ;;  %v4185_v25 = vadd.f32 %v4184_v15, %v4016_v19 }
 0x54d   : > { %6660 = vst [vmem:[%s7903_s23 + $0xf0] sm:$0xff] %v6624_v27   ;;  %v4255_v45 = vmul.f32 %v8273_v63, %v4185_v25 }
 0x54e   : > { %v3848_v53 = vpop.f32.mrf.mxu2 }
 0x54f   : > { %v3849_v51 = vadd.f32 %v3848_v53, %v3680_v23  ;;  %v4017_v1 = vpop.f32.mrf.mxu3  ;;  %v4323_v11 = vadd.f32 %v6793_v43, %v4255_v45 }
 0x551   : > { %v4018_v5 = vadd.f32 %v4017_v1, %v3849_v51  ;;  %v4387_v61 = vmax.f32 %v4323_v11, 0.0 }
 0x553   : > { %v4187_v7 = vadd.f32 %v4186_v6, %v4018_v5 }
 0x555   : > { %v4256_v18 = vmul.f32 %v8273_v63, %v4187_v7 }
 0x557   : > { %v4324_v40 = vadd.f32 %v6793_v43, %v4256_v18 }
 0x559   : > { %v4388_v13 = vmax.f32 %v4324_v40, 0.0 }
 0x55b   : > { %v6629_v39 = vpack.c.bf16 %v4388_v13, %v4387_v61 }
 0x55d   : > { %6661 = vst [vmem:[%s7903_s23 + $0xf8] sm:$0xff] %v6629_v39  }
 0x55e   : > { %6941 = shalt.err (!%p6938_p12)
}
 0x55f   : > { %s7013_s6 = smov 64   ;;  %s7014_s13 = smov 4  }
 0x560   : > { %6703 = dma.vmem_to_hbm [thread:$0]  (%p7130_p3), %s4532_s14, 4096, %s4534_s21, %s4518_s18, %s7013_s6, %s7013_s6, %s7014_s13  }
 0x561 PF: > { %p6730_p13 = scmp.ge.s32.totalorder %s7004_s20, 2  ;;  %s4548_s1 = sand.u32 1, %s6984_s15  }
 0x562   : > { %s4549_s23 = scalar_lea.sflag [#allocation4], %s4548_s1 }
 0x563   : > { %p6720_p0 = pnand %p6730_p13, %p7089_p6 }
 0x565   : > { %p6721_p5 = pneg %p6720_p0 }
 0x567   : > { %6979 = dma.done.wait (%p6721_p5), %s4549_s23, 4096  }
 0x568   : > { %6981 = vsyncadd (%p6721_p5), %s4549_s23, 4294963200  ;;  %s22_s20 = sadd.s32 1, %s7004_s20   ;;  %s8443_s15 = smov %s6988_s16 }
 0x569   : > { %p19_p7 = scmp.ge.s32.totalorder %s22_s20, 34   ;;  %s8444_s16 = smov %s6992_s17 }
 0x56a   : > { %s8445_s17 = smov %s7139_s11  ;;  %s8446_s18 = smov %s7000_s19 }
 0x56b   : > { %s8447_s19 = smov %s8449_s29  ;;  %21 = sbr.rel (!%p19_p7) target bundleno = 10 (0xa), region = 96 }
 0x570   :  { %4555 = vsyncpa [#allocation3], 1 }
 0x571   :  { %4557 = vsyncpa [#allocation3 + $0x1], 1 }
 0x572   :  { %4558 = vsyncpa [#allocation6], 1 }
 0x573   :  { %4559 = vsyncpa [#allocation9], 1 }
 0x574   :  { %4560 = vsyncpa [#allocation4], 1 }
 0x575   :  { %4562 = vsyncpa [#allocation4 + $0x1], 1 }

</bundles_post_ra>
